<compile_context>
chip_gen: v7x
topology: tpu7x:2x2x1
jax: 0.10.0
libtpu: 0.0.40
codegen_flags: <defaults>
</compile_context>

<pallas_src>
import functools

import jax
import jax.numpy as jnp
from jax import lax
from jax.experimental import pallas as pl
from jax.experimental.pallas import tpu as pltpu

_LANE = 128


def _round_up(v: int, m: int = _LANE) -> int:
    return ((v + m - 1) // m) * m


# ----------------------------------------------------------------------------
# Fused kernel: conv1 + ReLU + conv2 + ReLU + Linear for one image block.
# Row-slab layout inside a block: row = h * block_n + n_local, lane = w*C + c.
# ----------------------------------------------------------------------------
def _encoder_fused_kernel(*refs, block_n: int, n_layers: int):
    x_ref = refs[0]
    conv_refs = refs[1:1 + 2 * n_layers]
    wfc_ref = refs[1 + 2 * n_layers]        # (h_final, L_pad, out_pad) bf16
    bfc_ref = refs[2 + 2 * n_layers]        # (1, out_pad) f32
    o_ref = refs[3 + 2 * n_layers]          # (block_n, out_pad) f32

    f32, bf16 = jnp.float32, jnp.bfloat16
    rows = x_ref.shape[0]                   # img_h * block_n

    # --- conv stack: per-kh block-Toeplitz matmuls on the MXU.  The h-shift
    # is an XLU sublane roll by kh*block_n rows of the f32 slab; wrap-around
    # rows only land in garbage rows (h >= H_out) which are never consumed.
    act = x_ref[...].astype(f32)            # (rows, L0_pad)
    for li in range(n_layers):
        t_ref = conv_refs[2 * li]           # (ksize, K_pad, N_pad) bf16
        b_ref = conv_refs[2 * li + 1]       # (1, N_pad) f32
        ksize = t_ref.shape[0]
        acc = jnp.dot(act.astype(bf16), t_ref[0], preferred_element_type=f32)
        for kh in range(1, ksize):
            shifted = pltpu.roll(act, shift=rows - kh * block_n, axis=0)
            acc = acc + jnp.dot(shifted.astype(bf16), t_ref[kh],
                                preferred_element_type=f32)
        act = jnp.maximum(acc + b_ref[...], 0.0)   # padded lanes stay exactly 0

    # --- FC head:  out[n, :] = sum_h act[h*block_n + n, :] @ Wfc[h]  + b
    # (h, n) ordering makes each act_h a contiguous static row slice; only the
    # first h_final*block_n (valid) rows are read, so garbage rows never leak.
    h_final = wfc_ref.shape[0]
    out = jnp.zeros((block_n, o_ref.shape[1]), f32)
    for h in range(h_final):
        a_h = act[h * block_n:(h + 1) * block_n, :].astype(bf16)
        out = out + jnp.dot(a_h, wfc_ref[h], preferred_element_type=f32)
    o_ref[...] = (out + bfc_ref[...]).astype(o_ref.dtype)


# ----------------------------------------------------------------------------
# One-time parameter preparation (outside the hot path)
# ----------------------------------------------------------------------------
def _conv_toeplitz(w_oihw, w_in):
    """Per-kh block-Toeplitz matrices for the width-packed slab layout.

    T[kh, w_i*Cin + ci, w_o*Cout + co] = w[co, ci, kh, w_i - w_o]
    for 0 <= w_i - w_o < ksize_w, else 0.
    """
    cout, cin, ksh, ksw = w_oihw.shape
    w_out = w_in - ksw + 1
    w_t = w_oihw.transpose(2, 3, 1, 0)                      # (kh, kw, cin, cout)
    wi = jnp.arange(w_in)[:, None]
    wo = jnp.arange(w_out)[None, :]
    kw_idx = wi - wo                                        # (w_in, w_out)
    valid = (kw_idx >= 0) & (kw_idx < ksw)
    kw_c = jnp.clip(kw_idx, 0, ksw - 1)
    blocks = w_t[:, kw_c]                                   # (kh, w_in, w_out, cin, cout)
    blocks = blocks * valid[None, :, :, None, None].astype(w_t.dtype)
    return blocks.transpose(0, 1, 3, 2, 4).reshape(ksh, w_in * cin, w_out * cout)


def prepare_encoder_params(params, dim_in):
    """Convert torch-layout weights into the kernel layout (done once).

    Weights -> bf16 (MXU-native), biases stay f32 (added to the f32
    accumulator).  Lane/contraction dims zero-padded to multiples of 128 so
    MXU tiles and vector stores are fully dense.
    """
    c_in, img_h, img_w = dim_in
    prepped = {"conv": []}
    w_grid, h_grid, c_prev = img_w, img_h, c_in
    for (wk, bk) in params["convs"]:
        cout, cin, ksh, ksw = wk.shape
        assert cin == c_prev
        t = _conv_toeplitz(wk.astype(jnp.float32), w_grid)
        w_out = w_grid - ksw + 1
        k_dim, n_dim = w_grid * cin, w_out * cout
        k_pad, n_pad = _round_up(k_dim), _round_up(n_dim)
        t = jnp.pad(t, ((0, 0), (0, k_pad - k_dim), (0, n_pad - n_dim)))
        b_lane = jnp.pad(jnp.tile(bk.astype(jnp.float32), (w_out,)),
                         (0, n_pad - n_dim)).reshape(1, n_pad)
        prepped["conv"].append((t.astype(jnp.bfloat16), b_lane))
        w_grid, h_grid, c_prev = w_out, h_grid - ksh + 1, cout

    dim_out = params["fc_w"].shape[0]
    l_last, l_pad = w_grid * c_prev, _round_up(w_grid * c_prev)
    out_pad = _round_up(dim_out)
    # fc_w columns are torch NCHW-flatten order (c, h, w).  Re-lay per output
    # row h into the slab lane order:  Wfc[h, w*C + c, j] = fc_w[j, (c, h, w)].
    wf = params["fc_w"].astype(jnp.float32).reshape(dim_out, c_prev, h_grid, w_grid)
    wfc = wf.transpose(2, 3, 1, 0).reshape(h_grid, l_last, dim_out)
    wfc = jnp.pad(wfc, ((0, 0), (0, l_pad - l_last), (0, out_pad - dim_out)))
    prepped["fc_w"] = wfc.astype(jnp.bfloat16)
    prepped["fc_b"] = params["fc_b"].reshape(1, dim_out).astype(jnp.float32)
    return prepped


# ----------------------------------------------------------------------------
# Forward (single fused pallas_call, M-tiled over images)
# ----------------------------------------------------------------------------
def _vmem_budget_bytes():
    """Per-generation VMEM budget (~3/4 of physical: v5e/v6e ~96MiB, v7x ~48MiB)."""
    try:
        cap = int(pltpu.get_tpu_info().vmem_capacity_bytes)
    except Exception:
        cap = 64 * 1024 * 1024          # v7x-safe fallback
    return min((cap * 3) // 4, 100 * 1024 * 1024)


def _choose_block_n(n_batch, max_imgs):
    """Images per grid block: full batch if it fits, else a multiple-of-8
    divisor of the batch (keeps (8,128)-aligned blocks when n_blocks > 1)."""
    if n_batch <= max_imgs:
        return n_batch
    bn = (min(max_imgs, n_batch) // 8) * 8
    while bn >= 8:
        if n_batch % bn == 0:
            return bn
        bn -= 8
    # TODO(synk): pad the batch to a multiple of 8 images instead of failing.
    raise ValueError(
        f"Cannot tile batch={n_batch} into VMEM-sized blocks "
        f"(max {max_imgs} images/block).")


def encoder_forward(prepped, x_nchw):
    n, c, img_h, img_w = x_nchw.shape
    dim_out = prepped["fc_b"].shape[1]
    out_pad = prepped["fc_w"].shape[2]
    lane0 = img_w * c
    lane0_pad = prepped["conv"][0][0].shape[1]
    n_layers = len(prepped["conv"])
    # The FC contraction width must match the last conv layer's padded lanes.
    assert prepped["conv"][-1][0].shape[2] == prepped["fc_w"].shape[1]

    # ---- block sizing: weights resident, activation slab tiled over images.
    weight_arrays = [a for pair in prepped["conv"] for a in pair]
    weight_arrays += [prepped["fc_w"], prepped["fc_b"]]
    weight_bytes = sum(int(a.size) * a.dtype.itemsize for a in weight_arrays)
    layer_lanes = [int(t.shape[2]) for t, _ in prepped["conv"]]
    per_img = img_h * (lane0_pad * 2 * 2              # bf16 x slab, double-buffered
                       + sum(layer_lanes) * 12)       # f32 acc + f32 act + bf16 copy
    per_img += out_pad * 4 * 2
    budget = _vmem_budget_bytes()
    max_imgs = max(1, (budget - weight_bytes - (2 << 20)) // per_img)
    block_n = _choose_block_n(n, max_imgs)
    n_blocks = n // block_n
    block_rows = img_h * block_n

    # ---- NCHW -> blocked (h, n)-major row slab: row = h*block_n + n_local,
    #      lane = w*C + c; zero-pad lanes to a multiple of 128; bf16 for DMA.
    xt = x_nchw.astype(jnp.bfloat16).transpose(0, 2, 3, 1)          # (N,H,W,C)
    xt = xt.reshape(n_blocks, block_n, img_h, lane0)
    xt = xt.transpose(0, 2, 1, 3)                                   # (nb,H,bn,W*C)
    x2 = xt.reshape(n_blocks * block_rows, lane0)
    x2 = jnp.pad(x2, ((0, 0), (0, lane0_pad - lane0)))

    bfc = jnp.pad(prepped["fc_b"], ((0, 0), (0, out_pad - dim_out)))

    operands = [x2]
    in_specs = [pl.BlockSpec((block_rows, lane0_pad), lambda i: (i, 0))]
    for (t, bl) in prepped["conv"]:
        operands += [t, bl]
        in_specs += [pl.BlockSpec(t.shape, lambda i: (0, 0, 0)),
                     pl.BlockSpec(bl.shape, lambda i: (0, 0))]
    operands += [prepped["fc_w"], bfc]
    in_specs += [pl.BlockSpec(prepped["fc_w"].shape, lambda i: (0, 0, 0)),
                 pl.BlockSpec(bfc.shape, lambda i: (0, 0))]

    out = pl.pallas_call(
        functools.partial(_encoder_fused_kernel, block_n=block_n,
                          n_layers=n_layers),
        grid=(n_blocks,),
        out_shape=jax.ShapeDtypeStruct((n, out_pad), jnp.float32),
        in_specs=in_specs,
        out_specs=pl.BlockSpec((block_n, out_pad), lambda i: (i, 0)),
        compiler_params=pltpu.CompilerParams(
            dimension_semantics=("parallel",),
            vmem_limit_bytes=int(budget)),
    )(*operands)
    return out[:, :dim_out]


# ----------------------------------------------------------------------------
# Parameter init (torch-layout) + pure-JAX reference
# ----------------------------------------------------------------------------
def init_encoder_params(key, dim_in, dim_out, n_layers=2, n_kernels=32, ksize=3):
    c_in, h, w = dim_in
    params = {"convs": []}
    keys = jax.random.split(key, 2 * n_layers + 2)
    ki, in_ch = 0, c_in
    for _ in range(n_layers):
        fan_in = in_ch * ksize * ksize
        wk = jax.random.normal(keys[ki], (n_kernels, in_ch, ksize, ksize),
                               jnp.float32) * (1.0 / fan_in) ** 0.5
        bk = jax.random.normal(keys[ki + 1], (n_kernels,), jnp.float32) * 0.01
        params["convs"].append((wk, bk))
        in_ch = n_kernels
        ki += 2
    ho, wo = h, w
    for _ in range(n_layers):
        ho, wo = ho - ksize + 1, wo - ksize + 1
    v_shape = n_kernels * ho * wo
    params["fc_w"] = jax.random.normal(keys[ki], (dim_out, v_shape),
                                       jnp.float32) * (1.0 / v_shape) ** 0.5
    params["fc_b"] = jax.random.normal(keys[ki + 1], (dim_out,),
                                       jnp.float32) * 0.01
    return params


def encoder_reference(params, x_nchw):
    x = x_nchw
    for (wk, bk) in params["convs"]:
        y = lax.conv_general_dilated(
            x, wk, window_strides=(1, 1), padding="VALID",
            dimension_numbers=("NCHW", "OIHW", "NCHW"))
        x = jnp.maximum(y + bk[None, :, None, None], 0.0)
    v = x.reshape(x.shape[0], -1)                   # torch.flatten(start_dim=1)
    return v @ params["fc_w"].T + params["fc_b"]


# ----------------------------------------------------------------------------
if __name__ == "__main__":
    dim_in = (4, 16, 16)   # (C, H, W)
    dim_out = 8
    batch = 2

    key = jax.random.PRNGKey(0)
    k_param, k_x = jax.random.split(key)
    params = init_encoder_params(k_param, dim_in, dim_out)
    prepped = prepare_encoder_params(params, dim_in)

    x = jax.random.normal(k_x, (batch,) + dim_in, jnp.float32)  # NCHW input

    fwd = jax.jit(encoder_forward)
    out = jax.block_until_ready(fwd(prepped, x))

    ref = jax.block_until_ready(encoder_reference(params, x))
    assert out.shape == (batch, dim_out), out.shape
    # bf16 MXU inputs with f32 accumulation -> relaxed tolerance vs f32 ref.
    if not jnp.allclose(out, ref, atol=5e-2, rtol=5e-2):
        max_err = float(jnp.max(jnp.abs(out - ref)))
        raise AssertionError(f"Pallas encoder mismatch (max abs err {max_err})")

    print("KERNEL_OK")
</pallas_src>

<mosaic_0001>
module attributes {stable_mosaic.version = 11 : i64} {
  func.func @_encoder_fused_kernel(%arg0: i32, %arg1: memref<32x128xbf16, #tpu.memory_space<vmem>>, %arg2: memref<3x128x512xbf16, #tpu.memory_space<vmem>>, %arg3: memref<1x512xf32, #tpu.memory_space<vmem>>, %arg4: memref<3x512x384xbf16, #tpu.memory_space<vmem>>, %arg5: memref<1x384xf32, #tpu.memory_space<vmem>>, %arg6: memref<12x384x128xbf16, #tpu.memory_space<vmem>>, %arg7: memref<1x128xf32, #tpu.memory_space<vmem>>, %arg8: memref<2x128xf32, #tpu.memory_space<vmem>>) attributes {dimension_semantics = [#tpu.dimension_semantics<parallel>], iteration_bounds = array<i64: 1>, scalar_prefetch = 0 : i64, scratch_operands = 0 : i64, tpu.core_type = #tpu.core_type<tc>, window_params = [{transform_indices = @transform_0, window_bounds = array<i64: 32, 128>}, {pipeline_mode = #tpu.pipeline_mode<synchronous>, transform_indices = @transform_1, window_bounds = array<i64: 3, 128, 512>}, {pipeline_mode = #tpu.pipeline_mode<synchronous>, transform_indices = @transform_2, window_bounds = array<i64: 1, 512>}, {pipeline_mode = #tpu.pipeline_mode<synchronous>, transform_indices = @transform_3, window_bounds = array<i64: 3, 512, 384>}, {pipeline_mode = #tpu.pipeline_mode<synchronous>, transform_indices = @transform_4, window_bounds = array<i64: 1, 384>}, {pipeline_mode = #tpu.pipeline_mode<synchronous>, transform_indices = @transform_5, window_bounds = array<i64: 12, 384, 128>}, {pipeline_mode = #tpu.pipeline_mode<synchronous>, transform_indices = @transform_6, window_bounds = array<i64: 1, 128>}, {transform_indices = @transform_7, window_bounds = array<i64: 2, 128>}]} {
    %c0 = arith.constant 0 : index
    %c0_0 = arith.constant 0 : index
    %0 = vector.load %arg1[%c0, %c0_0] : memref<32x128xbf16, #tpu.memory_space<vmem>>, vector<32x128xbf16>
    %1 = arith.extf %0 : vector<32x128xbf16> to vector<32x128xf32>
    %2 = arith.truncf %1 : vector<32x128xf32> to vector<32x128xbf16>
    %c0_1 = arith.constant 0 : index
    %c0_2 = arith.constant 0 : index
    %c0_3 = arith.constant 0 : index
    %3 = vector.load %arg2[%c0_1, %c0_2, %c0_3] : memref<3x128x512xbf16, #tpu.memory_space<vmem>>, vector<1x128x512xbf16>
    %4 = vector.shape_cast %3 : vector<1x128x512xbf16> to vector<128x512xbf16>
    %cst = arith.constant dense<0.000000e+00> : vector<32x512xf32>
    %5 = tpu.matmul %2, %4, %cst {dimension_numbers = #tpu.dot_dimension_numbers<[1], [0], [0], [1], [0, 0, 1, 1], [], []>} : vector<32x128xbf16>, vector<128x512xbf16>, vector<32x512xf32> -> vector<32x512xf32>
    %c30_i32 = arith.constant 30 : i32
    %6 = tpu.dynamic_rotate %1 by %c30_i32 dim 0 : vector<32x128xf32>, i32 -> vector<32x128xf32>
    %7 = arith.truncf %6 : vector<32x128xf32> to vector<32x128xbf16>
    %c1 = arith.constant 1 : index
    %c0_4 = arith.constant 0 : index
    %c0_5 = arith.constant 0 : index
    %8 = vector.load %arg2[%c1, %c0_4, %c0_5] : memref<3x128x512xbf16, #tpu.memory_space<vmem>>, vector<1x128x512xbf16>
    %9 = vector.shape_cast %8 : vector<1x128x512xbf16> to vector<128x512xbf16>
    %cst_6 = arith.constant dense<0.000000e+00> : vector<32x512xf32>
    %10 = tpu.matmul %7, %9, %cst_6 {dimension_numbers = #tpu.dot_dimension_numbers<[1], [0], [0], [1], [0, 0, 1, 1], [], []>} : vector<32x128xbf16>, vector<128x512xbf16>, vector<32x512xf32> -> vector<32x512xf32>
    %11 = arith.addf %5, %10 : vector<32x512xf32>
    %c28_i32 = arith.constant 28 : i32
    %12 = tpu.dynamic_rotate %1 by %c28_i32 dim 0 : vector<32x128xf32>, i32 -> vector<32x128xf32>
    %13 = arith.truncf %12 : vector<32x128xf32> to vector<32x128xbf16>
    %c2 = arith.constant 2 : index
    %c0_7 = arith.constant 0 : index
    %c0_8 = arith.constant 0 : index
    %14 = vector.load %arg2[%c2, %c0_7, %c0_8] : memref<3x128x512xbf16, #tpu.memory_space<vmem>>, vector<1x128x512xbf16>
    %15 = vector.shape_cast %14 : vector<1x128x512xbf16> to vector<128x512xbf16>
    %cst_9 = arith.constant dense<0.000000e+00> : vector<32x512xf32>
    %16 = tpu.matmul %13, %15, %cst_9 {dimension_numbers = #tpu.dot_dimension_numbers<[1], [0], [0], [1], [0, 0, 1, 1], [], []>} : vector<32x128xbf16>, vector<128x512xbf16>, vector<32x512xf32> -> vector<32x512xf32>
    %17 = arith.addf %11, %16 : vector<32x512xf32>
    %c0_10 = arith.constant 0 : index
    %c0_11 = arith.constant 0 : index
    %18 = vector.load %arg3[%c0_10, %c0_11] : memref<1x512xf32, #tpu.memory_space<vmem>>, vector<1x512xf32>
    %19 = vector.broadcast %18 : vector<1x512xf32> to vector<32x512xf32>
    %20 = arith.addf %17, %19 : vector<32x512xf32>
    %cst_12 = arith.constant 0.000000e+00 : f32
    %21 = vector.broadcast %cst_12 : f32 to vector<32x512xf32>
    %22 = arith.maximumf %20, %21 : vector<32x512xf32>
    %23 = arith.truncf %22 : vector<32x512xf32> to vector<32x512xbf16>
    %c0_13 = arith.constant 0 : index
    %c0_14 = arith.constant 0 : index
    %c0_15 = arith.constant 0 : index
    %24 = vector.load %arg4[%c0_13, %c0_14, %c0_15] : memref<3x512x384xbf16, #tpu.memory_space<vmem>>, vector<1x512x384xbf16>
    %25 = vector.shape_cast %24 : vector<1x512x384xbf16> to vector<512x384xbf16>
    %cst_16 = arith.constant dense<0.000000e+00> : vector<32x384xf32>
    %26 = tpu.matmul %23, %25, %cst_16 {dimension_numbers = #tpu.dot_dimension_numbers<[1], [0], [0], [1], [0, 0, 1, 1], [], []>} : vector<32x512xbf16>, vector<512x384xbf16>, vector<32x384xf32> -> vector<32x384xf32>
    %c30_i32_17 = arith.constant 30 : i32
    %27 = tpu.dynamic_rotate %22 by %c30_i32_17 dim 0 : vector<32x512xf32>, i32 -> vector<32x512xf32>
    %28 = arith.truncf %27 : vector<32x512xf32> to vector<32x512xbf16>
    %c1_18 = arith.constant 1 : index
    %c0_19 = arith.constant 0 : index
    %c0_20 = arith.constant 0 : index
    %29 = vector.load %arg4[%c1_18, %c0_19, %c0_20] : memref<3x512x384xbf16, #tpu.memory_space<vmem>>, vector<1x512x384xbf16>
    %30 = vector.shape_cast %29 : vector<1x512x384xbf16> to vector<512x384xbf16>
    %cst_21 = arith.constant dense<0.000000e+00> : vector<32x384xf32>
    %31 = tpu.matmul %28, %30, %cst_21 {dimension_numbers = #tpu.dot_dimension_numbers<[1], [0], [0], [1], [0, 0, 1, 1], [], []>} : vector<32x512xbf16>, vector<512x384xbf16>, vector<32x384xf32> -> vector<32x384xf32>
    %32 = arith.addf %26, %31 : vector<32x384xf32>
    %c28_i32_22 = arith.constant 28 : i32
    %33 = tpu.dynamic_rotate %22 by %c28_i32_22 dim 0 : vector<32x512xf32>, i32 -> vector<32x512xf32>
    %34 = arith.truncf %33 : vector<32x512xf32> to vector<32x512xbf16>
    %c2_23 = arith.constant 2 : index
    %c0_24 = arith.constant 0 : index
    %c0_25 = arith.constant 0 : index
    %35 = vector.load %arg4[%c2_23, %c0_24, %c0_25] : memref<3x512x384xbf16, #tpu.memory_space<vmem>>, vector<1x512x384xbf16>
    %36 = vector.shape_cast %35 : vector<1x512x384xbf16> to vector<512x384xbf16>
    %cst_26 = arith.constant dense<0.000000e+00> : vector<32x384xf32>
    %37 = tpu.matmul %34, %36, %cst_26 {dimension_numbers = #tpu.dot_dimension_numbers<[1], [0], [0], [1], [0, 0, 1, 1], [], []>} : vector<32x512xbf16>, vector<512x384xbf16>, vector<32x384xf32> -> vector<32x384xf32>
    %38 = arith.addf %32, %37 : vector<32x384xf32>
    %c0_27 = arith.constant 0 : index
    %c0_28 = arith.constant 0 : index
    %39 = vector.load %arg5[%c0_27, %c0_28] : memref<1x384xf32, #tpu.memory_space<vmem>>, vector<1x384xf32>
    %40 = vector.broadcast %39 : vector<1x384xf32> to vector<32x384xf32>
    %41 = arith.addf %38, %40 : vector<32x384xf32>
    %cst_29 = arith.constant 0.000000e+00 : f32
    %42 = vector.broadcast %cst_29 : f32 to vector<32x384xf32>
    %43 = arith.maximumf %41, %42 : vector<32x384xf32>
    %cst_30 = arith.constant 0.000000e+00 : f32
    %44 = vector.broadcast %cst_30 : f32 to vector<2x128xf32>
    %45 = vector.extract_strided_slice %43 {offsets = [0, 0], sizes = [2, 384], strides = [1, 1]} : vector<32x384xf32> to vector<2x384xf32>
    %46 = arith.truncf %45 : vector<2x384xf32> to vector<2x384xbf16>
    %c0_31 = arith.constant 0 : index
    %c0_32 = arith.constant 0 : index
    %c0_33 = arith.constant 0 : index
    %47 = vector.load %arg6[%c0_31, %c0_32, %c0_33] : memref<12x384x128xbf16, #tpu.memory_space<vmem>>, vector<1x384x128xbf16>
    %48 = vector.shape_cast %47 : vector<1x384x128xbf16> to vector<384x128xbf16>
    %cst_34 = arith.constant dense<0.000000e+00> : vector<2x128xf32>
    %49 = tpu.matmul %46, %48, %cst_34 {dimension_numbers = #tpu.dot_dimension_numbers<[1], [0], [0], [1], [0, 0, 1, 1], [], []>} : vector<2x384xbf16>, vector<384x128xbf16>, vector<2x128xf32> -> vector<2x128xf32>
    %50 = arith.addf %44, %49 : vector<2x128xf32>
    %51 = vector.extract_strided_slice %43 {offsets = [2, 0], sizes = [2, 384], strides = [1, 1]} : vector<32x384xf32> to vector<2x384xf32>
    %52 = arith.truncf %51 : vector<2x384xf32> to vector<2x384xbf16>
    %c1_35 = arith.constant 1 : index
    %c0_36 = arith.constant 0 : index
    %c0_37 = arith.constant 0 : index
    %53 = vector.load %arg6[%c1_35, %c0_36, %c0_37] : memref<12x384x128xbf16, #tpu.memory_space<vmem>>, vector<1x384x128xbf16>
    %54 = vector.shape_cast %53 : vector<1x384x128xbf16> to vector<384x128xbf16>
    %cst_38 = arith.constant dense<0.000000e+00> : vector<2x128xf32>
    %55 = tpu.matmul %52, %54, %cst_38 {dimension_numbers = #tpu.dot_dimension_numbers<[1], [0], [0], [1], [0, 0, 1, 1], [], []>} : vector<2x384xbf16>, vector<384x128xbf16>, vector<2x128xf32> -> vector<2x128xf32>
    %56 = arith.addf %50, %55 : vector<2x128xf32>
    %57 = vector.extract_strided_slice %43 {offsets = [4, 0], sizes = [2, 384], strides = [1, 1]} : vector<32x384xf32> to vector<2x384xf32>
    %58 = arith.truncf %57 : vector<2x384xf32> to vector<2x384xbf16>
    %c2_39 = arith.constant 2 : index
    %c0_40 = arith.constant 0 : index
    %c0_41 = arith.constant 0 : index
    %59 = vector.load %arg6[%c2_39, %c0_40, %c0_41] : memref<12x384x128xbf16, #tpu.memory_space<vmem>>, vector<1x384x128xbf16>
    %60 = vector.shape_cast %59 : vector<1x384x128xbf16> to vector<384x128xbf16>
    %cst_42 = arith.constant dense<0.000000e+00> : vector<2x128xf32>
    %61 = tpu.matmul %58, %60, %cst_42 {dimension_numbers = #tpu.dot_dimension_numbers<[1], [0], [0], [1], [0, 0, 1, 1], [], []>} : vector<2x384xbf16>, vector<384x128xbf16>, vector<2x128xf32> -> vector<2x128xf32>
    %62 = arith.addf %56, %61 : vector<2x128xf32>
    %63 = vector.extract_strided_slice %43 {offsets = [6, 0], sizes = [2, 384], strides = [1, 1]} : vector<32x384xf32> to vector<2x384xf32>
    %64 = arith.truncf %63 : vector<2x384xf32> to vector<2x384xbf16>
    %c3 = arith.constant 3 : index
    %c0_43 = arith.constant 0 : index
    %c0_44 = arith.constant 0 : index
    %65 = vector.load %arg6[%c3, %c0_43, %c0_44] : memref<12x384x128xbf16, #tpu.memory_space<vmem>>, vector<1x384x128xbf16>
    %66 = vector.shape_cast %65 : vector<1x384x128xbf16> to vector<384x128xbf16>
    %cst_45 = arith.constant dense<0.000000e+00> : vector<2x128xf32>
    %67 = tpu.matmul %64, %66, %cst_45 {dimension_numbers = #tpu.dot_dimension_numbers<[1], [0], [0], [1], [0, 0, 1, 1], [], []>} : vector<2x384xbf16>, vector<384x128xbf16>, vector<2x128xf32> -> vector<2x128xf32>
    %68 = arith.addf %62, %67 : vector<2x128xf32>
    %69 = vector.extract_strided_slice %43 {offsets = [8, 0], sizes = [2, 384], strides = [1, 1]} : vector<32x384xf32> to vector<2x384xf32>
    %70 = arith.truncf %69 : vector<2x384xf32> to vector<2x384xbf16>
    %c4 = arith.constant 4 : index
    %c0_46 = arith.constant 0 : index
    %c0_47 = arith.constant 0 : index
    %71 = vector.load %arg6[%c4, %c0_46, %c0_47] : memref<12x384x128xbf16, #tpu.memory_space<vmem>>, vector<1x384x128xbf16>
    %72 = vector.shape_cast %71 : vector<1x384x128xbf16> to vector<384x128xbf16>
    %cst_48 = arith.constant dense<0.000000e+00> : vector<2x128xf32>
    %73 = tpu.matmul %70, %72, %cst_48 {dimension_numbers = #tpu.dot_dimension_numbers<[1], [0], [0], [1], [0, 0, 1, 1], [], []>} : vector<2x384xbf16>, vector<384x128xbf16>, vector<2x128xf32> -> vector<2x128xf32>
    %74 = arith.addf %68, %73 : vector<2x128xf32>
    %75 = vector.extract_strided_slice %43 {offsets = [10, 0], sizes = [2, 384], strides = [1, 1]} : vector<32x384xf32> to vector<2x384xf32>
    %76 = arith.truncf %75 : vector<2x384xf32> to vector<2x384xbf16>
    %c5 = arith.constant 5 : index
    %c0_49 = arith.constant 0 : index
    %c0_50 = arith.constant 0 : index
    %77 = vector.load %arg6[%c5, %c0_49, %c0_50] : memref<12x384x128xbf16, #tpu.memory_space<vmem>>, vector<1x384x128xbf16>
    %78 = vector.shape_cast %77 : vector<1x384x128xbf16> to vector<384x128xbf16>
    %cst_51 = arith.constant dense<0.000000e+00> : vector<2x128xf32>
    %79 = tpu.matmul %76, %78, %cst_51 {dimension_numbers = #tpu.dot_dimension_numbers<[1], [0], [0], [1], [0, 0, 1, 1], [], []>} : vector<2x384xbf16>, vector<384x128xbf16>, vector<2x128xf32> -> vector<2x128xf32>
    %80 = arith.addf %74, %79 : vector<2x128xf32>
    %81 = vector.extract_strided_slice %43 {offsets = [12, 0], sizes = [2, 384], strides = [1, 1]} : vector<32x384xf32> to vector<2x384xf32>
    %82 = arith.truncf %81 : vector<2x384xf32> to vector<2x384xbf16>
    %c6 = arith.constant 6 : index
    %c0_52 = arith.constant 0 : index
    %c0_53 = arith.constant 0 : index
    %83 = vector.load %arg6[%c6, %c0_52, %c0_53] : memref<12x384x128xbf16, #tpu.memory_space<vmem>>, vector<1x384x128xbf16>
    %84 = vector.shape_cast %83 : vector<1x384x128xbf16> to vector<384x128xbf16>
    %cst_54 = arith.constant dense<0.000000e+00> : vector<2x128xf32>
    %85 = tpu.matmul %82, %84, %cst_54 {dimension_numbers = #tpu.dot_dimension_numbers<[1], [0], [0], [1], [0, 0, 1, 1], [], []>} : vector<2x384xbf16>, vector<384x128xbf16>, vector<2x128xf32> -> vector<2x128xf32>
    %86 = arith.addf %80, %85 : vector<2x128xf32>
    %87 = vector.extract_strided_slice %43 {offsets = [14, 0], sizes = [2, 384], strides = [1, 1]} : vector<32x384xf32> to vector<2x384xf32>
    %88 = arith.truncf %87 : vector<2x384xf32> to vector<2x384xbf16>
    %c7 = arith.constant 7 : index
    %c0_55 = arith.constant 0 : index
    %c0_56 = arith.constant 0 : index
    %89 = vector.load %arg6[%c7, %c0_55, %c0_56] : memref<12x384x128xbf16, #tpu.memory_space<vmem>>, vector<1x384x128xbf16>
    %90 = vector.shape_cast %89 : vector<1x384x128xbf16> to vector<384x128xbf16>
    %cst_57 = arith.constant dense<0.000000e+00> : vector<2x128xf32>
    %91 = tpu.matmul %88, %90, %cst_57 {dimension_numbers = #tpu.dot_dimension_numbers<[1], [0], [0], [1], [0, 0, 1, 1], [], []>} : vector<2x384xbf16>, vector<384x128xbf16>, vector<2x128xf32> -> vector<2x128xf32>
    %92 = arith.addf %86, %91 : vector<2x128xf32>
    %93 = vector.extract_strided_slice %43 {offsets = [16, 0], sizes = [2, 384], strides = [1, 1]} : vector<32x384xf32> to vector<2x384xf32>
    %94 = arith.truncf %93 : vector<2x384xf32> to vector<2x384xbf16>
    %c8 = arith.constant 8 : index
    %c0_58 = arith.constant 0 : index
    %c0_59 = arith.constant 0 : index
    %95 = vector.load %arg6[%c8, %c0_58, %c0_59] : memref<12x384x128xbf16, #tpu.memory_space<vmem>>, vector<1x384x128xbf16>
    %96 = vector.shape_cast %95 : vector<1x384x128xbf16> to vector<384x128xbf16>
    %cst_60 = arith.constant dense<0.000000e+00> : vector<2x128xf32>
    %97 = tpu.matmul %94, %96, %cst_60 {dimension_numbers = #tpu.dot_dimension_numbers<[1], [0], [0], [1], [0, 0, 1, 1], [], []>} : vector<2x384xbf16>, vector<384x128xbf16>, vector<2x128xf32> -> vector<2x128xf32>
    %98 = arith.addf %92, %97 : vector<2x128xf32>
    %99 = vector.extract_strided_slice %43 {offsets = [18, 0], sizes = [2, 384], strides = [1, 1]} : vector<32x384xf32> to vector<2x384xf32>
    %100 = arith.truncf %99 : vector<2x384xf32> to vector<2x384xbf16>
    %c9 = arith.constant 9 : index
    %c0_61 = arith.constant 0 : index
    %c0_62 = arith.constant 0 : index
    %101 = vector.load %arg6[%c9, %c0_61, %c0_62] : memref<12x384x128xbf16, #tpu.memory_space<vmem>>, vector<1x384x128xbf16>
    %102 = vector.shape_cast %101 : vector<1x384x128xbf16> to vector<384x128xbf16>
    %cst_63 = arith.constant dense<0.000000e+00> : vector<2x128xf32>
    %103 = tpu.matmul %100, %102, %cst_63 {dimension_numbers = #tpu.dot_dimension_numbers<[1], [0], [0], [1], [0, 0, 1, 1], [], []>} : vector<2x384xbf16>, vector<384x128xbf16>, vector<2x128xf32> -> vector<2x128xf32>
    %104 = arith.addf %98, %103 : vector<2x128xf32>
    %105 = vector.extract_strided_slice %43 {offsets = [20, 0], sizes = [2, 384], strides = [1, 1]} : vector<32x384xf32> to vector<2x384xf32>
    %106 = arith.truncf %105 : vector<2x384xf32> to vector<2x384xbf16>
    %c10 = arith.constant 10 : index
    %c0_64 = arith.constant 0 : index
    %c0_65 = arith.constant 0 : index
    %107 = vector.load %arg6[%c10, %c0_64, %c0_65] : memref<12x384x128xbf16, #tpu.memory_space<vmem>>, vector<1x384x128xbf16>
    %108 = vector.shape_cast %107 : vector<1x384x128xbf16> to vector<384x128xbf16>
    %cst_66 = arith.constant dense<0.000000e+00> : vector<2x128xf32>
    %109 = tpu.matmul %106, %108, %cst_66 {dimension_numbers = #tpu.dot_dimension_numbers<[1], [0], [0], [1], [0, 0, 1, 1], [], []>} : vector<2x384xbf16>, vector<384x128xbf16>, vector<2x128xf32> -> vector<2x128xf32>
    %110 = arith.addf %104, %109 : vector<2x128xf32>
    %111 = vector.extract_strided_slice %43 {offsets = [22, 0], sizes = [2, 384], strides = [1, 1]} : vector<32x384xf32> to vector<2x384xf32>
    %112 = arith.truncf %111 : vector<2x384xf32> to vector<2x384xbf16>
    %c11 = arith.constant 11 : index
    %c0_67 = arith.constant 0 : index
    %c0_68 = arith.constant 0 : index
    %113 = vector.load %arg6[%c11, %c0_67, %c0_68] : memref<12x384x128xbf16, #tpu.memory_space<vmem>>, vector<1x384x128xbf16>
    %114 = vector.shape_cast %113 : vector<1x384x128xbf16> to vector<384x128xbf16>
    %cst_69 = arith.constant dense<0.000000e+00> : vector<2x128xf32>
    %115 = tpu.matmul %112, %114, %cst_69 {dimension_numbers = #tpu.dot_dimension_numbers<[1], [0], [0], [1], [0, 0, 1, 1], [], []>} : vector<2x384xbf16>, vector<384x128xbf16>, vector<2x128xf32> -> vector<2x128xf32>
    %116 = arith.addf %110, %115 : vector<2x128xf32>
    %c0_70 = arith.constant 0 : index
    %c0_71 = arith.constant 0 : index
    %117 = vector.load %arg7[%c0_70, %c0_71] : memref<1x128xf32, #tpu.memory_space<vmem>>, vector<1x128xf32>
    %118 = vector.broadcast %117 : vector<1x128xf32> to vector<2x128xf32>
    %119 = arith.addf %116, %118 : vector<2x128xf32>
    %c0_72 = arith.constant 0 : index
    %c0_73 = arith.constant 0 : index
    %120 = vector.load %arg8[%c0_72, %c0_73] : memref<2x128xf32, #tpu.memory_space<vmem>>, vector<2x128xf32>
    tpu.vector_store %arg8[%c0_72, %c0_73], %119 {strides = array<i32>} : memref<2x128xf32, #tpu.memory_space<vmem>>, vector<2x128xf32>,
    return
  }
  func.func @transform_0(%arg0: i32) -> (i32, i32) {
    %c0_i32 = arith.constant 0 : i32
    %c0_i32_0 = arith.constant 0 : i32
    return %arg0, %c0_i32 : i32, i32
  }
  func.func @transform_1(%arg0: i32) -> (i32, i32, i32) {
    %c0_i32 = arith.constant 0 : i32
    %c0_i32_0 = arith.constant 0 : i32
    %c0_i32_1 = arith.constant 0 : i32
    %c0_i32_2 = arith.constant 0 : i32
    return %c0_i32, %c0_i32_0, %c0_i32_1 : i32, i32, i32
  }
  func.func @transform_2(%arg0: i32) -> (i32, i32) {
    %c0_i32 = arith.constant 0 : i32
    %c0_i32_0 = arith.constant 0 : i32
    %c0_i32_1 = arith.constant 0 : i32
    return %c0_i32, %c0_i32_0 : i32, i32
  }
  func.func @transform_3(%arg0: i32) -> (i32, i32, i32) {
    %c0_i32 = arith.constant 0 : i32
    %c0_i32_0 = arith.constant 0 : i32
    %c0_i32_1 = arith.constant 0 : i32
    %c0_i32_2 = arith.constant 0 : i32
    return %c0_i32, %c0_i32_0, %c0_i32_1 : i32, i32, i32
  }
  func.func @transform_4(%arg0: i32) -> (i32, i32) {
    %c0_i32 = arith.constant 0 : i32
    %c0_i32_0 = arith.constant 0 : i32
    %c0_i32_1 = arith.constant 0 : i32
    return %c0_i32, %c0_i32_0 : i32, i32
  }
  func.func @transform_5(%arg0: i32) -> (i32, i32, i32) {
    %c0_i32 = arith.constant 0 : i32
    %c0_i32_0 = arith.constant 0 : i32
    %c0_i32_1 = arith.constant 0 : i32
    %c0_i32_2 = arith.constant 0 : i32
    return %c0_i32, %c0_i32_0, %c0_i32_1 : i32, i32, i32
  }
  func.func @transform_6(%arg0: i32) -> (i32, i32) {
    %c0_i32 = arith.constant 0 : i32
    %c0_i32_0 = arith.constant 0 : i32
    %c0_i32_1 = arith.constant 0 : i32
    return %c0_i32, %c0_i32_0 : i32, i32
  }
  func.func @transform_7(%arg0: i32) -> (i32, i32) {
    %c0_i32 = arith.constant 0 : i32
    %c0_i32_0 = arith.constant 0 : i32
    return %arg0, %c0_i32 : i32, i32
  }
}

</mosaic_0001>

<bundles_post_ra>
// kernel: encoder_forward.1
= control target key start
LH: loop header
LB: loop body
LE: loop exit
PB: predicated region body
PF: predicated region fallthrough
CT: control target
= control target key end

     0   :  { %12 = vsyncpa [#allocation3], 0  ;;  %s10349_s0 = inlined_call_operand.vmem [shape: bf16[32,128], index: 0, kind: input, shape index: {}]   ;;  %s10350_s1 = inlined_call_operand.hbm [shape: bf16[3,128,512], index: 1, kind: input, shape index: {}]   ;;  %s10351_s2 = inlined_call_operand.hbm [shape: f32[1,512], index: 2, kind: input, shape index: {}]   ;;  %s10352_s3 = inlined_call_operand.hbm [shape: bf16[3,512,384], index: 3, kind: input, shape index: {}]   ;;  %s10353_s4 = inlined_call_operand.hbm [shape: f32[1,384], index: 4, kind: input, shape index: {}]   ;;  %s10354_s5 = inlined_call_operand.hbm [shape: bf16[12,384,128], index: 5, kind: input, shape index: {}]   ;;  %s10355_s6 = inlined_call_operand.vmem [shape: f32[1,128], index: 6, kind: input, shape index: {}]   ;;  %s10356_s7 = inlined_call_operand.hbm [shape: f32[2,128], index: 7, kind: output, shape index: {}]  }
   0x1   :  { %13 = vsyncpa [#allocation6], 0 }
   0x2   :  { %14 = vsyncpa [#allocation9], 0 }
   0x3   :  { %15 = vsyncpa [#allocation4], 0  ;;  %s9615_s24 = smov [#allocation5]   ;;  %s9616_s26 = smov [#allocation8]  }
   0x4   :  { %s36_s25 = sshll.u32 %s9615_s24, 4  ;;  %s58_s27 = sshll.u32 %s9616_s26, 4  ;;  %s37_s25 = int_to_ptr.vmem [resolvable:$true] %s36_s25  ;;  %s59_s27 = int_to_ptr.vmem [resolvable:$true] %s58_s27 }
   0x5   :  { %s9475_s30 = scalar_lea.hbm %s10351_s2, 64 }
   0x6   :  { %p9476_p0 = scmp.ne.s32.totalorder %s10351_s2, %s9475_s30  ;;  %p9479_p1 = scmp.lt.u32.totalorder %s9475_s30, %s10351_s2 }
   0x8   :  { %p9481_p2 = pnand %p9479_p1, %p9476_p0 }
   0xa   :  { %9484 = shalt.err (!%p9481_p2)
}
   0xb   :  { %s9485_s12 = scalar_lea.vmem %s37_s25, 64  ;;  %p9490_p4 = scmp.lt.s32.totalorder %s37_s25, %s37_s25 }
   0xc   :  { %p9486_p3 = scmp.ne.s32.totalorder %s37_s25, %s9485_s12  ;;  %p9491_p5 = scmp.lt.s32.totalorder %s9485_s12, %s9485_s12 }
   0xe   :  { %p9492_p6 = por %p9491_p5, %p9490_p4 }
  0x10   :  { %p9493_p7 = pnand %p9492_p6, %p9486_p3 }
  0x12   :  { %9496 = shalt.err (!%p9493_p7)
}
  0x13   :  { %39 = dma.hbm_to_vmem [thread:$0]  %s10351_s2, 64, %s37_s25, [#allocation6]  }
  0x14   :  { %s9497_s17 = scalar_lea.hbm %s10353_s4, 48 }
  0x15   :  { %p9498_p8 = scmp.ne.s32.totalorder %s10353_s4, %s9497_s17  ;;  %p9501_p9 = scmp.lt.u32.totalorder %s9497_s17, %s10353_s4 }
  0x17   :  { %p9503_p10 = pnand %p9501_p9, %p9498_p8 }
  0x19   :  { %9506 = shalt.err (!%p9503_p10)
}
  0x1a   :  { %s9507_s22 = scalar_lea.vmem %s59_s27, 48  ;;  %s9511_s23 = scalar_lea.vmem %s59_s27, 64 }
  0x1b   :  { %p9508_p11 = scmp.ne.s32.totalorder %s59_s27, %s9507_s22  ;;  %p9512_p12 = scmp.lt.s32.totalorder %s59_s27, %s59_s27 }
  0x1c   :  { %p9513_p13 = scmp.lt.s32.totalorder %s9511_s23, %s9507_s22 }
  0x1e   :  { %p9514_p0 = por %p9513_p13, %p9512_p12 }
  0x20   :  { %p9515_p1 = pnand %p9514_p0, %p9508_p11 }
  0x22   :  { %9518 = shalt.err (!%p9515_p1)
}
  0x23   :  { %61 = dma.hbm_to_vmem [thread:$0]  %s10353_s4, 48, %s59_s27, [#allocation9]  }
  0x24   :  { %s9617_s25 = smov [#allocation2]   ;;  %s9519_s30 = scalar_lea.hbm %s10350_s1, 12288 }
  0x25   :  { %s23_s26 = sshll.u32 %s9617_s25, 4  ;;  %p9520_p2 = scmp.ne.s32.totalorder %s10350_s1, %s9519_s30  ;;  %s24_s26 = int_to_ptr.vmem [resolvable:$true] %s23_s26 }
  0x26   :  { %p9523_p3 = scmp.lt.u32.totalorder %s9519_s30, %s10350_s1 }
  0x28   :  { %p9525_p4 = pnand %p9523_p3, %p9520_p2 }
  0x2a   :  { %9528 = shalt.err (!%p9525_p4)
}
  0x2b   :  { %s9529_s12 = scalar_lea.vmem %s24_s26, 12288  ;;  %p9534_p6 = scmp.lt.s32.totalorder %s24_s26, %s24_s26 }
  0x2c   :  { %p9530_p5 = scmp.ne.s32.totalorder %s24_s26, %s9529_s12  ;;  %p9535_p7 = scmp.lt.s32.totalorder %s9529_s12, %s9529_s12 }
  0x2e   :  { %p9536_p8 = por %p9535_p7, %p9534_p6 }
  0x30   :  { %p9537_p9 = pnand %p9536_p8, %p9530_p5 }
  0x32   :  { %9540 = shalt.err (!%p9537_p9)
}
  0x33   :  { %s9618_s4 = smov 256   ;;  %s9619_s27 = smov 16  }
  0x34   :  { %29 = dma.hbm_to_vmem [thread:$0]  %s10350_s1, 12288, %s24_s26, [#allocation3], %s9618_s4, %s9618_s4, %s9619_s27  }
  0x35   :  { %s9620_s15 = smov [#allocation7]   ;;  %s9541_s19 = scalar_lea.hbm %s10352_s3, 36864 }
  0x36   :  { %s45_s16 = sshll.u32 %s9620_s15, 4  ;;  %p9542_p10 = scmp.ne.s32.totalorder %s10352_s3, %s9541_s19  ;;  %s46_s16 = int_to_ptr.vmem [resolvable:$true] %s45_s16 }
  0x37   :  { %p9545_p11 = scmp.lt.u32.totalorder %s9541_s19, %s10352_s3 }
  0x39   :  { %p9547_p12 = pnand %p9545_p11, %p9542_p10 }
  0x3b   :  { %9550 = shalt.err (!%p9547_p12)
}
  0x3c   :  { %s9551_s2 = scalar_lea.vmem %s46_s16, 36864  ;;  %p9556_p0 = scmp.lt.s32.totalorder %s46_s16, %s46_s16 }
  0x3d   :  { %p9552_p13 = scmp.ne.s32.totalorder %s46_s16, %s9551_s2  ;;  %p9557_p1 = scmp.lt.s32.totalorder %s9551_s2, %s9551_s2 }
  0x3f   :  { %p9558_p2 = por %p9557_p1, %p9556_p0 }
  0x41   :  { %p9559_p3 = pnand %p9558_p2, %p9552_p13 }
  0x43   :  { %9562 = shalt.err (!%p9559_p3)
}
  0x44   :  { %s9621_s1 = smov 192   ;;  %s9622_s24 = smov 12  }
  0x45   :  { %51 = dma.hbm_to_vmem [thread:$0]  %s10352_s3, 36864, %s46_s16, [#allocation6], %s9621_s1, %s9621_s1, %s9622_s24  }
  0x46   :  { %s9623_s28 = smov [#allocation10]   ;;  %s9563_s9 = scalar_lea.hbm %s10354_s5, 36864 }
  0x47   :  { %s67_s29 = sshll.u32 %s9623_s28, 4  ;;  %p9564_p4 = scmp.ne.s32.totalorder %s10354_s5, %s9563_s9  ;;  %s68_s29 = int_to_ptr.vmem [resolvable:$true] %s67_s29 }
  0x48   :  { %p9567_p5 = scmp.lt.u32.totalorder %s9563_s9, %s10354_s5 }
  0x4a   :  { %p9569_p6 = pnand %p9567_p5, %p9564_p4 }
  0x4c   :  { %9572 = shalt.err (!%p9569_p6)
}
  0x4d   :  { %s9573_s27 = scalar_lea.vmem %s68_s29, 36864  ;;  %p9578_p8 = scmp.lt.s32.totalorder %s68_s29, %s68_s29 }
  0x4e   :  { %p9574_p7 = scmp.ne.s32.totalorder %s68_s29, %s9573_s27  ;;  %p9579_p9 = scmp.lt.s32.totalorder %s9573_s27, %s9573_s27 }
  0x50   :  { %p9580_p10 = por %p9579_p9, %p9578_p8 }
  0x52   :  { %p9581_p11 = pnand %p9580_p10, %p9574_p7 }
  0x54   :  { %9584 = shalt.err (!%p9581_p11)
}
  0x55   :  { %s9624_s3 = smov 64   ;;  %s9625_s13 = smov 4  }
  0x56   :  { %73 = dma.hbm_to_vmem [thread:$0]  %s10354_s5, 36864, %s68_s29, [#allocation9], %s9624_s3, %s9624_s3, %s9625_s13  }
  0x57   :  { %9607 = dma.done.wait [#allocation3], 12288  }
  0x58   :  { %9608 = vsyncadd [#allocation3], 4294955008 }
  0x59   :  { %9609 = dma.done.wait [#allocation6], 36928  }
  0x5a   :  { %9610 = vsyncadd [#allocation6], 4294930368 }
  0x5b   :  { %9611 = dma.done.wait [#allocation9], 36912  }
  0x5c   :  { %9612 = vsyncadd [#allocation9], 4294930384  ;;  %v9626_v0 = vmov 0   ;;  %v8655_v1 = vld [vmem:[#allocation2 + $0x104] ss:$16 sps:$4 sm:$0xff]   ;;  %v136_v23 = vlaneseq  ;;  %v9742_v32 = vld [vmem:[%s10349_s0 + $0x8] sm:$0xff]  }
  0x5d   :  { %370 = vmatprep.mubr.bf16.mxu0 %v9626_v0  ;;  %423 = vmatprep.mubr.bf16.mxu1 %v9626_v0  ;;  %v8657_v2 = vld [vmem:[#allocation2 + $0x10c] ss:$16 sps:$4 sm:$0xff]   ;;  %v8659_v3 = vld [vmem:[#allocation2 + $0x100] ss:$16 sps:$4 sm:$0xff]   ;;  %v8660_v4 = vld [vmem:[#allocation2 + $0x108] ss:$16 sps:$4 sm:$0xff]   ;;  %v98_v37 = vunpack.c.l.bf16 %v9742_v32  ;;  %v99_v39 = vunpack.c.h.bf16 %v9742_v32 }
  0x5e   :  { %338 = vmatprep.subr.bf16.mxu0 %v8655_v1  ;;  %391 = vmatprep.subr.bf16.mxu1 %v8657_v2  ;;  %v8661_v5 = vld [vmem:[#allocation2 + $0x124] ss:$16 sps:$4 sm:$0xff]   ;;  %v8663_v6 = vld [vmem:[#allocation2 + $0x12c] ss:$16 sps:$4 sm:$0xff]   ;;  %v8665_v7 = vld [vmem:[#allocation2 + $0x120] ss:$16 sps:$4 sm:$0xff]  }
  0x5f   :  { %339 = vmatpush1.bf16.msra.mxu0 %v8659_v3  ;;  %392 = vmatpush1.bf16.msra.mxu1 %v8660_v4  ;;  %v8666_v8 = vld [vmem:[#allocation2 + $0x128] ss:$16 sps:$4 sm:$0xff]   ;;  %v8667_v9 = vld [vmem:[#allocation2 + $0x144] ss:$16 sps:$4 sm:$0xff]   ;;  %v8669_v10 = vld [vmem:[#allocation2 + $0x14c] ss:$16 sps:$4 sm:$0xff]  }
  0x60   :  { %340 = vmatprep.subr.bf16.mxu0 %v8661_v5  ;;  %393 = vmatprep.subr.bf16.mxu1 %v8663_v6  ;;  %v8671_v11 = vld [vmem:[#allocation2 + $0x140] ss:$16 sps:$4 sm:$0xff]   ;;  %v8672_v12 = vld [vmem:[#allocation2 + $0x148] ss:$16 sps:$4 sm:$0xff]   ;;  %v8673_v13 = vld [vmem:[#allocation2 + $0x164] ss:$16 sps:$4 sm:$0xff]  }
  0x61   :  { %v8675_v14 = vld [vmem:[#allocation2 + $0x16c] ss:$16 sps:$4 sm:$0xff]   ;;  %v8677_v15 = vld [vmem:[#allocation2 + $0x160] ss:$16 sps:$4 sm:$0xff]   ;;  %v8678_v16 = vld [vmem:[#allocation2 + $0x168] ss:$16 sps:$4 sm:$0xff]  }
  0x62   :  { %v8679_v17 = vld [vmem:[#allocation2 + $0x184] ss:$16 sps:$4 sm:$0xff]   ;;  %v8681_v18 = vld [vmem:[#allocation2 + $0x18c] ss:$16 sps:$4 sm:$0xff]   ;;  %v8683_v19 = vld [vmem:[#allocation2 + $0x180] ss:$16 sps:$4 sm:$0xff]  }
  0x63   :  { %341 = vmatpush1.bf16.msra.mxu0 %v8665_v7  ;;  %394 = vmatpush1.bf16.msra.mxu1 %v8666_v8  ;;  %v8684_v20 = vld [vmem:[#allocation2 + $0x188] ss:$16 sps:$4 sm:$0xff]   ;;  %v8685_v21 = vld [vmem:[#allocation2 + $0x1a4] ss:$16 sps:$4 sm:$0xff]   ;;  %v8687_v22 = vld [vmem:[#allocation2 + $0x1ac] ss:$16 sps:$4 sm:$0xff]  }
  0x64   :  { %342 = vmatprep.subr.bf16.mxu0 %v8667_v9  ;;  %395 = vmatprep.subr.bf16.mxu1 %v8669_v10  ;;  %v8689_v24 = vld [vmem:[#allocation2 + $0x1a0] ss:$16 sps:$4 sm:$0xff]   ;;  %v8690_v25 = vld [vmem:[#allocation2 + $0x1a8] ss:$16 sps:$4 sm:$0xff]   ;;  %v8691_v26 = vld [vmem:[#allocation2 + $0x1c4] ss:$16 sps:$4 sm:$0xff]  }
  0x65   :  { %v8693_v27 = vld [vmem:[#allocation2 + $0x1cc] ss:$16 sps:$4 sm:$0xff]   ;;  %v9732_v28 = vshrl.u32 %v136_v23, 7  ;;  %v8695_v29 = vld [vmem:[#allocation2 + $0x1c0] ss:$16 sps:$4 sm:$0xff]   ;;  %v134_v43 = vrot.slane %v98_v37, 2 }
  0x66   :  { %v8696_v30 = vld [vmem:[#allocation2 + $0x1c8] ss:$16 sps:$4 sm:$0xff]   ;;  %v9737_v31 = vld [vmem:[%s10349_s0] sm:$0xff]   ;;  %v8699_v34 = vld [vmem:[#allocation2 + $0x1ec] ss:$16 sps:$4 sm:$0xff]   ;;  %v724_v47 = vrot.slane %v98_v37, 4 }
  0x67   :  { %343 = vmatpush1.bf16.msra.mxu0 %v8671_v11  ;;  %396 = vmatpush1.bf16.msra.mxu1 %v8672_v12  ;;  %v8697_v33 = vld [vmem:[#allocation2 + $0x1e4] ss:$16 sps:$4 sm:$0xff]   ;;  %v96_v35 = vunpack.c.l.bf16 %v9737_v31  ;;  %v97_v36 = vunpack.c.h.bf16 %v9737_v31  ;;  %v8701_v38 = vld [vmem:[#allocation2 + $0x1e0] ss:$16 sps:$4 sm:$0xff]   ;;  %vm138_vm0 = vcmp.lt.s32.totalorder %v9732_v28, 6  ;;  %vm726_vm1 = vcmp.lt.s32.totalorder %v9732_v28, 4 }
  0x68   :  { %344 = vmatprep.subr.bf16.mxu0 %v8673_v13  ;;  %397 = vmatprep.subr.bf16.mxu1 %v8675_v14  ;;  %v8702_v40 = vld [vmem:[#allocation2 + $0x1e8] ss:$16 sps:$4 sm:$0xff]   ;;  %v8705_v45 = vld [vmem:[#allocation2 + $0x4] ss:$16 sps:$4 sm:$0xff]   ;;  %v8708_v48 = vld [vmem:[#allocation2 + $0xc] ss:$16 sps:$4 sm:$0xff]  }
  0x69   :  { %v132_v41 = vrot.slane %v96_v35, 2  ;;  %v133_v42 = vrot.slane %v97_v36, 2  ;;  %v722_v44 = vrot.slane %v96_v35, 4  ;;  %v723_v46 = vrot.slane %v97_v36, 4  ;;  %v8703_v54 = vld [vmem:[#allocation2] ss:$16 sps:$4 sm:$0xff]  }
  0x6a   :  { %v725_v51 = vrot.slane %v99_v39, 4  ;;  %v8706_v55 = vld [vmem:[#allocation2 + $0x8] ss:$16 sps:$4 sm:$0xff]   ;;  %v8711_v59 = vld [vmem:[#allocation2 + $0x24] ss:$16 sps:$4 sm:$0xff]   ;;  %v135_v60 = vrot.slane %v99_v39, 2 }
  0x6b   :  { %345 = vmatpush1.bf16.msra.mxu0 %v8677_v15  ;;  %398 = vmatpush1.bf16.msra.mxu1 %v8678_v16  ;;  %v140_v49 = vsel %vm138_vm0, %v133_v42, %v134_v43  ;;  %v141_v50 = vsel %vm138_vm0, %v132_v41, %v133_v42  ;;  %v728_v52 = vsel %vm726_vm1, %v723_v46, %v724_v47  ;;  %v8714_v62 = vld [vmem:[#allocation2 + $0x2c] ss:$16 sps:$4 sm:$0xff]   ;;  %v8709_v1 = vld [vmem:[#allocation2 + $0x20] ss:$16 sps:$4 sm:$0xff]   ;;  %v8712_v2 = vld [vmem:[#allocation2 + $0x28] ss:$16 sps:$4 sm:$0xff]  }
  0x6c   :  { %346 = vmatprep.subr.bf16.mxu0 %v8679_v17  ;;  %399 = vmatprep.subr.bf16.mxu1 %v8681_v18  ;;  %v729_v53 = vsel %vm726_vm1, %v722_v44, %v723_v46  ;;  %v143_v56 = vpack.c.bf16 %v140_v49, %v141_v50  ;;  %v727_v58 = vsel %vm726_vm1, %v724_v47, %v725_v51  ;;  %v8717_v3 = vld [vmem:[#allocation2 + $0x44] ss:$16 sps:$4 sm:$0xff]   ;;  %v8720_v6 = vld [vmem:[#allocation2 + $0x4c] ss:$16 sps:$4 sm:$0xff]   ;;  %v8715_v7 = vld [vmem:[#allocation2 + $0x40] ss:$16 sps:$4 sm:$0xff]  }
  0x6d   :  { %v9758_v57 = vpack.c.bf16 %v728_v52, %v729_v53  ;;  %v730_v61 = vsel %vm726_vm1, %v725_v51, %v722_v44  ;;  %v139_v4 = vsel %vm138_vm0, %v134_v43, %v135_v60  ;;  %v142_v5 = vsel %vm138_vm0, %v135_v60, %v132_v41  ;;  %v8718_v8 = vld [vmem:[#allocation2 + $0x48] ss:$16 sps:$4 sm:$0xff]   ;;  %v8723_v10 = vld [vmem:[#allocation2 + $0x64] ss:$16 sps:$4 sm:$0xff]   ;;  %v8726_v11 = vld [vmem:[#allocation2 + $0x6c] ss:$16 sps:$4 sm:$0xff]  }
  0x6e   :  { %v9764_v63 = vpack.c.bf16 %v730_v61, %v727_v58  ;;  %v144_v9 = vpack.c.bf16 %v142_v5, %v139_v4  ;;  %v8721_v12 = vld [vmem:[#allocation2 + $0x60] ss:$16 sps:$4 sm:$0xff]   ;;  %v8724_v13 = vld [vmem:[#allocation2 + $0x68] ss:$16 sps:$4 sm:$0xff]   ;;  %v8729_v14 = vld [vmem:[#allocation2 + $0x84] ss:$16 sps:$4 sm:$0xff]  }
  0x6f   :  { %347 = vmatpush1.bf16.msra.mxu0 %v8683_v19  ;;  %400 = vmatpush1.bf16.msra.mxu1 %v8684_v20  ;;  %v8732_v15 = vld [vmem:[#allocation2 + $0x8c] ss:$16 sps:$4 sm:$0xff]   ;;  %v8727_v16 = vld [vmem:[#allocation2 + $0x80] ss:$16 sps:$4 sm:$0xff]   ;;  %v8730_v17 = vld [vmem:[#allocation2 + $0x88] ss:$16 sps:$4 sm:$0xff]  }
  0x70   :  { %348 = vmatprep.subr.bf16.mxu0 %v8685_v21  ;;  %401 = vmatprep.subr.bf16.mxu1 %v8687_v22  ;;  %v8735_v18 = vld [vmem:[#allocation2 + $0xa4] ss:$16 sps:$4 sm:$0xff]   ;;  %v8738_v19 = vld [vmem:[#allocation2 + $0xac] ss:$16 sps:$4 sm:$0xff]   ;;  %v8733_v20 = vld [vmem:[#allocation2 + $0xa0] ss:$16 sps:$4 sm:$0xff]  }
  0x71   :  { %v8736_v21 = vld [vmem:[#allocation2 + $0xa8] ss:$16 sps:$4 sm:$0xff]   ;;  %v8741_v22 = vld [vmem:[#allocation2 + $0xc4] ss:$16 sps:$4 sm:$0xff]   ;;  %v8744_v23 = vld [vmem:[#allocation2 + $0xcc] ss:$16 sps:$4 sm:$0xff]  }
  0x72   :  { %v8751_v35 = vld [vmem:[#allocation2 + $0x200] ss:$16 sps:$4 sm:$0xff]   ;;  %v8754_v36 = vld [vmem:[#allocation2 + $0x208] ss:$16 sps:$4 sm:$0xff]   ;;  %v8760_v37 = vld [vmem:[#allocation2 + $0x224] ss:$16 sps:$4 sm:$0xff]  }
  0x73   :  { %349 = vmatpush1.bf16.msra.mxu0 %v8689_v24  ;;  %402 = vmatpush1.bf16.msra.mxu1 %v8690_v25  ;;  %v8739_v24 = vld [vmem:[#allocation2 + $0xc0] ss:$16 sps:$4 sm:$0xff]   ;;  %v8742_v25 = vld [vmem:[#allocation2 + $0xc8] ss:$16 sps:$4 sm:$0xff]   ;;  %v8766_v41 = vld [vmem:[#allocation2 + $0x244] ss:$16 sps:$4 sm:$0xff]  }
  0x74   :  { %350 = vmatprep.subr.bf16.mxu0 %v8691_v26  ;;  %403 = vmatprep.subr.bf16.mxu1 %v8693_v27  ;;  %v8747_v26 = vld [vmem:[#allocation2 + $0xe4] ss:$16 sps:$4 sm:$0xff]   ;;  %v8750_v27 = vld [vmem:[#allocation2 + $0xec] ss:$16 sps:$4 sm:$0xff]   ;;  %v8758_v39 = vld [vmem:[#allocation2 + $0x220] ss:$16 sps:$4 sm:$0xff]  }
  0x75   :  { %v8769_v42 = vld [vmem:[#allocation2 + $0x24c] ss:$16 sps:$4 sm:$0xff]   ;;  %v8764_v43 = vld [vmem:[#allocation2 + $0x240] ss:$16 sps:$4 sm:$0xff]   ;;  %v8767_v44 = vld [vmem:[#allocation2 + $0x248] ss:$16 sps:$4 sm:$0xff]  }
  0x76   :  { %v8770_v46 = vld [vmem:[#allocation2 + $0x260] ss:$16 sps:$4 sm:$0xff]   ;;  %v8773_v47 = vld [vmem:[#allocation2 + $0x268] ss:$16 sps:$4 sm:$0xff]   ;;  %v8781_v49 = vld [vmem:[#allocation2 + $0x28c] ss:$16 sps:$4 sm:$0xff]  }
  0x77   :  { %351 = vmatpush1.bf16.msra.mxu0 %v8695_v29  ;;  %404 = vmatpush1.bf16.msra.mxu1 %v8696_v30  ;;  %v8745_v29 = vld [vmem:[#allocation2 + $0xe0] ss:$16 sps:$4 sm:$0xff]   ;;  %v8748_v30 = vld [vmem:[#allocation2 + $0xe8] ss:$16 sps:$4 sm:$0xff]   ;;  %v8784_v52 = vld [vmem:[#allocation2 + $0x2a4] ss:$16 sps:$4 sm:$0xff]  }
  0x78   :  { %352 = vmatprep.subr.bf16.mxu0 %v8697_v33  ;;  %405 = vmatprep.subr.bf16.mxu1 %v8699_v34  ;;  %v8753_v33 = vld [vmem:[#allocation2 + $0x204] ss:$16 sps:$4 sm:$0xff]   ;;  %v8756_v34 = vld [vmem:[#allocation2 + $0x20c] ss:$16 sps:$4 sm:$0xff]   ;;  %v8776_v50 = vld [vmem:[#allocation2 + $0x280] ss:$16 sps:$4 sm:$0xff]  }
  0x79   :  { %v8779_v51 = vld [vmem:[#allocation2 + $0x288] ss:$16 sps:$4 sm:$0xff]   ;;  %v8787_v53 = vld [vmem:[#allocation2 + $0x2ac] ss:$16 sps:$4 sm:$0xff]   ;;  %v8789_v58 = vld [vmem:[#allocation2 + $0x2c0] ss:$16 sps:$4 sm:$0xff]  }
  0x7a   :  { %v8797_v60 = vld [vmem:[#allocation2 + $0x2e4] ss:$16 sps:$4 sm:$0xff]   ;;  %v8800_v61 = vld [vmem:[#allocation2 + $0x2ec] ss:$16 sps:$4 sm:$0xff]   ;;  %vm9628_vm2 = vmmov 0   ;;  %s9629_s20 = smov [#allocation11]  }
  0x7b   :  { %353 = vmatpush1.bf16.msra.mxu0 %v8701_v38  ;;  %406 = vmatpush1.bf16.msra.mxu1 %v8702_v40  ;;  %v8763_v38 = vld [vmem:[#allocation2 + $0x22c] ss:$16 sps:$4 sm:$0xff]   ;;  %v8761_v40 = vld [vmem:[#allocation2 + $0x228] ss:$16 sps:$4 sm:$0xff]   ;;  %v8801_v4 = vld [vmem:[#allocation7 + $0x300] ss:$12 sps:$4 sm:$0xff]  }
  0x7c   :  { %616 = vmatprep.subr.bf16.mxu0 %v8705_v45  ;;  %669 = vmatprep.subr.bf16.mxu1 %v8708_v48  ;;  %v8772_v45 = vld [vmem:[#allocation2 + $0x264] ss:$16 sps:$4 sm:$0xff]   ;;  %v8829_v5 = vld [vmem:[#allocation7 + $0x308] ss:$12 sps:$4 sm:$0xff]   ;;  %s7122_s21 = sshll.u32 %s9629_s20, 4  ;;  %s7123_s21 = int_to_ptr.vmem [resolvable:$true] %s7122_s21 }
  0x7d   :  { %v8778_v48 = vld [vmem:[#allocation2 + $0x284] ss:$16 sps:$4 sm:$0xff]   ;;  %s9585_s22 = scalar_lea.vmem %s7123_s21, 32  ;;  %p9590_p13 = scmp.lt.s32.totalorder %s7123_s21, %s7123_s21 }
  0x7e   :  { %371 = vmatmul.mubr.bf16.vlgmr.msra.gmra.mrb[0].mxu0 %v143_v56  ;;  %424 = vmatmul.mubr.bf16.vlgmr.msra.gmra.mrb[0].mxu1 %v143_v56  ;;  %v8794_v56 = vld [vmem:[#allocation2 + $0x2cc] ss:$16 sps:$4 sm:$0xff]   ;;  %p9586_p12 = scmp.ne.s32.totalorder %s7123_s21, %s9585_s22  ;;  %p9591_p0 = scmp.lt.s32.totalorder %s9585_s22, %s9585_s22 }
  0x7f   :  { %617 = vmatpush1.bf16.msra.mxu0 %v8703_v54  ;;  %670 = vmatpush1.bf16.msra.mxu1 %v8706_v55  ;;  %v8782_v54 = vld [vmem:[#allocation2 + $0x2a0] ss:$16 sps:$4 sm:$0xff]   ;;  %v8791_v55 = vld [vmem:[#allocation2 + $0x2c4] ss:$16 sps:$4 sm:$0xff]  }
  0x80   :  { %618 = vmatprep.subr.bf16.mxu0 %v8711_v59  ;;  %671 = vmatprep.subr.bf16.mxu1 %v8714_v62  ;;  %v8792_v59 = vld [vmem:[#allocation2 + $0x2c8] ss:$16 sps:$4 sm:$0xff]   ;;  %v8795_v62 = vld [vmem:[#allocation2 + $0x2e0] ss:$16 sps:$4 sm:$0xff]   ;;  %p9592_p1 = por %p9591_p0, %p9590_p13 }
  0x81   :  { %380 = vmatprep.mubr.bf16.mxu0 %v9626_v0  ;;  %433 = vmatprep.mubr.bf16.mxu1 %v9626_v0 }
  0x82   :  { %p9593_p2 = pnand %p9592_p1, %p9586_p12 }
  0x83   :  { %619 = vmatpush1.bf16.msra.mxu0 %v8709_v1  ;;  %672 = vmatpush1.bf16.msra.mxu1 %v8712_v2  ;;  %v8798_v1 = vld [vmem:[#allocation2 + $0x2e8] ss:$16 sps:$4 sm:$0xff]  }
  0x84   :  { %620 = vmatprep.subr.bf16.mxu0 %v8717_v3  ;;  %673 = vmatprep.subr.bf16.mxu1 %v8720_v6  ;;  %v8803_v2 = vld [vmem:[#allocation7 + $0x304] ss:$12 sps:$4 sm:$0xff]   ;;  %v8828_v3 = vld [vmem:[#allocation7 + $0x3c8] ss:$12 sps:$4 sm:$0xff]  }
  0x85   :  { %v8806_v6 = vld [vmem:[#allocation7 + $0x31c] ss:$12 sps:$4 sm:$0xff]  }
  0x86   :  { %381 = vmatmul.mubr.bf16.gmra.mrb[4].mxu0 %v144_v9  ;;  %434 = vmatmul.mubr.bf16.gmra.mrb[4].mxu1 %v144_v9  ;;  %v8834_v9 = vld [vmem:[#allocation7 + $0x320] ss:$12 sps:$4 sm:$0xff]  }
  0x87   :  { %621 = vmatpush1.bf16.msra.mxu0 %v8715_v7  ;;  %674 = vmatpush1.bf16.msra.mxu1 %v8718_v8  ;;  %v8833_v7 = vld [vmem:[#allocation7 + $0x3e0] ss:$12 sps:$4 sm:$0xff]   ;;  %v8804_v8 = vld [vmem:[#allocation7 + $0x318] ss:$12 sps:$4 sm:$0xff]  }
  0x88   :  { %622 = vmatprep.subr.bf16.mxu0 %v8723_v10  ;;  %675 = vmatprep.subr.bf16.mxu1 %v8726_v11  ;;  %v8809_v10 = vld [vmem:[#allocation7 + $0x334] ss:$12 sps:$4 sm:$0xff]   ;;  %v8838_v11 = vld [vmem:[#allocation7 + $0x3f8] ss:$12 sps:$4 sm:$0xff]  }
  0x89   :  { %648 = vmatprep.mubr.bf16.mxu0 %v9626_v0  ;;  %701 = vmatprep.mubr.bf16.mxu1 %v9626_v0 }
  0x8b   :  { %623 = vmatpush1.bf16.msra.mxu0 %v8721_v12  ;;  %676 = vmatpush1.bf16.msra.mxu1 %v8724_v13  ;;  %v8807_v12 = vld [vmem:[#allocation7 + $0x330] ss:$12 sps:$4 sm:$0xff]   ;;  %v8839_v13 = vld [vmem:[#allocation7 + $0x338] ss:$12 sps:$4 sm:$0xff]  }
  0x8c   :  { %624 = vmatprep.subr.bf16.mxu0 %v8729_v14  ;;  %677 = vmatprep.subr.bf16.mxu1 %v8732_v15  ;;  %v8812_v14 = vld [vmem:[#allocation7 + $0x34c] ss:$12 sps:$4 sm:$0xff]   ;;  %v8843_v15 = vld [vmem:[#allocation7 + $0x410] ss:$12 sps:$4 sm:$0xff]  }
  0x8f   :  { %625 = vmatpush1.bf16.msra.mxu0 %v8727_v16  ;;  %678 = vmatpush1.bf16.msra.mxu1 %v8730_v17  ;;  %v8813_v16 = vld [vmem:[#allocation7 + $0x360] ss:$12 sps:$4 sm:$0xff]   ;;  %v8818_v17 = vld [vmem:[#allocation7 + $0x37c] ss:$12 sps:$4 sm:$0xff]  }
  0x90   :  { %626 = vmatprep.subr.bf16.mxu0 %v8735_v18  ;;  %679 = vmatprep.subr.bf16.mxu1 %v8738_v19  ;;  %v8816_v18 = vld [vmem:[#allocation7 + $0x378] ss:$12 sps:$4 sm:$0xff]   ;;  %v8821_v19 = vld [vmem:[#allocation7 + $0x394] ss:$12 sps:$4 sm:$0xff]  }
  0x93   :  { %627 = vmatpush1.bf16.msra.mxu0 %v8733_v20  ;;  %680 = vmatpush1.bf16.msra.mxu1 %v8736_v21  ;;  %v8819_v20 = vld [vmem:[#allocation7 + $0x390] ss:$12 sps:$4 sm:$0xff]   ;;  %v8824_v21 = vld [vmem:[#allocation7 + $0x3ac] ss:$12 sps:$4 sm:$0xff]  }
  0x94   :  { %628 = vmatprep.subr.bf16.mxu0 %v8741_v22  ;;  %681 = vmatprep.subr.bf16.mxu1 %v8744_v23  ;;  %v8822_v22 = vld [vmem:[#allocation7 + $0x3a8] ss:$12 sps:$4 sm:$0xff]   ;;  %v8825_v23 = vld [vmem:[#allocation7 + $0x3c0] ss:$12 sps:$4 sm:$0xff]  }
  0x97   :  { %629 = vmatpush1.bf16.msra.mxu0 %v8739_v24  ;;  %682 = vmatpush1.bf16.msra.mxu1 %v8742_v25  ;;  %v8832_v24 = vld [vmem:[#allocation7 + $0x3dc] ss:$12 sps:$4 sm:$0xff]   ;;  %v8830_v25 = vld [vmem:[#allocation7 + $0x3d8] ss:$12 sps:$4 sm:$0xff]  }
  0x98   :  { %630 = vmatprep.subr.bf16.mxu0 %v8747_v26  ;;  %683 = vmatprep.subr.bf16.mxu1 %v8750_v27  ;;  %v8837_v26 = vld [vmem:[#allocation7 + $0x3f4] ss:$12 sps:$4 sm:$0xff]   ;;  %v8835_v27 = vld [vmem:[#allocation7 + $0x3f0] ss:$12 sps:$4 sm:$0xff]  }
  0x9b   :  { %631 = vmatpush1.bf16.msra.mxu0 %v8745_v29  ;;  %684 = vmatpush1.bf16.msra.mxu1 %v8748_v30  ;;  %v8842_v29 = vld [vmem:[#allocation7 + $0x40c] ss:$12 sps:$4 sm:$0xff]   ;;  %v8840_v30 = vld [vmem:[#allocation7 + $0x408] ss:$12 sps:$4 sm:$0xff]  }
  0x9c   :  { %926 = vmatprep.subr.bf16.mxu0 %v8753_v33  ;;  %979 = vmatprep.subr.bf16.mxu1 %v8756_v34  ;;  %v8844_v33 = vld [vmem:[#allocation7 + $0x350] ss:$12 sps:$4 sm:$0xff]  }
  0x9d   :  { %v8847_v34 = vld [vmem:[#allocation7 + $0x424] ss:$12 sps:$4 sm:$0xff]  }
  0x9e   :  { %649 = vmatmul.mubr.bf16.vlgmr.msra.gmra.mrb[0].mxu0 %v9737_v31  ;;  %702 = vmatmul.mubr.bf16.vlgmr.msra.gmra.mrb[0].mxu1 %v9737_v31  ;;  %v8775_v31 = vld [vmem:[#allocation2 + $0x26c] ss:$16 sps:$4 sm:$0xff]  }
  0x9f   :  { %927 = vmatpush1.bf16.msra.mxu0 %v8751_v35  ;;  %980 = vmatpush1.bf16.msra.mxu1 %v8754_v36  ;;  %v8848_v35 = vld [vmem:[#allocation7 + $0x428] ss:$12 sps:$4 sm:$0xff]   ;;  %v8845_v36 = vld [vmem:[#allocation7 + $0x420] ss:$12 sps:$4 sm:$0xff]  }
  0xa0   :  { %928 = vmatprep.subr.bf16.mxu0 %v8760_v37  ;;  %981 = vmatprep.subr.bf16.mxu1 %v8763_v38  ;;  %v8849_v37 = vld [vmem:[#allocation7 + $0x368] ss:$12 sps:$4 sm:$0xff]  }
  0xa1   :  { %658 = vmatprep.mubr.bf16.mxu0 %v9626_v0  ;;  %711 = vmatprep.mubr.bf16.mxu1 %v9626_v0  ;;  %v8852_v38 = vld [vmem:[#allocation7 + $0x43c] ss:$12 sps:$4 sm:$0xff]  }
  0xa3   :  { %929 = vmatpush1.bf16.msra.mxu0 %v8758_v39  ;;  %982 = vmatpush1.bf16.msra.mxu1 %v8761_v40  ;;  %v8853_v39 = vld [vmem:[#allocation7 + $0x440] ss:$12 sps:$4 sm:$0xff]   ;;  %v8850_v40 = vld [vmem:[#allocation7 + $0x438] ss:$12 sps:$4 sm:$0xff]  }
  0xa4   :  { %930 = vmatprep.subr.bf16.mxu0 %v8766_v41  ;;  %983 = vmatprep.subr.bf16.mxu1 %v8769_v42  ;;  %v8854_v41 = vld [vmem:[#allocation7 + $0x380] ss:$12 sps:$4 sm:$0xff]  }
  0xa5   :  { %v8857_v42 = vld [vmem:[#allocation7 + $0x454] ss:$12 sps:$4 sm:$0xff]  }
  0xa6   :  { %659 = vmatmul.mubr.bf16.gmra.mrb[4].mxu0 %v9742_v32  ;;  %712 = vmatmul.mubr.bf16.gmra.mrb[4].mxu1 %v9742_v32  ;;  %v8785_v32 = vld [vmem:[#allocation2 + $0x2a8] ss:$16 sps:$4 sm:$0xff]  }
  0xa7   :  { %931 = vmatpush1.bf16.msra.mxu0 %v8764_v43  ;;  %984 = vmatpush1.bf16.msra.mxu1 %v8767_v44  ;;  %v8858_v43 = vld [vmem:[#allocation7 + $0x458] ss:$12 sps:$4 sm:$0xff]   ;;  %v8855_v44 = vld [vmem:[#allocation7 + $0x450] ss:$12 sps:$4 sm:$0xff]  }
  0xa8   :  { %932 = vmatprep.subr.bf16.mxu0 %v8772_v45  ;;  %985 = vmatprep.subr.bf16.mxu1 %v8775_v31  ;;  %v8859_v45 = vld [vmem:[#allocation7 + $0x398] ss:$12 sps:$4 sm:$0xff]  }
  0xa9   :  { %958 = vmatprep.mubr.bf16.mxu0 %v9626_v0  ;;  %1011 = vmatprep.mubr.bf16.mxu1 %v9626_v0  ;;  %v8862_v31 = vld [vmem:[#allocation7 + $0x46c] ss:$12 sps:$4 sm:$0xff]  }
  0xab   :  { %933 = vmatpush1.bf16.msra.mxu0 %v8770_v46  ;;  %986 = vmatpush1.bf16.msra.mxu1 %v8773_v47  ;;  %v8863_v46 = vld [vmem:[#allocation7 + $0x470] ss:$12 sps:$4 sm:$0xff]   ;;  %v8860_v47 = vld [vmem:[#allocation7 + $0x468] ss:$12 sps:$4 sm:$0xff]  }
  0xac   :  { %934 = vmatprep.subr.bf16.mxu0 %v8778_v48  ;;  %987 = vmatprep.subr.bf16.mxu1 %v8781_v49  ;;  %v8864_v48 = vld [vmem:[#allocation7 + $0x3b0] ss:$12 sps:$4 sm:$0xff]  }
  0xad   :  { %v8867_v49 = vld [vmem:[#allocation7 + $0x484] ss:$12 sps:$4 sm:$0xff]  }
  0xaf   :  { %935 = vmatpush1.bf16.msra.mxu0 %v8776_v50  ;;  %988 = vmatpush1.bf16.msra.mxu1 %v8779_v51  ;;  %v8868_v50 = vld [vmem:[#allocation7 + $0x548] ss:$12 sps:$4 sm:$0xff]   ;;  %v1048_v51 = vld [vmem:[#allocation5] sm:$0xf] }
  0xb0   :  { %936 = vmatprep.subr.bf16.mxu0 %v8784_v52  ;;  %989 = vmatprep.subr.bf16.mxu1 %v8787_v53  ;;  %v1052_v52 = vsub.s32 0, %v9732_v28  ;;  %v1060_v53 = vsub.s32 2, %v9732_v28 }
  0xb3   :  { %937 = vmatpush1.bf16.msra.mxu0 %v8782_v54  ;;  %990 = vmatpush1.bf16.msra.mxu1 %v8785_v32  ;;  %v1056_v54 = vsub.s32 1, %v9732_v28  ;;  %v1064_v32 = vsub.s32 3, %v9732_v28 }
  0xb4   :  { %938 = vmatprep.subr.bf16.mxu0 %v8791_v55  ;;  %991 = vmatprep.subr.bf16.mxu1 %v8794_v56  ;;  %v1053_v55 = vrot.slane %v1048_v51, %v1052_v52  ;;  %v1061_v56 = vrot.slane %v1048_v51, %v1060_v53 }
  0xb7   :  { %939 = vmatpush1.bf16.msra.mxu0 %v8789_v58  ;;  %992 = vmatpush1.bf16.msra.mxu1 %v8792_v59  ;;  %v9798_v58 = vrot.slane %v1048_v51, %v1056_v54  ;;  %v9800_v59 = vrot.slane %v1048_v51, %v1064_v32 }
  0xb8   :  { %940 = vmatprep.subr.bf16.mxu0 %v8797_v60  ;;  %993 = vmatprep.subr.bf16.mxu1 %v8800_v61 }
  0xbb   :  { %941 = vmatpush1.bf16.msra.mxu0 %v8795_v62  ;;  %994 = vmatpush1.bf16.msra.mxu1 %v8798_v1 }
  0xbc   :  { %1919 = vmatprep.subr.bf16.mxu0 %v8803_v2  ;;  %7808 = vmatprep.subr.bf16.mxu1 %v8828_v3 }
  0xbe   :  { %959 = vmatmul.mubr.bf16.vlgmr.msra.gmra.mrb[0].mxu0 %v9758_v57  ;;  %1012 = vmatmul.mubr.bf16.vlgmr.msra.gmra.mrb[0].mxu1 %v9758_v57  ;;  %v8810_v57 = vld [vmem:[#allocation7 + $0x348] ss:$12 sps:$4 sm:$0xff]  }
  0xbf   :  { %968 = vmatprep.mubr.bf16.mxu0 %v9626_v0  ;;  %1021 = vmatprep.mubr.bf16.mxu1 %v9626_v0  ;;  %v8815_v0 = vld [vmem:[#allocation7 + $0x364] ss:$12 sps:$4 sm:$0xff]  }
  0xc0   :  { %1920 = vmatpush1.bf16.msra.mxu0 %v8801_v4  ;;  %7809 = vmatpush3.bf16.msra.mxu1 %v8829_v5 }
  0xc1   :  { %1921 = vmatprep.subr.bf16.mxu0 %v8806_v6  ;;  %7810 = vmatprep.subr.bf16.mxu1 %v8833_v7 }
  0xc4   :  { %1922 = vmatpush1.bf16.msra.mxu0 %v8804_v8  ;;  %7811 = vmatpush3.bf16.msra.mxu1 %v8834_v9 }
  0xc5   :  { %1923 = vmatprep.subr.bf16.mxu0 %v8809_v10  ;;  %7812 = vmatprep.subr.bf16.mxu1 %v8838_v11 }
  0xc6   :  { %969 = vmatmul.mubr.bf16.gmra.mrb[4].mxu0 %v9764_v63  ;;  %1022 = vmatmul.mubr.bf16.gmra.mrb[4].mxu1 %v9764_v63  ;;  %v8827_v63 = vld [vmem:[#allocation7 + $0x3c4] ss:$12 sps:$4 sm:$0xff]  }
  0xc8   :  { %1924 = vmatpush1.bf16.msra.mxu0 %v8807_v12  ;;  %7813 = vmatpush3.bf16.msra.mxu1 %v8839_v13 }
  0xc9   :  { %1925 = vmatprep.subr.bf16.mxu0 %v8812_v14  ;;  %7814 = vmatprep.subr.bf16.mxu1 %v8843_v15 }
  0xcc   :  { %1926 = vmatpush1.bf16.msra.mxu0 %v8810_v57  ;;  %7815 = vmatpush3.bf16.msra.mxu1 %v8844_v33 }
  0xcd   :  { %1927 = vmatprep.subr.bf16.mxu0 %v8815_v0  ;;  %7816 = vmatprep.subr.bf16.mxu1 %v8848_v35 }
  0xd0   :  { %1928 = vmatpush1.bf16.msra.mxu0 %v8813_v16  ;;  %7817 = vmatpush3.bf16.msra.mxu1 %v8849_v37 }
  0xd1   :  { %1929 = vmatprep.subr.bf16.mxu0 %v8818_v17  ;;  %7818 = vmatprep.subr.bf16.mxu1 %v8853_v39 }
  0xd4   :  { %1930 = vmatpush1.bf16.msra.mxu0 %v8816_v18  ;;  %7819 = vmatpush3.bf16.msra.mxu1 %v8854_v41 }
  0xd5   :  { %1931 = vmatprep.subr.bf16.mxu0 %v8821_v19  ;;  %7820 = vmatprep.subr.bf16.mxu1 %v8858_v43 }
  0xd8   :  { %1932 = vmatpush1.bf16.msra.mxu0 %v8819_v20  ;;  %7821 = vmatpush3.bf16.msra.mxu1 %v8859_v45 }
  0xd9   :  { %1933 = vmatprep.subr.bf16.mxu0 %v8824_v21  ;;  %7822 = vmatprep.subr.bf16.mxu1 %v8863_v46 }
  0xdc   :  { %1934 = vmatpush1.bf16.msra.mxu0 %v8822_v22  ;;  %7823 = vmatpush3.bf16.msra.mxu1 %v8864_v48 }
  0xdd   :  { %1935 = vmatprep.subr.bf16.mxu0 %v8827_v63  ;;  %7836 = vmatprep.subr.bf16.mxu1 %v8868_v50 }
  0xe0   :  { %1936 = vmatpush1.bf16.msra.mxu0 %v8825_v23 }
  0xe1   :  { %1937 = vmatprep.subr.bf16.mxu0 %v8832_v24 }
  0xe4   :  { %1938 = vmatpush1.bf16.msra.mxu0 %v8830_v25 }
  0xe5   :  { %1939 = vmatprep.subr.bf16.mxu0 %v8837_v26 }
  0xe8   :  { %1940 = vmatpush1.bf16.msra.mxu0 %v8835_v27 }
  0xe9   :  { %1941 = vmatprep.subr.bf16.mxu0 %v8842_v29 }
  0xec   :  { %1942 = vmatpush1.bf16.msra.mxu0 %v8840_v30 }
  0xed   :  { %1943 = vmatprep.subr.bf16.mxu0 %v8847_v34 }
  0xf0   :  { %1944 = vmatpush1.bf16.msra.mxu0 %v8845_v36 }
  0xf1   :  { %1945 = vmatprep.subr.bf16.mxu0 %v8852_v38 }
  0xf4   :  { %1946 = vmatpush1.bf16.msra.mxu0 %v8850_v40 }
  0xf5   :  { %1947 = vmatprep.subr.bf16.mxu0 %v8857_v42 }
  0xf8   :  { %1948 = vmatpush1.bf16.msra.mxu0 %v8855_v44 }
  0xf9   :  { %1949 = vmatprep.subr.bf16.mxu0 %v8862_v31 }
  0xfc   :  { %1950 = vmatpush1.bf16.msra.mxu0 %v8860_v47 }
  0xfd   :  { %1970 = vmatprep.subr.bf16.mxu0 %v8867_v49 }
 0x191   :  { %v960_v60 = vpop.f32.mrb[0].mxu0  ;;  %v1013_v61 = vpop.f32.mrb[0].mxu1 }
 0x192   :  { %v1070_v62 = vadd.f32 %v1053_v55, %v960_v60  ;;  %v1072_v1 = vadd.f32 %v1061_v56, %v1013_v61  ;;  %v962_v2 = vpop.f32.mrb[1].mxu0  ;;  %v1015_v3 = vpop.f32.mrb[1].mxu1 }
 0x193   :  { %v1071_v4 = vadd.f32 %v9798_v58, %v962_v2  ;;  %v1073_v5 = vadd.f32 %v9800_v59, %v1015_v3  ;;  %v964_v6 = vpop.f32.mrb[2].mxu0  ;;  %v1017_v7 = vpop.f32.mrb[2].mxu1 }
 0x194   :  { %v9804_v8 = vmax.f32 %v1070_v62, 0.0  ;;  %v9806_v9 = vmax.f32 %v1072_v1, 0.0  ;;  %v1074_v10 = vadd.f32 %v1053_v55, %v964_v6  ;;  %v1076_v11 = vadd.f32 %v1061_v56, %v1017_v7  ;;  %v966_v12 = vpop.f32.mrb[3].mxu0  ;;  %v1019_v13 = vpop.f32.mrb[3].mxu1 }
 0x195   :  { %v9808_v14 = vmax.f32 %v1071_v4, 0.0  ;;  %v9810_v15 = vmax.f32 %v1073_v5, 0.0  ;;  %v1075_v57 = vadd.f32 %v9798_v58, %v966_v12  ;;  %v1077_v0 = vadd.f32 %v9800_v59, %v1019_v13 }
 0x196   :  { %v1238_v16 = vrot.slane %v9804_v8, 2  ;;  %v2827_v17 = vrot.slane %v9804_v8, 4  ;;  %v1240_v18 = vrot.slane %v9806_v9, 2  ;;  %v1090_v19 = vmax.f32 %v1074_v10, 0.0 }
 0x197   :  { %v1092_v20 = vmax.f32 %v1076_v11, 0.0  ;;  %v9817_v21 = vmax.f32 %v1075_v57, 0.0  ;;  %v9819_v22 = vmax.f32 %v1077_v0, 0.0  ;;  %v2829_v63 = vrot.slane %v9806_v9, 4 }
 0x198   :  { %v1239_v23 = vrot.slane %v9808_v14, 2  ;;  %v2828_v24 = vrot.slane %v9808_v14, 4  ;;  %v1241_v25 = vrot.slane %v9810_v15, 2  ;;  %v9826_v29 = vpack.c.bf16 %v1090_v19, %v9804_v8 }
 0x199   :  { %v970_v26 = vpop.f32.mrb[4].mxu0  ;;  %v1023_v27 = vpop.f32.mrb[4].mxu1  ;;  %v1242_v30 = vrot.slane %v1090_v19, 2  ;;  %v2831_v33 = vrot.slane %v1090_v19, 4  ;;  %v9829_v34 = vpack.c.bf16 %v1092_v20, %v9806_v9  ;;  %v2830_v37 = vrot.slane %v9810_v15, 4 }
 0x19a   :  { %v972_v35 = vpop.f32.mrb[5].mxu0  ;;  %v1025_v36 = vpop.f32.mrb[5].mxu1  ;;  %v1244_v38 = vrot.slane %v1092_v20, 2  ;;  %v2833_v39 = vrot.slane %v1092_v20, 4  ;;  %v1243_v40 = vrot.slane %v9817_v21, 2  ;;  %v2832_v45 = vrot.slane %v9817_v21, 4 }
 0x19b   :  { %v974_v41 = vpop.f32.mrb[6].mxu0  ;;  %v1027_v42 = vpop.f32.mrb[6].mxu1  ;;  %v1262_v43 = vsel %vm138_vm0, %v1238_v16, %v1242_v30  ;;  %v2851_v44 = vsel %vm726_vm1, %v2827_v17, %v2831_v33  ;;  %v1245_v31 = vrot.slane %v9819_v22, 2  ;;  %v1078_v50 = vadd.f32 %v1053_v55, %v970_v26  ;;  %v8894_v9 = vld [vmem:[#allocation7 + $0x500] ss:$12 sps:$4 sm:$0xff]  }
 0x19c   :  { %v976_v46 = vpop.f32.mrb[7].mxu0  ;;  %v1029_v47 = vpop.f32.mrb[7].mxu1  ;;  %v1264_v48 = vsel %vm138_vm0, %v1240_v18, %v1244_v38  ;;  %v2853_v49 = vsel %vm726_vm1, %v2829_v63, %v2833_v39  ;;  %v1080_v51 = vadd.f32 %v1061_v56, %v1023_v27  ;;  %v1079_v32 = vadd.f32 %v9798_v58, %v972_v35 }
 0x19d   :  { %v1081_v60 = vadd.f32 %v9800_v59, %v1025_v36  ;;  %v1082_v61 = vadd.f32 %v1053_v55, %v974_v41  ;;  %v1084_v62 = vadd.f32 %v1061_v56, %v1027_v42  ;;  %v9853_v1 = vmax.f32 %v1078_v50, 0.0  ;;  %v8865_v41 = vld [vmem:[#allocation7 + $0x480] ss:$12 sps:$4 sm:$0xff]  }
 0x19e   :  { %v9855_v2 = vmax.f32 %v1080_v51, 0.0  ;;  %v9857_v3 = vmax.f32 %v1079_v32, 0.0  ;;  %v1083_v13 = vadd.f32 %v9798_v58, %v976_v46  ;;  %v1085_v57 = vadd.f32 %v9800_v59, %v1029_v47  ;;  %v8872_v47 = vld [vmem:[#allocation7 + $0x49c] ss:$12 sps:$4 sm:$0xff]  }
 0x19f   :  { %v9859_v4 = vmax.f32 %v1081_v60, 0.0  ;;  %v9861_v5 = vmax.f32 %v1082_v61, 0.0  ;;  %v9863_v6 = vmax.f32 %v1084_v62, 0.0  ;;  %v1246_v7 = vrot.slane %v9853_v1, 2  ;;  %v8873_v62 = vld [vmem:[#allocation7 + $0x560] ss:$12 sps:$4 sm:$0xff]  }
 0x1a0   :  { %v2835_v10 = vrot.slane %v9853_v1, 4  ;;  %v1248_v11 = vrot.slane %v9855_v2, 2  ;;  %v2837_v55 = vrot.slane %v9855_v2, 4  ;;  %v1247_v56 = vrot.slane %v9857_v3, 2 }
 0x1a1   :  { %v1249_v12 = vrot.slane %v9859_v4, 2  ;;  %v1258_v0 = vsel %vm138_vm0, %v1242_v30, %v1246_v7  ;;  %v2834_v30 = vrot.slane %v9819_v22, 4  ;;  %v2836_v36 = vrot.slane %v9857_v3, 4 }
 0x1a2   :  { %v2847_v19 = vsel %vm726_vm1, %v2831_v33, %v2835_v10  ;;  %v1260_v20 = vsel %vm138_vm0, %v1244_v38, %v1248_v11  ;;  %v2849_v26 = vsel %vm726_vm1, %v2833_v39, %v2837_v55  ;;  %v1270_v27 = vpack.c.bf16 %v1258_v0, %v1262_v43 }
 0x1a3   :  { %v9885_v58 = vpack.c.bf16 %v2847_v19, %v2851_v44  ;;  %v9887_v59 = vpack.c.bf16 %v1260_v20, %v1264_v48  ;;  %v9889_v35 = vpack.c.bf16 %v2849_v26, %v2853_v49  ;;  %v1250_v33 = vrot.slane %v9861_v5, 2  ;;  %v8869_v44 = vld [vmem:[#allocation7 + $0x488] ss:$12 sps:$4 sm:$0xff]  }
 0x1a4   :  { %v1252_v38 = vrot.slane %v9863_v6, 2  ;;  %v1099_v42 = vmax.f32 %v1083_v13, 0.0  ;;  %v9895_v46 = vmax.f32 %v1085_v57, 0.0  ;;  %v1259_v39 = vsel %vm138_vm0, %v1243_v40, %v1247_v56  ;;  %v8870_v13 = vld [vmem:[#allocation7 + $0x498] ss:$12 sps:$4 sm:$0xff]  }
 0x1a5   :  { %v1263_v43 = vsel %vm138_vm0, %v1239_v23, %v1243_v40  ;;  %v1254_v49 = vsel %vm138_vm0, %v1246_v7, %v1250_v33  ;;  %v1266_v50 = vsel %vm138_vm0, %v1250_v33, %v1238_v16  ;;  %v1261_v51 = vsel %vm138_vm0, %v1245_v31, %v1249_v12  ;;  %v8874_v7 = vld [vmem:[#allocation7 + $0x4a0] ss:$12 sps:$4 sm:$0xff]  }
 0x1a6   :  { %v1271_v48 = vpack.c.bf16 %v1259_v39, %v1263_v43  ;;  %v2838_v32 = vrot.slane %v9859_v4, 4  ;;  %v2839_v60 = vrot.slane %v9861_v5, 4  ;;  %v1251_v61 = vrot.slane %v1099_v42, 2  ;;  %v8877_v26 = vld [vmem:[#allocation7 + $0x4b4] ss:$12 sps:$4 sm:$0xff]  }
 0x1a7   :  { %v1253_v40 = vrot.slane %v9895_v46, 2  ;;  %v1274_v57 = vpack.c.bf16 %v1266_v50, %v1254_v49  ;;  %v1265_v16 = vsel %vm138_vm0, %v1241_v25, %v1245_v31  ;;  %v1256_v0 = vsel %vm138_vm0, %v1248_v11, %v1252_v38  ;;  %v8878_v31 = vld [vmem:[#allocation7 + $0x578] ss:$12 sps:$4 sm:$0xff]   ;;  %v8875_v49 = vld [vmem:[#allocation7 + $0x4b0] ss:$12 sps:$4 sm:$0xff]  }
 0x1a8   :  { %1951 = vmatprep.mubr.bf16.mxu0 %v1271_v48  ;;  %2053 = vmatprep.mubr.bf16.mxu1 %v1271_v48  ;;  %v1255_v19 = vsel %vm138_vm0, %v1247_v56, %v1251_v61  ;;  %v1267_v20 = vsel %vm138_vm0, %v1251_v61, %v1239_v23  ;;  %v1273_v33 = vpack.c.bf16 %v1261_v51, %v1265_v16  ;;  %v2840_v39 = vrot.slane %v1099_v42, 4  ;;  %v8879_v50 = vld [vmem:[#allocation7 + $0x4b8] ss:$12 sps:$4 sm:$0xff]   ;;  %v8893_v16 = vld [vmem:[#allocation7 + $0x5c0] ss:$12 sps:$4 sm:$0xff]  }
 0x1a9   :  { %1952 = vmatmul.mubr.bf16.vlgmr.msra.gmra.mrb[8].mxu0 %v1270_v27  ;;  %2054 = vmatmul.mubr.bf16.vlgmr.msra.gmra.mrb[8].mxu1 %v1270_v27  ;;  %v1275_v43 = vpack.c.bf16 %v1267_v20, %v1255_v19  ;;  %v1257_v11 = vsel %vm138_vm0, %v1249_v12, %v1253_v40  ;;  %v1269_v56 = vsel %vm138_vm0, %v1253_v40, %v1241_v25  ;;  %v2841_v27 = vrot.slane %v9863_v6, 4  ;;  %v8883_v40 = vld [vmem:[#allocation7 + $0x590] ss:$12 sps:$4 sm:$0xff]   ;;  %v8899_v19 = vld [vmem:[#allocation7 + $0x518] ss:$12 sps:$4 sm:$0xff]  }
 0x1aa   :  { %1971 = vmatpush1.bf16.msra.mxu0 %v8865_v41  ;;  %7837 = vmatpush3.bf16.msra.mxu1 %v8869_v44  ;;  %v9933_v23 = vpack.c.bf16 %v1269_v56, %v1257_v11  ;;  %v1268_v41 = vsel %vm138_vm0, %v1252_v38, %v1240_v18  ;;  %v9941_v44 = vpack.c.bf16 %v9817_v21, %v9808_v14  ;;  %v2842_v12 = vrot.slane %v9895_v46, 4  ;;  %v8902_v20 = vld [vmem:[#allocation7 + $0x52c] ss:$12 sps:$4 sm:$0xff]   ;;  %v8909_v56 = vld [vmem:[#allocation7 + $0x8] ss:$12 sps:$4 sm:$0xff]  }
 0x1ab   :  { %1972 = vmatprep.subr.bf16.mxu0 %v8872_v47  ;;  %7838 = vmatprep.subr.bf16.mxu1 %v8873_v62  ;;  %v9944_v25 = vpack.c.bf16 %v1268_v41, %v1256_v0  ;;  %v9947_v47 = vpack.c.bf16 %v1099_v42, %v9857_v3  ;;  %v9951_v48 = vpack.c.bf16 %v9861_v5, %v9853_v1  ;;  %v8882_v5 = vld [vmem:[#allocation7 + $0x4cc] ss:$12 sps:$4 sm:$0xff]  }
 0x1ac   :  { %1961 = vmatprep.mubr.bf16.mxu0 %v1275_v43  ;;  %2061 = vmatprep.mubr.bf16.mxu1 %v1275_v43  ;;  %v9955_v18 = vpack.c.bf16 %v9819_v22, %v9810_v15  ;;  %v9959_v38 = vpack.c.bf16 %v9895_v46, %v9859_v4  ;;  %v9963_v51 = vpack.c.bf16 %v9863_v6, %v9855_v2  ;;  %v8884_v22 = vld [vmem:[#allocation7 + $0x4d0] ss:$12 sps:$4 sm:$0xff]   ;;  %v8888_v15 = vld [vmem:[#allocation7 + $0x5a8] ss:$12 sps:$4 sm:$0xff]   ;;  %v8890_v2 = vld [vmem:[#allocation7 + $0x4f8] ss:$12 sps:$4 sm:$0xff]  }
 0x1ad   :  { %v2848_v3 = vsel %vm726_vm1, %v2832_v45, %v2836_v36  ;;  %v2852_v4 = vsel %vm726_vm1, %v2828_v24, %v2832_v45  ;;  %v2844_v42 = vsel %vm726_vm1, %v2836_v36, %v2840_v39  ;;  %v2856_v6 = vsel %vm726_vm1, %v2840_v39, %v2828_v24  ;;  %v8880_v45 = vld [vmem:[#allocation7 + $0x4c8] ss:$12 sps:$4 sm:$0xff]   ;;  %v8898_v0 = vld [vmem:[#allocation7 + $0x5d8] ss:$12 sps:$4 sm:$0xff]   ;;  %v8904_v39 = vld [vmem:[#allocation7 + $0x530] ss:$12 sps:$4 sm:$0xff]  }
 0x1ae   :  { %1973 = vmatpush1.bf16.msra.mxu0 %v8870_v13  ;;  %7839 = vmatpush3.bf16.msra.mxu1 %v8874_v7  ;;  %v9981_v46 = vpack.c.bf16 %v2848_v3, %v2852_v4  ;;  %v9983_v61 = vpack.c.bf16 %v2856_v6, %v2844_v42  ;;  %v2843_v21 = vsel %vm726_vm1, %v2835_v10, %v2839_v60  ;;  %v8885_v13 = vld [vmem:[#allocation7 + $0x4e0] ss:$12 sps:$4 sm:$0xff]   ;;  %v8889_v7 = vld [vmem:[#allocation7 + $0x4e8] ss:$12 sps:$4 sm:$0xff]   ;;  %v8907_v43 = vld [vmem:[#allocation7 + $0x544] ss:$12 sps:$4 sm:$0xff]  }
 0x1af   :  { %1974 = vmatprep.subr.bf16.mxu0 %v8877_v26  ;;  %7840 = vmatprep.subr.bf16.mxu1 %v8878_v31  ;;  %v2855_v14 = vsel %vm726_vm1, %v2839_v60, %v2827_v17  ;;  %v2850_v24 = vsel %vm726_vm1, %v2834_v30, %v2838_v32  ;;  %v2854_v1 = vsel %vm726_vm1, %v2830_v37, %v2834_v30  ;;  %v8887_v60 = vld [vmem:[#allocation7 + $0x4e4] ss:$12 sps:$4 sm:$0xff]   ;;  %v8908_v31 = vld [vmem:[#allocation7 + $0xc8] ss:$12 sps:$4 sm:$0xff]   ;;  %v8905_v11 = vld [vmem:[#allocation7 + $0x540] ss:$12 sps:$4 sm:$0xff]  }
 0x1b0   :  { %v2846_v10 = vsel %vm726_vm1, %v2838_v32, %v2842_v12  ;;  %v10005_v8 = vpack.c.bf16 %v2855_v14, %v2843_v21  ;;  %v10007_v17 = vpack.c.bf16 %v2850_v24, %v2854_v1  ;;  %v2858_v36 = vsel %vm726_vm1, %v2842_v12, %v2830_v37  ;;  %v8903_v26 = vld [vmem:[#allocation7 + $0x5f0] ss:$12 sps:$4 sm:$0xff]   ;;  %v8910_v41 = vld [vmem:[#allocation7 + $0x558] ss:$12 sps:$4 sm:$0xff]   ;;  %v8913_v12 = vld [vmem:[#allocation7 + $0xe0] ss:$12 sps:$4 sm:$0xff]  }
 0x1b1   :  { %1962 = vmatmul.mubr.bf16.gmra.mrb[12].mxu0 %v1274_v57  ;;  %2062 = vmatmul.mubr.bf16.gmra.mrb[12].mxu1 %v1274_v57  ;;  %v10013_v62 = vpack.c.bf16 %v2858_v36, %v2846_v10  ;;  %v2845_v30 = vsel %vm726_vm1, %v2837_v55, %v2841_v27  ;;  %v2857_v32 = vsel %vm726_vm1, %v2841_v27, %v2829_v63  ;;  %v8892_v57 = vld [vmem:[#allocation7 + $0x4fc] ss:$12 sps:$4 sm:$0xff]   ;;  %v8897_v55 = vld [vmem:[#allocation7 + $0x514] ss:$12 sps:$4 sm:$0xff]   ;;  %v8918_v3 = vld [vmem:[#allocation7 + $0xf8] ss:$12 sps:$4 sm:$0xff]  }
 0x1b2   :  { %1975 = vmatpush1.bf16.msra.mxu0 %v8875_v49  ;;  %7841 = vmatpush3.bf16.msra.mxu1 %v8879_v50  ;;  %v10023_v37 = vpack.c.bf16 %v2857_v32, %v2845_v30  ;;  %v8895_v63 = vld [vmem:[#allocation7 + $0x510] ss:$12 sps:$4 sm:$0xff]   ;;  %v8914_v49 = vld [vmem:[#allocation7 + $0x20] ss:$12 sps:$4 sm:$0xff]   ;;  %v8919_v4 = vld [vmem:[#allocation7 + $0x38] ss:$12 sps:$4 sm:$0xff]  }
 0x1b3   :  { %2002 = vmatprep.mubr.bf16.mxu0 %v1273_v33  ;;  %2101 = vmatprep.mubr.bf16.mxu1 %v1273_v33  ;;  %v8900_v33 = vld [vmem:[#allocation7 + $0x528] ss:$12 sps:$4 sm:$0xff]   ;;  %v8922_v42 = vld [vmem:[#allocation7 + $0x58c] ss:$12 sps:$4 sm:$0xff]   ;;  %v8923_v21 = vld [vmem:[#allocation7 + $0x110] ss:$12 sps:$4 sm:$0xff]  }
 0x1b4   :  { %1976 = vmatprep.subr.bf16.mxu0 %v8882_v5  ;;  %7842 = vmatprep.subr.bf16.mxu1 %v8883_v40  ;;  %v8912_v27 = vld [vmem:[#allocation7 + $0x55c] ss:$12 sps:$4 sm:$0xff]   ;;  %v8917_v50 = vld [vmem:[#allocation7 + $0x574] ss:$12 sps:$4 sm:$0xff]   ;;  %v8927_v40 = vld [vmem:[#allocation7 + $0x5a4] ss:$12 sps:$4 sm:$0xff]  }
 0x1b5   :  { %v8915_v5 = vld [vmem:[#allocation7 + $0x570] ss:$12 sps:$4 sm:$0xff]   ;;  %v8920_v6 = vld [vmem:[#allocation7 + $0x588] ss:$12 sps:$4 sm:$0xff]   ;;  %v8925_v14 = vld [vmem:[#allocation7 + $0x5a0] ss:$12 sps:$4 sm:$0xff]  }
 0x1b6   :  { %1977 = vmatpush1.bf16.msra.mxu0 %v8880_v45  ;;  %7843 = vmatpush3.bf16.msra.mxu1 %v8884_v22  ;;  %v8924_v45 = vld [vmem:[#allocation7 + $0x50] ss:$12 sps:$4 sm:$0xff]   ;;  %v8928_v24 = vld [vmem:[#allocation7 + $0x128] ss:$12 sps:$4 sm:$0xff]   ;;  %v8930_v36 = vld [vmem:[#allocation7 + $0x5b8] ss:$12 sps:$4 sm:$0xff]  }
 0x1b7   :  { %1978 = vmatprep.subr.bf16.mxu0 %v8887_v60  ;;  %7844 = vmatprep.subr.bf16.mxu1 %v8888_v15  ;;  %v8929_v1 = vld [vmem:[#allocation7 + $0x68] ss:$12 sps:$4 sm:$0xff]   ;;  %v8933_v22 = vld [vmem:[#allocation7 + $0x140] ss:$12 sps:$4 sm:$0xff]   ;;  %v8935_v32 = vld [vmem:[#allocation7 + $0x5d0] ss:$12 sps:$4 sm:$0xff]  }
 0x1b8   :  { %v8932_v10 = vld [vmem:[#allocation7 + $0x5bc] ss:$12 sps:$4 sm:$0xff]   ;;  %v8934_v60 = vld [vmem:[#allocation7 + $0x80] ss:$12 sps:$4 sm:$0xff]   ;;  %v8938_v15 = vld [vmem:[#allocation7 + $0x158] ss:$12 sps:$4 sm:$0xff]  }
 0x1b9   :  { %v8937_v30 = vld [vmem:[#allocation7 + $0x5d4] ss:$12 sps:$4 sm:$0xff]  }
 0x1ba   :  { %1979 = vmatpush1.bf16.msra.mxu0 %v8885_v13  ;;  %7845 = vmatpush3.bf16.msra.mxu1 %v8889_v7  ;;  %v8939_v13 = vld [vmem:[#allocation7 + $0x98] ss:$12 sps:$4 sm:$0xff]  }
 0x1bb   :  { %1980 = vmatprep.subr.bf16.mxu0 %v8892_v57  ;;  %7846 = vmatprep.subr.bf16.mxu1 %v8893_v16  ;;  %v8942_v7 = vld [vmem:[#allocation7 + $0x5ec] ss:$12 sps:$4 sm:$0xff]   ;;  %v8940_v57 = vld [vmem:[#allocation7 + $0x5e8] ss:$12 sps:$4 sm:$0xff]   ;;  %v8943_v16 = vld [vmem:[#allocation7 + $0x170] ss:$12 sps:$4 sm:$0xff]  }
 0x1be   :  { %1981 = vmatpush1.bf16.msra.mxu0 %v8890_v2  ;;  %7847 = vmatpush3.bf16.msra.mxu1 %v8894_v9  ;;  %v8944_v2 = vld [vmem:[#allocation7 + $0xb0] ss:$12 sps:$4 sm:$0xff]  }
 0x1bf   :  { %1982 = vmatprep.subr.bf16.mxu0 %v8897_v55  ;;  %7848 = vmatprep.subr.bf16.mxu1 %v8898_v0  ;;  %v8947_v9 = vld [vmem:[#allocation7 + $0x4] ss:$12 sps:$4 sm:$0xff]   ;;  %v8948_v55 = vld [vmem:[#allocation7 + $0x248] ss:$12 sps:$4 sm:$0xff]   ;;  %v8945_v0 = vld [vmem:[#allocation7] ss:$12 sps:$4 sm:$0xff]  }
 0x1c2   :  { %1983 = vmatpush1.bf16.msra.mxu0 %v8895_v63  ;;  %7849 = vmatpush3.bf16.msra.mxu1 %v8899_v19  ;;  %v8949_v63 = vld [vmem:[#allocation7 + $0x188] ss:$12 sps:$4 sm:$0xff]  }
 0x1c3   :  { %1984 = vmatprep.subr.bf16.mxu0 %v8902_v20  ;;  %7850 = vmatprep.subr.bf16.mxu1 %v8903_v26  ;;  %v8952_v19 = vld [vmem:[#allocation7 + $0x1c] ss:$12 sps:$4 sm:$0xff]   ;;  %v8953_v20 = vld [vmem:[#allocation7 + $0x260] ss:$12 sps:$4 sm:$0xff]   ;;  %v8950_v26 = vld [vmem:[#allocation7 + $0x18] ss:$12 sps:$4 sm:$0xff]  }
 0x1c6   :  { %1985 = vmatpush1.bf16.msra.mxu0 %v8900_v33  ;;  %7851 = vmatpush3.bf16.msra.mxu1 %v8904_v39  ;;  %v8954_v33 = vld [vmem:[#allocation7 + $0x1a0] ss:$12 sps:$4 sm:$0xff]  }
 0x1c7   :  { %1986 = vmatprep.subr.bf16.mxu0 %v8907_v43  ;;  %7864 = vmatprep.subr.bf16.mxu1 %v8908_v31  ;;  %v8957_v39 = vld [vmem:[#allocation7 + $0x34] ss:$12 sps:$4 sm:$0xff]   ;;  %v8958_v43 = vld [vmem:[#allocation7 + $0x278] ss:$12 sps:$4 sm:$0xff]   ;;  %v8955_v31 = vld [vmem:[#allocation7 + $0x30] ss:$12 sps:$4 sm:$0xff]  }
 0x1c9   :  { %2102 = vmatmul.mubr.bf16.vlgmr.msra.gmra.mrb[16].mxu1 %v9887_v59 }
 0x1ca   :  { %1987 = vmatpush1.bf16.msra.mxu0 %v8905_v11  ;;  %2109 = vmatprep.mubr.bf16.mxu1 %v9933_v23  ;;  %v8959_v11 = vld [vmem:[#allocation7 + $0x1b8] ss:$12 sps:$4 sm:$0xff]  }
 0x1cb   :  { %7865 = vmatpush3.bf16.msra.mxu1 %v8909_v56  ;;  %1988 = vmatprep.subr.bf16.mxu0 %v8912_v27  ;;  %v8962_v56 = vld [vmem:[#allocation7 + $0x4c] ss:$12 sps:$4 sm:$0xff]   ;;  %v8963_v27 = vld [vmem:[#allocation7 + $0x290] ss:$12 sps:$4 sm:$0xff]  }
 0x1cc   :  { %7866 = vmatprep.subr.bf16.mxu1 %v8913_v12  ;;  %v8968_v12 = vld [vmem:[#allocation7 + $0x2a8] ss:$12 sps:$4 sm:$0xff]  }
 0x1ce   :  { %1989 = vmatpush1.bf16.msra.mxu0 %v8910_v41  ;;  %v8967_v41 = vld [vmem:[#allocation7 + $0x64] ss:$12 sps:$4 sm:$0xff]  }
 0x1cf   :  { %7867 = vmatpush3.bf16.msra.mxu1 %v8914_v49  ;;  %1990 = vmatprep.subr.bf16.mxu0 %v8917_v50  ;;  %v8965_v49 = vld [vmem:[#allocation7 + $0x60] ss:$12 sps:$4 sm:$0xff]   ;;  %v8969_v50 = vld [vmem:[#allocation7 + $0x1e8] ss:$12 sps:$4 sm:$0xff]  }
 0x1d0   :  { %7868 = vmatprep.subr.bf16.mxu1 %v8918_v3  ;;  %v8973_v3 = vld [vmem:[#allocation7 + $0x2c0] ss:$12 sps:$4 sm:$0xff]  }
 0x1d1   :  { %2110 = vmatmul.mubr.bf16.gmra.mrb[20].mxu1 %v9944_v25 }
 0x1d2   :  { %1991 = vmatpush1.bf16.msra.mxu0 %v8915_v5  ;;  %2763 = vmatprep.mubr.bf16.mxu1 %v9941_v44  ;;  %v8970_v5 = vld [vmem:[#allocation7 + $0x78] ss:$12 sps:$4 sm:$0xff]  }
 0x1d3   :  { %7869 = vmatpush3.bf16.msra.mxu1 %v8919_v4  ;;  %1992 = vmatprep.subr.bf16.mxu0 %v8922_v42  ;;  %v8977_v4 = vld [vmem:[#allocation7 + $0x94] ss:$12 sps:$4 sm:$0xff]   ;;  %v8978_v42 = vld [vmem:[#allocation7 + $0x2d8] ss:$12 sps:$4 sm:$0xff]  }
 0x1d4   :  { %7870 = vmatprep.subr.bf16.mxu1 %v8923_v21  ;;  %v8979_v21 = vld [vmem:[#allocation7 + $0x218] ss:$12 sps:$4 sm:$0xff]  }
 0x1d6   :  { %1993 = vmatpush1.bf16.msra.mxu0 %v8920_v6  ;;  %v8975_v6 = vld [vmem:[#allocation7 + $0x90] ss:$12 sps:$4 sm:$0xff]  }
 0x1d7   :  { %7871 = vmatpush3.bf16.msra.mxu1 %v8924_v45  ;;  %1994 = vmatprep.subr.bf16.mxu0 %v8927_v40  ;;  %v8982_v45 = vld [vmem:[#allocation7 + $0xac] ss:$12 sps:$4 sm:$0xff]   ;;  %v8983_v40 = vld [vmem:[#allocation7 + $0x2f0] ss:$12 sps:$4 sm:$0xff]  }
 0x1d8   :  { %7872 = vmatprep.subr.bf16.mxu1 %v8928_v24  ;;  %v8984_v24 = vld [vmem:[#allocation7 + $0x230] ss:$12 sps:$4 sm:$0xff]  }
 0x1da   :  { %1995 = vmatpush1.bf16.msra.mxu0 %v8925_v14  ;;  %v8980_v14 = vld [vmem:[#allocation7 + $0xa8] ss:$12 sps:$4 sm:$0xff]  }
 0x1db   :  { %7873 = vmatpush3.bf16.msra.mxu1 %v8929_v1  ;;  %1996 = vmatprep.subr.bf16.mxu0 %v8932_v10  ;;  %v8987_v1 = vld [vmem:[#allocation7 + $0xc4] ss:$12 sps:$4 sm:$0xff]   ;;  %v8988_v10 = vld [vmem:[#allocation7 + $0x6c8] ss:$12 sps:$4 sm:$0xff]  }
 0x1dc   :  { %7874 = vmatprep.subr.bf16.mxu1 %v8933_v22  ;;  %v8989_v22 = vld [vmem:[#allocation7 + $0x608] ss:$12 sps:$4 sm:$0xff]  }
 0x1de   :  { %1997 = vmatpush1.bf16.msra.mxu0 %v8930_v36  ;;  %v8985_v36 = vld [vmem:[#allocation7 + $0xc0] ss:$12 sps:$4 sm:$0xff]  }
 0x1df   :  { %7875 = vmatpush3.bf16.msra.mxu1 %v8934_v60  ;;  %1998 = vmatprep.subr.bf16.mxu0 %v8937_v30  ;;  %v8992_v60 = vld [vmem:[#allocation7 + $0xdc] ss:$12 sps:$4 sm:$0xff]   ;;  %v8993_v30 = vld [vmem:[#allocation7 + $0x6e0] ss:$12 sps:$4 sm:$0xff]  }
 0x1e0   :  { %7876 = vmatprep.subr.bf16.mxu1 %v8938_v15  ;;  %v8994_v15 = vld [vmem:[#allocation7 + $0x620] ss:$12 sps:$4 sm:$0xff]  }
 0x1e2   :  { %1999 = vmatpush1.bf16.msra.mxu0 %v8935_v32  ;;  %v8990_v32 = vld [vmem:[#allocation7 + $0xd8] ss:$12 sps:$4 sm:$0xff]  }
 0x1e3   :  { %7877 = vmatpush3.bf16.msra.mxu1 %v8939_v13  ;;  %2000 = vmatprep.subr.bf16.mxu0 %v8942_v7  ;;  %v8997_v13 = vld [vmem:[#allocation7 + $0xf4] ss:$12 sps:$4 sm:$0xff]   ;;  %v8998_v7 = vld [vmem:[#allocation7 + $0x6f8] ss:$12 sps:$4 sm:$0xff]  }
 0x1e4   :  { %7878 = vmatprep.subr.bf16.mxu1 %v8943_v16  ;;  %v8999_v16 = vld [vmem:[#allocation7 + $0x638] ss:$12 sps:$4 sm:$0xff]  }
 0x1e6   :  { %2001 = vmatpush1.bf16.msra.mxu0 %v8940_v57  ;;  %v8995_v57 = vld [vmem:[#allocation7 + $0xf0] ss:$12 sps:$4 sm:$0xff]  }
 0x1e7   :  { %7879 = vmatpush3.bf16.msra.mxu1 %v8944_v2  ;;  %2629 = vmatprep.subr.bf16.mxu0 %v8947_v9  ;;  %v9002_v2 = vld [vmem:[#allocation7 + $0x10c] ss:$12 sps:$4 sm:$0xff]   ;;  %v9003_v9 = vld [vmem:[#allocation7 + $0x710] ss:$12 sps:$4 sm:$0xff]  }
 0x1e8   :  { %7892 = vmatprep.subr.bf16.mxu1 %v8948_v55  ;;  %v9000_v55 = vld [vmem:[#allocation7 + $0x108] ss:$12 sps:$4 sm:$0xff]  }
 0x1e9   :  { %2003 = vmatmul.mubr.bf16.vlgmr.msra.gmra.mrb[8].mxu0 %v9887_v59  ;;  %v8960_v59 = vld [vmem:[#allocation7 + $0x48] ss:$12 sps:$4 sm:$0xff]  }
 0x1ea   :  { %2764 = vmatmul.mubr.bf16.vlgmr.msra.gmra.mrb[24].mxu1 %v9826_v29  ;;  %2012 = vmatprep.mubr.bf16.mxu0 %v9933_v23  ;;  %v8964_v23 = vld [vmem:[#allocation7 + $0x1d0] ss:$12 sps:$4 sm:$0xff]  }
 0x1eb   :  { %2630 = vmatpush1.bf16.msra.mxu0 %v8945_v0  ;;  %2771 = vmatprep.mubr.bf16.mxu1 %v9947_v47  ;;  %v9004_v0 = vld [vmem:[#allocation7 + $0x650] ss:$12 sps:$4 sm:$0xff]  }
 0x1ec   :  { %7893 = vmatpush3.bf16.msra.mxu1 %v8949_v63  ;;  %2631 = vmatprep.subr.bf16.mxu0 %v8952_v19  ;;  %v9007_v63 = vld [vmem:[#allocation7 + $0x124] ss:$12 sps:$4 sm:$0xff]   ;;  %v9008_v19 = vld [vmem:[#allocation7 + $0x728] ss:$12 sps:$4 sm:$0xff]  }
 0x1ed   :  { %7894 = vmatprep.subr.bf16.mxu1 %v8953_v20  ;;  %v9005_v20 = vld [vmem:[#allocation7 + $0x120] ss:$12 sps:$4 sm:$0xff]  }
 0x1ef   :  { %2632 = vmatpush1.bf16.msra.mxu0 %v8950_v26  ;;  %v9009_v26 = vld [vmem:[#allocation7 + $0x668] ss:$12 sps:$4 sm:$0xff]  }
 0x1f0   :  { %7895 = vmatpush3.bf16.msra.mxu1 %v8954_v33  ;;  %2633 = vmatprep.subr.bf16.mxu0 %v8957_v39  ;;  %v9012_v33 = vld [vmem:[#allocation7 + $0x13c] ss:$12 sps:$4 sm:$0xff]   ;;  %v9013_v39 = vld [vmem:[#allocation7 + $0x740] ss:$12 sps:$4 sm:$0xff]  }
 0x1f1   :  { %2013 = vmatmul.mubr.bf16.gmra.mrb[16].mxu0 %v9944_v25  ;;  %7896 = vmatprep.subr.bf16.mxu1 %v8958_v43  ;;  %v8972_v25 = vld [vmem:[#allocation7 + $0x7c] ss:$12 sps:$4 sm:$0xff]   ;;  %v9010_v43 = vld [vmem:[#allocation7 + $0x138] ss:$12 sps:$4 sm:$0xff]  }
 0x1f2   :  { %2772 = vmatmul.mubr.bf16.gmra.mrb[28].mxu1 %v9951_v48  ;;  %2661 = vmatprep.mubr.bf16.mxu0 %v9941_v44  ;;  %v8974_v44 = vld [vmem:[#allocation7 + $0x200] ss:$12 sps:$4 sm:$0xff]  }
 0x1f3   :  { %2634 = vmatpush1.bf16.msra.mxu0 %v8955_v31  ;;  %2811 = vmatprep.mubr.bf16.mxu1 %v9955_v18  ;;  %v9014_v31 = vld [vmem:[#allocation7 + $0x680] ss:$12 sps:$4 sm:$0xff]  }
 0x1f4   :  { %7897 = vmatpush3.bf16.msra.mxu1 %v8959_v11  ;;  %2635 = vmatprep.subr.bf16.mxu0 %v8962_v56  ;;  %v9017_v11 = vld [vmem:[#allocation7 + $0x154] ss:$12 sps:$4 sm:$0xff]   ;;  %v9018_v56 = vld [vmem:[#allocation7 + $0x758] ss:$12 sps:$4 sm:$0xff]  }
 0x1f5   :  { %7898 = vmatprep.subr.bf16.mxu1 %v8963_v27  ;;  %v9015_v27 = vld [vmem:[#allocation7 + $0x150] ss:$12 sps:$4 sm:$0xff]  }
 0x1f7   :  { %2636 = vmatpush1.bf16.msra.mxu0 %v8960_v59  ;;  %v9019_v59 = vld [vmem:[#allocation7 + $0x698] ss:$12 sps:$4 sm:$0xff]  }
 0x1f8   :  { %7899 = vmatpush3.bf16.msra.mxu1 %v8964_v23  ;;  %2637 = vmatprep.subr.bf16.mxu0 %v8967_v41  ;;  %v9022_v23 = vld [vmem:[#allocation7 + $0x16c] ss:$12 sps:$4 sm:$0xff]   ;;  %v9023_v41 = vld [vmem:[#allocation7 + $0x770] ss:$12 sps:$4 sm:$0xff]  }
 0x1f9   :  { %7900 = vmatprep.subr.bf16.mxu1 %v8968_v12  ;;  %v9020_v12 = vld [vmem:[#allocation7 + $0x168] ss:$12 sps:$4 sm:$0xff]  }
 0x1fb   :  { %2638 = vmatpush1.bf16.msra.mxu0 %v8965_v49  ;;  %v9024_v49 = vld [vmem:[#allocation7 + $0x6b0] ss:$12 sps:$4 sm:$0xff]  }
 0x1fc   :  { %7901 = vmatpush3.bf16.msra.mxu1 %v8969_v50  ;;  %2639 = vmatprep.subr.bf16.mxu0 %v8972_v25  ;;  %v9027_v50 = vld [vmem:[#allocation7 + $0x184] ss:$12 sps:$4 sm:$0xff]   ;;  %v9028_v25 = vld [vmem:[#allocation7 + $0x848] ss:$12 sps:$4 sm:$0xff]  }
 0x1fd   :  { %7902 = vmatprep.subr.bf16.mxu1 %v8973_v3  ;;  %v9025_v3 = vld [vmem:[#allocation7 + $0x180] ss:$12 sps:$4 sm:$0xff]  }
 0x1ff   :  { %2640 = vmatpush1.bf16.msra.mxu0 %v8970_v5  ;;  %v9029_v5 = vld [vmem:[#allocation7 + $0x788] ss:$12 sps:$4 sm:$0xff]  }
 0x200   :  { %7903 = vmatpush3.bf16.msra.mxu1 %v8974_v44  ;;  %2641 = vmatprep.subr.bf16.mxu0 %v8977_v4  ;;  %v9032_v44 = vld [vmem:[#allocation7 + $0x19c] ss:$12 sps:$4 sm:$0xff]   ;;  %v9033_v4 = vld [vmem:[#allocation7 + $0x860] ss:$12 sps:$4 sm:$0xff]  }
 0x201   :  { %7904 = vmatprep.subr.bf16.mxu1 %v8978_v42  ;;  %v9030_v42 = vld [vmem:[#allocation7 + $0x198] ss:$12 sps:$4 sm:$0xff]  }
 0x203   :  { %2642 = vmatpush1.bf16.msra.mxu0 %v8975_v6  ;;  %v9034_v6 = vld [vmem:[#allocation7 + $0x7a0] ss:$12 sps:$4 sm:$0xff]  }
 0x204   :  { %7905 = vmatpush3.bf16.msra.mxu1 %v8979_v21  ;;  %2643 = vmatprep.subr.bf16.mxu0 %v8982_v45  ;;  %v9037_v21 = vld [vmem:[#allocation7 + $0x1b4] ss:$12 sps:$4 sm:$0xff]   ;;  %v9038_v45 = vld [vmem:[#allocation7 + $0x878] ss:$12 sps:$4 sm:$0xff]  }
 0x205   :  { %7906 = vmatprep.subr.bf16.mxu1 %v8983_v40  ;;  %v9035_v40 = vld [vmem:[#allocation7 + $0x1b0] ss:$12 sps:$4 sm:$0xff]  }
 0x207   :  { %2644 = vmatpush1.bf16.msra.mxu0 %v8980_v14  ;;  %v9039_v14 = vld [vmem:[#allocation7 + $0x7b8] ss:$12 sps:$4 sm:$0xff]  }
 0x208   :  { %7907 = vmatpush3.bf16.msra.mxu1 %v8984_v24  ;;  %2645 = vmatprep.subr.bf16.mxu0 %v8987_v1  ;;  %v9042_v24 = vld [vmem:[#allocation7 + $0x1cc] ss:$12 sps:$4 sm:$0xff]   ;;  %v9043_v1 = vld [vmem:[#allocation7 + $0x890] ss:$12 sps:$4 sm:$0xff]  }
 0x209   :  { %7920 = vmatprep.subr.bf16.mxu1 %v8988_v10  ;;  %v9047_v10 = vld [vmem:[#allocation7 + $0x1e4] ss:$12 sps:$4 sm:$0xff]  }
 0x20b   :  { %2812 = vmatmul.mubr.bf16.vlgmr.msra.gmra.mrb[32].mxu1 %v9829_v34  ;;  %2646 = vmatpush1.bf16.msra.mxu0 %v8985_v36  ;;  %v9048_v36 = vld [vmem:[#allocation7 + $0x8a8] ss:$12 sps:$4 sm:$0xff]  }
 0x20c   :  { %2819 = vmatprep.mubr.bf16.mxu1 %v9959_v38  ;;  %7921 = vmatpush3.bf16.msra.mxu1 %v8989_v22  ;;  %v9045_v22 = vld [vmem:[#allocation7 + $0x1e0] ss:$12 sps:$4 sm:$0xff]  }
 0x20d   :  { %2647 = vmatprep.subr.bf16.mxu0 %v8992_v60  ;;  %7922 = vmatprep.subr.bf16.mxu1 %v8993_v30  ;;  %v9049_v60 = vld [vmem:[#allocation7 + $0x7e8] ss:$12 sps:$4 sm:$0xff]  }
 0x20e   :  { %v9052_v30 = vld [vmem:[#allocation7 + $0x1fc] ss:$12 sps:$4 sm:$0xff]  }
 0x20f   :  { %2648 = vmatpush1.bf16.msra.mxu0 %v8990_v32  ;;  %v9050_v32 = vld [vmem:[#allocation7 + $0x1f8] ss:$12 sps:$4 sm:$0xff]  }
 0x210   :  { %7923 = vmatpush3.bf16.msra.mxu1 %v8994_v15  ;;  %2649 = vmatprep.subr.bf16.mxu0 %v8997_v13  ;;  %v9057_v15 = vld [vmem:[#allocation7 + $0x214] ss:$12 sps:$4 sm:$0xff]   ;;  %v9058_v13 = vld [vmem:[#allocation7 + $0x8d8] ss:$12 sps:$4 sm:$0xff]  }
 0x211   :  { %7924 = vmatprep.subr.bf16.mxu1 %v8998_v7  ;;  %v9055_v7 = vld [vmem:[#allocation7 + $0x210] ss:$12 sps:$4 sm:$0xff]  }
 0x213   :  { %2820 = vmatmul.mubr.bf16.gmra.mrb[36].mxu1 %v9963_v51  ;;  %2650 = vmatpush1.bf16.msra.mxu0 %v8995_v57  ;;  %v9059_v57 = vld [vmem:[#allocation7 + $0x818] ss:$12 sps:$4 sm:$0xff]  }
 0x214   :  { %7925 = vmatpush3.bf16.msra.mxu1 %v8999_v16  ;;  %3642 = vmatprep.mubr.bf16.mxu1 %v9981_v46  ;;  %v9062_v16 = vld [vmem:[#allocation7 + $0x22c] ss:$12 sps:$4 sm:$0xff]  }
 0x215   :  { %2651 = vmatprep.subr.bf16.mxu0 %v9002_v2  ;;  %7926 = vmatprep.subr.bf16.mxu1 %v9003_v9  ;;  %v9063_v2 = vld [vmem:[#allocation7 + $0x8f0] ss:$12 sps:$4 sm:$0xff]   ;;  %v9060_v9 = vld [vmem:[#allocation7 + $0x228] ss:$12 sps:$4 sm:$0xff]  }
 0x217   :  { %2652 = vmatpush1.bf16.msra.mxu0 %v9000_v55  ;;  %v9064_v55 = vld [vmem:[#allocation7 + $0x830] ss:$12 sps:$4 sm:$0xff]  }
 0x218   :  { %7927 = vmatpush3.bf16.msra.mxu1 %v9004_v0  ;;  %2653 = vmatprep.subr.bf16.mxu0 %v9007_v63  ;;  %v9067_v0 = vld [vmem:[#allocation7 + $0x244] ss:$12 sps:$4 sm:$0xff]   ;;  %v9065_v63 = vld [vmem:[#allocation7 + $0x240] ss:$12 sps:$4 sm:$0xff]  }
 0x219   :  { %7928 = vmatprep.subr.bf16.mxu1 %v9008_v19  ;;  %v9070_v19 = vld [vmem:[#allocation7 + $0x25c] ss:$12 sps:$4 sm:$0xff]  }
 0x21b   :  { %2654 = vmatpush1.bf16.msra.mxu0 %v9005_v20  ;;  %v9068_v20 = vld [vmem:[#allocation7 + $0x258] ss:$12 sps:$4 sm:$0xff]  }
 0x21c   :  { %7929 = vmatpush3.bf16.msra.mxu1 %v9009_v26  ;;  %2655 = vmatprep.subr.bf16.mxu0 %v9012_v33  ;;  %v9073_v26 = vld [vmem:[#allocation7 + $0x274] ss:$12 sps:$4 sm:$0xff]   ;;  %v9071_v33 = vld [vmem:[#allocation7 + $0x270] ss:$12 sps:$4 sm:$0xff]  }
 0x21d   :  { %7930 = vmatprep.subr.bf16.mxu1 %v9013_v39  ;;  %v9076_v39 = vld [vmem:[#allocation7 + $0x28c] ss:$12 sps:$4 sm:$0xff]  }
 0x21f   :  { %2656 = vmatpush1.bf16.msra.mxu0 %v9010_v43  ;;  %v9074_v43 = vld [vmem:[#allocation7 + $0x288] ss:$12 sps:$4 sm:$0xff]  }
 0x220   :  { %7931 = vmatpush3.bf16.msra.mxu1 %v9014_v31  ;;  %2657 = vmatprep.subr.bf16.mxu0 %v9017_v11  ;;  %v9079_v31 = vld [vmem:[#allocation7 + $0x2a4] ss:$12 sps:$4 sm:$0xff]   ;;  %v9077_v11 = vld [vmem:[#allocation7 + $0x2a0] ss:$12 sps:$4 sm:$0xff]  }
 0x221   :  { %7932 = vmatprep.subr.bf16.mxu1 %v9018_v56  ;;  %v9082_v56 = vld [vmem:[#allocation7 + $0x2bc] ss:$12 sps:$4 sm:$0xff]  }
 0x223   :  { %2658 = vmatpush1.bf16.msra.mxu0 %v9015_v27  ;;  %v9080_v27 = vld [vmem:[#allocation7 + $0x2b8] ss:$12 sps:$4 sm:$0xff]  }
 0x224   :  { %7933 = vmatpush3.bf16.msra.mxu1 %v9019_v59  ;;  %2659 = vmatprep.subr.bf16.mxu0 %v9022_v23  ;;  %v9085_v59 = vld [vmem:[#allocation7 + $0x2d4] ss:$12 sps:$4 sm:$0xff]   ;;  %v9083_v23 = vld [vmem:[#allocation7 + $0x2d0] ss:$12 sps:$4 sm:$0xff]  }
 0x225   :  { %7934 = vmatprep.subr.bf16.mxu1 %v9023_v41  ;;  %v9088_v41 = vld [vmem:[#allocation7 + $0x2ec] ss:$12 sps:$4 sm:$0xff]  }
 0x227   :  { %2660 = vmatpush1.bf16.msra.mxu0 %v9020_v12  ;;  %v9086_v12 = vld [vmem:[#allocation7 + $0x2e8] ss:$12 sps:$4 sm:$0xff]  }
 0x228   :  { %7935 = vmatpush3.bf16.msra.mxu1 %v9024_v49  ;;  %2680 = vmatprep.subr.bf16.mxu0 %v9027_v50  ;;  %v9091_v49 = vld [vmem:[#allocation7 + $0x604] ss:$12 sps:$4 sm:$0xff]   ;;  %v9089_v50 = vld [vmem:[#allocation7 + $0x600] ss:$12 sps:$4 sm:$0xff]  }
 0x229   :  { %7948 = vmatprep.subr.bf16.mxu1 %v9028_v25  ;;  %v9094_v25 = vld [vmem:[#allocation7 + $0x61c] ss:$12 sps:$4 sm:$0xff]  }
 0x22a   :  { %2662 = vmatmul.mubr.bf16.vlgmr.msra.gmra.mrb[8].mxu0 %v9826_v29  ;;  %v9040_v29 = vld [vmem:[#allocation7 + $0x1c8] ss:$12 sps:$4 sm:$0xff]  }
 0x22b   :  { %3643 = vmatmul.mubr.bf16.vlgmr.msra.gmra.mrb[40].mxu1 %v9885_v58  ;;  %2671 = vmatprep.mubr.bf16.mxu0 %v9947_v47  ;;  %v9044_v47 = vld [vmem:[#allocation7 + $0x7d0] ss:$12 sps:$4 sm:$0xff]  }
 0x22c   :  { %2681 = vmatpush1.bf16.msra.mxu0 %v9025_v3  ;;  %3650 = vmatprep.mubr.bf16.mxu1 %v9983_v61  ;;  %v9092_v3 = vld [vmem:[#allocation7 + $0x618] ss:$12 sps:$4 sm:$0xff]  }
 0x22d   :  { %7949 = vmatpush3.bf16.msra.mxu1 %v9029_v5  ;;  %2682 = vmatprep.subr.bf16.mxu0 %v9032_v44  ;;  %v9097_v5 = vld [vmem:[#allocation7 + $0x634] ss:$12 sps:$4 sm:$0xff]   ;;  %v9095_v44 = vld [vmem:[#allocation7 + $0x630] ss:$12 sps:$4 sm:$0xff]  }
 0x22e   :  { %7950 = vmatprep.subr.bf16.mxu1 %v9033_v4  ;;  %v9100_v4 = vld [vmem:[#allocation7 + $0x64c] ss:$12 sps:$4 sm:$0xff]  }
 0x230   :  { %2683 = vmatpush1.bf16.msra.mxu0 %v9030_v42  ;;  %v9098_v42 = vld [vmem:[#allocation7 + $0x648] ss:$12 sps:$4 sm:$0xff]  }
 0x231   :  { %7951 = vmatpush3.bf16.msra.mxu1 %v9034_v6  ;;  %2684 = vmatprep.subr.bf16.mxu0 %v9037_v21  ;;  %v9103_v6 = vld [vmem:[#allocation7 + $0x664] ss:$12 sps:$4 sm:$0xff]  }
 0x232   :  { %2672 = vmatmul.mubr.bf16.gmra.mrb[20].mxu0 %v9951_v48  ;;  %7952 = vmatprep.subr.bf16.mxu1 %v9038_v45  ;;  %v9053_v48 = vld [vmem:[#allocation7 + $0x8c0] ss:$12 sps:$4 sm:$0xff]   ;;  %v9104_v45 = vld [vmem:[#allocation7 + $0x678] ss:$12 sps:$4 sm:$0xff]  }
 0x233   :  { %3651 = vmatmul.mubr.bf16.gmra.mrb[44].mxu1 %v10005_v8  ;;  %2712 = vmatprep.mubr.bf16.mxu0 %v9955_v18  ;;  %v9054_v18 = vld [vmem:[#allocation7 + $0x800] ss:$12 sps:$4 sm:$0xff]  }
 0x234   :  { %2685 = vmatpush1.bf16.msra.mxu0 %v9035_v40  ;;  %3690 = vmatprep.mubr.bf16.mxu1 %v10007_v17 }
 0x235   :  { %7953 = vmatpush3.bf16.msra.mxu1 %v9039_v14  ;;  %2686 = vmatprep.subr.bf16.mxu0 %v9042_v24  ;;  %v9109_v14 = vld [vmem:[#allocation7 + $0x694] ss:$12 sps:$4 sm:$0xff]  }
 0x236   :  { %7954 = vmatprep.subr.bf16.mxu1 %v9043_v1 }
 0x238   :  { %2687 = vmatpush1.bf16.msra.mxu0 %v9040_v29 }
 0x239   :  { %7955 = vmatpush3.bf16.msra.mxu1 %v9044_v47  ;;  %2688 = vmatprep.subr.bf16.mxu0 %v9047_v10  ;;  %v9107_v47 = vld [vmem:[#allocation7 + $0x690] ss:$12 sps:$4 sm:$0xff]  }
 0x23a   :  { %7956 = vmatprep.subr.bf16.mxu1 %v9048_v36 }
 0x23c   :  { %2689 = vmatpush1.bf16.msra.mxu0 %v9045_v22  ;;  %v9110_v22 = vld [vmem:[#allocation7 + $0x6a8] ss:$12 sps:$4 sm:$0xff]  }
 0x23d   :  { %7957 = vmatpush3.bf16.msra.mxu1 %v9049_v60  ;;  %2690 = vmatprep.subr.bf16.mxu0 %v9052_v30 }
 0x23e   :  { %7958 = vmatprep.subr.bf16.mxu1 %v9053_v48  ;;  %v9115_v48 = vld [vmem:[#allocation7 + $0x6c4] ss:$12 sps:$4 sm:$0xff]  }
 0x240   :  { %2691 = vmatpush1.bf16.msra.mxu0 %v9050_v32 }
 0x241   :  { %7959 = vmatpush3.bf16.msra.mxu1 %v9054_v18  ;;  %2692 = vmatprep.subr.bf16.mxu0 %v9057_v15 }
 0x242   :  { %7960 = vmatprep.subr.bf16.mxu1 %v9058_v13 }
 0x244   :  { %2693 = vmatpush1.bf16.msra.mxu0 %v9055_v7 }
 0x245   :  { %7961 = vmatpush3.bf16.msra.mxu1 %v9059_v57  ;;  %2694 = vmatprep.subr.bf16.mxu0 %v9062_v16  ;;  %v9113_v57 = vld [vmem:[#allocation7 + $0x6c0] ss:$12 sps:$4 sm:$0xff]   ;;  %v9118_v16 = vld [vmem:[#allocation7 + $0x6dc] ss:$12 sps:$4 sm:$0xff]  }
 0x246   :  { %7962 = vmatprep.subr.bf16.mxu1 %v9063_v2  ;;  %v9116_v2 = vld [vmem:[#allocation7 + $0x6d8] ss:$12 sps:$4 sm:$0xff]  }
 0x248   :  { %2695 = vmatpush1.bf16.msra.mxu0 %v9060_v9  ;;  %v9121_v9 = vld [vmem:[#allocation7 + $0x6f4] ss:$12 sps:$4 sm:$0xff]  }
 0x249   :  { %7963 = vmatpush3.bf16.msra.mxu1 %v9064_v55  ;;  %2696 = vmatprep.subr.bf16.mxu0 %v9067_v0  ;;  %v9119_v55 = vld [vmem:[#allocation7 + $0x6f0] ss:$12 sps:$4 sm:$0xff]   ;;  %v9124_v0 = vld [vmem:[#allocation7 + $0x70c] ss:$12 sps:$4 sm:$0xff]  }
 0x24c   :  { %3691 = vmatmul.mubr.bf16.vlgmr.msra.gmra.mrb[48].mxu1 %v9889_v35  ;;  %2697 = vmatpush1.bf16.msra.mxu0 %v9065_v63  ;;  %v9122_v63 = vld [vmem:[#allocation7 + $0x708] ss:$12 sps:$4 sm:$0xff]  }
 0x24d   :  { %3698 = vmatprep.mubr.bf16.mxu1 %v10013_v62  ;;  %2698 = vmatprep.subr.bf16.mxu0 %v9070_v19  ;;  %v9127_v19 = vld [vmem:[#allocation7 + $0x724] ss:$12 sps:$4 sm:$0xff]  }
 0x250   :  { %2699 = vmatpush1.bf16.msra.mxu0 %v9068_v20  ;;  %v9125_v20 = vld [vmem:[#allocation7 + $0x720] ss:$12 sps:$4 sm:$0xff]  }
 0x251   :  { %2700 = vmatprep.subr.bf16.mxu0 %v9073_v26  ;;  %v9130_v26 = vld [vmem:[#allocation7 + $0x73c] ss:$12 sps:$4 sm:$0xff]  }
 0x254   :  { %3699 = vmatmul.mubr.bf16.gmra.mrb[52].mxu1 %v10023_v37  ;;  %2701 = vmatpush1.bf16.msra.mxu0 %v9071_v33 }
 0x255   :  { %2702 = vmatprep.subr.bf16.mxu0 %v9076_v39  ;;  %v9128_v39 = vld [vmem:[#allocation7 + $0x738] ss:$12 sps:$4 sm:$0xff]  }
 0x258   :  { %2703 = vmatpush1.bf16.msra.mxu0 %v9074_v43 }
 0x259   :  { %2704 = vmatprep.subr.bf16.mxu0 %v9079_v31  ;;  %v9133_v31 = vld [vmem:[#allocation7 + $0x754] ss:$12 sps:$4 sm:$0xff]  }
 0x25c   :  { %2705 = vmatpush1.bf16.msra.mxu0 %v9077_v11 }
 0x25d   :  { %2706 = vmatprep.subr.bf16.mxu0 %v9082_v56 }
 0x260   :  { %2707 = vmatpush1.bf16.msra.mxu0 %v9080_v27 }
 0x261   :  { %2708 = vmatprep.subr.bf16.mxu0 %v9085_v59 }
 0x264   :  { %2709 = vmatpush1.bf16.msra.mxu0 %v9083_v23 }
 0x265   :  { %2710 = vmatprep.subr.bf16.mxu0 %v9088_v41  ;;  %v9131_v41 = vld [vmem:[#allocation7 + $0x750] ss:$12 sps:$4 sm:$0xff]  }
 0x268   :  { %2711 = vmatpush1.bf16.msra.mxu0 %v9086_v12  ;;  %v9136_v12 = vld [vmem:[#allocation7 + $0x76c] ss:$12 sps:$4 sm:$0xff]  }
 0x269   :  { %3508 = vmatprep.subr.bf16.mxu0 %v9091_v49 }
 0x26b   :  { %2713 = vmatmul.mubr.bf16.vlgmr.msra.gmra.mrb[8].mxu0 %v9829_v34  ;;  %v9101_v34 = vld [vmem:[#allocation7 + $0x660] ss:$12 sps:$4 sm:$0xff]  }
 0x26c   :  { %2722 = vmatprep.mubr.bf16.mxu0 %v9959_v38  ;;  %3509 = vmatpush1.bf16.msra.mxu0 %v9089_v50  ;;  %v9106_v38 = vld [vmem:[#allocation7 + $0x67c] ss:$12 sps:$4 sm:$0xff]  }
 0x26d   :  { %3510 = vmatprep.subr.bf16.mxu0 %v9094_v25  ;;  %v9134_v25 = vld [vmem:[#allocation7 + $0x768] ss:$12 sps:$4 sm:$0xff]  }
 0x270   :  { %3511 = vmatpush1.bf16.msra.mxu0 %v9092_v3 }
 0x271   :  { %3512 = vmatprep.subr.bf16.mxu0 %v9097_v5  ;;  %v9139_v5 = vld [vmem:[#allocation7 + $0x784] ss:$12 sps:$4 sm:$0xff]  }
 0x273   :  { %2723 = vmatmul.mubr.bf16.gmra.mrb[24].mxu0 %v9963_v51 }
 0x274   :  { %3513 = vmatpush1.bf16.msra.mxu0 %v9095_v44  ;;  %3540 = vmatprep.mubr.bf16.mxu0 %v9981_v46  ;;  %v9112_v46 = vld [vmem:[#allocation7 + $0x6ac] ss:$12 sps:$4 sm:$0xff]  }
 0x275   :  { %3514 = vmatprep.subr.bf16.mxu0 %v9100_v4 }
 0x278   :  { %3515 = vmatpush1.bf16.msra.mxu0 %v9098_v42 }
 0x279   :  { %3516 = vmatprep.subr.bf16.mxu0 %v9103_v6 }
 0x27c   :  { %3517 = vmatpush1.bf16.msra.mxu0 %v9101_v34  ;;  %v7824_v21 = vpop.f32.mrb[8].mxu1  ;;  %v9137_v34 = vld [vmem:[#allocation7 + $0x780] ss:$12 sps:$4 sm:$0xff]  }
 0x27d   :  { %3518 = vmatprep.subr.bf16.mxu0 %v9106_v38  ;;  %v7825_v40 = vpop.f32.mrb[9].mxu1  ;;  %v9142_v38 = vld [vmem:[#allocation7 + $0x79c] ss:$12 sps:$4 sm:$0xff]  }
 0x27e   :  { %v7826_v24 = vadd.f32 %v7825_v40, %v7824_v21  ;;  %v7827_v1 = vpop.f32.mrb[10].mxu1  ;;  %v9140_v21 = vld [vmem:[#allocation7 + $0x798] ss:$12 sps:$4 sm:$0xff]   ;;  %v9143_v40 = vld [vmem:[#allocation7 + $0x7b0] ss:$12 sps:$4 sm:$0xff]  }
 0x27f   :  { %v7828_v29 = vpop.f32.mrb[11].mxu1 }
 0x280   :  { %3519 = vmatpush1.bf16.msra.mxu0 %v9104_v45  ;;  %v7829_v51 = vadd.f32 %v7828_v29, %v7827_v1  ;;  %v9145_v45 = vld [vmem:[#allocation7 + $0x7b4] ss:$12 sps:$4 sm:$0xff]   ;;  %v9151_v1 = vld [vmem:[#allocation7 + $0x7e4] ss:$12 sps:$4 sm:$0xff]  }
 0x281   :  { %3520 = vmatprep.subr.bf16.mxu0 %v9109_v14  ;;  %v9148_v14 = vld [vmem:[#allocation7 + $0x7cc] ss:$12 sps:$4 sm:$0xff]  }
 0x282   :  { %v9152_v29 = vld [vmem:[#allocation7 + $0x7f8] ss:$12 sps:$4 sm:$0xff]  }
 0x284   :  { %3521 = vmatpush1.bf16.msra.mxu0 %v9107_v47  ;;  %v10056_v10 = vpop.f32.mrb[12].mxu0  ;;  %v7830_v36 = vpop.f32.mrb[12].mxu1  ;;  %v9157_v47 = vld [vmem:[#allocation7 + $0x814] ss:$12 sps:$4 sm:$0xff]  }
 0x285   :  { %3522 = vmatprep.subr.bf16.mxu0 %v9112_v46  ;;  %v10058_v60 = vpop.f32.mrb[13].mxu0  ;;  %v7831_v30 = vpop.f32.mrb[13].mxu1 }
 0x286   :  { %v7832_v32 = vadd.f32 %v7831_v30, %v7830_v36  ;;  %v1967_v18 = vpop.f32.mrb[14].mxu0  ;;  %v7833_v15 = vpop.f32.mrb[14].mxu1  ;;  %v9155_v30 = vld [vmem:[#allocation7 + $0x810] ss:$12 sps:$4 sm:$0xff]  }
 0x287   :  { %v1968_v13 = vpop.f32.mrb[15].mxu0  ;;  %v7834_v7 = vpop.f32.mrb[15].mxu1 }
 0x288   :  { %3523 = vmatpush1.bf16.msra.mxu0 %v9110_v22  ;;  %v9158_v13 = vld [vmem:[#allocation7 + $0x828] ss:$12 sps:$4 sm:$0xff]  }
 0x289   :  { %3524 = vmatprep.subr.bf16.mxu0 %v9115_v48 }
 0x28c   :  { %3525 = vmatpush1.bf16.msra.mxu0 %v9113_v57 }
 0x28d   :  { %3526 = vmatprep.subr.bf16.mxu0 %v9118_v16 }
 0x290   :  { %3527 = vmatpush1.bf16.msra.mxu0 %v9116_v2  ;;  %v9163_v2 = vld [vmem:[#allocation7 + $0x844] ss:$12 sps:$4 sm:$0xff]  }
 0x291   :  { %3528 = vmatprep.subr.bf16.mxu0 %v9121_v9 }
 0x294   :  { %3529 = vmatpush1.bf16.msra.mxu0 %v9119_v55 }
 0x295   :  { %3530 = vmatprep.subr.bf16.mxu0 %v9124_v0 }
 0x298   :  { %3531 = vmatpush1.bf16.msra.mxu0 %v9122_v63 }
 0x299   :  { %3532 = vmatprep.subr.bf16.mxu0 %v9127_v19 }
 0x29c   :  { %3533 = vmatpush1.bf16.msra.mxu0 %v9125_v20  ;;  %v7852_v33 = vpop.f32.mrb[16].mxu1 }
 0x29d   :  { %v7853_v43 = vpop.f32.mrb[17].mxu1  ;;  %3534 = vmatprep.subr.bf16.mxu0 %v9130_v26 }
 0x29e   :  { %v7854_v11 = vadd.f32 %v7853_v43, %v7852_v33  ;;  %v7855_v56 = vpop.f32.mrb[18].mxu1  ;;  %v9161_v33 = vld [vmem:[#allocation7 + $0x840] ss:$12 sps:$4 sm:$0xff]   ;;  %v9166_v43 = vld [vmem:[#allocation7 + $0x85c] ss:$12 sps:$4 sm:$0xff]  }
 0x29f   :  { %v7856_v27 = vpop.f32.mrb[19].mxu1 }
 0x2a0   :  { %v2104_v59 = vadd.f32 %v7854_v11, %v7826_v24  ;;  %3535 = vmatpush1.bf16.msra.mxu0 %v9128_v39  ;;  %v7857_v23 = vadd.f32 %v7856_v27, %v7855_v56  ;;  %v9146_v24 = vld [vmem:[#allocation7 + $0x7c8] ss:$12 sps:$4 sm:$0xff]   ;;  %v9167_v11 = vld [vmem:[#allocation7 + $0x870] ss:$12 sps:$4 sm:$0xff]  }
 0x2a1   :  { %3536 = vmatprep.subr.bf16.mxu0 %v9133_v31  ;;  %v9169_v31 = vld [vmem:[#allocation7 + $0x874] ss:$12 sps:$4 sm:$0xff]   ;;  %v9175_v27 = vld [vmem:[#allocation7 + $0x8a4] ss:$12 sps:$4 sm:$0xff]  }
 0x2a2   :  { %v2107_v49 = vadd.f32 %v7857_v23, %v7829_v51  ;;  %v9170_v56 = vld [vmem:[#allocation7 + $0x888] ss:$12 sps:$4 sm:$0xff]  }
 0x2a3   :  { %v9178_v23 = vld [vmem:[#allocation7 + $0x8bc] ss:$12 sps:$4 sm:$0xff]  }
 0x2a4   :  { %3537 = vmatpush1.bf16.msra.mxu0 %v9131_v41  ;;  %v7858_v50 = vpop.f32.mrb[20].mxu1  ;;  %v9176_v41 = vld [vmem:[#allocation7 + $0x8b8] ss:$12 sps:$4 sm:$0xff]  }
 0x2a5   :  { %v7859_v3 = vpop.f32.mrb[21].mxu1  ;;  %3538 = vmatprep.subr.bf16.mxu0 %v9136_v12  ;;  %v9181_v12 = vld [vmem:[#allocation7 + $0x8d4] ss:$12 sps:$4 sm:$0xff]  }
 0x2a6   :  { %v7860_v44 = vadd.f32 %v7859_v3, %v7858_v50  ;;  %v7861_v4 = vpop.f32.mrb[22].mxu1 }
 0x2a7   :  { %v7862_v42 = vpop.f32.mrb[23].mxu1  ;;  %v9184_v4 = vld [vmem:[#allocation7 + $0x8ec] ss:$12 sps:$4 sm:$0xff]  }
 0x2a8   :  { %v2112_v6 = vadd.f32 %v7860_v44, %v7832_v32  ;;  %3539 = vmatpush1.bf16.msra.mxu0 %v9134_v25  ;;  %v9160_v32 = vld [vmem:[#allocation7 + $0x82c] ss:$12 sps:$4 sm:$0xff]  }
 0x2a9   :  { %3559 = vmatprep.subr.bf16.mxu0 %v9139_v5  ;;  %v9179_v5 = vld [vmem:[#allocation7 + $0x8d0] ss:$12 sps:$4 sm:$0xff]  }
 0x2ab   :  { %3541 = vmatmul.mubr.bf16.vlgmr.msra.gmra.mrb[8].mxu0 %v9885_v58  ;;  %v9149_v58 = vld [vmem:[#allocation7 + $0x7e0] ss:$12 sps:$4 sm:$0xff]  }
 0x2ac   :  { %3550 = vmatprep.mubr.bf16.mxu0 %v9983_v61  ;;  %3560 = vmatpush1.bf16.msra.mxu0 %v9137_v34  ;;  %v9154_v61 = vld [vmem:[#allocation7 + $0x7fc] ss:$12 sps:$4 sm:$0xff]  }
 0x2ad   :  { %3561 = vmatprep.subr.bf16.mxu0 %v9142_v38  ;;  %v9182_v38 = vld [vmem:[#allocation7 + $0x8e8] ss:$12 sps:$4 sm:$0xff]  }
 0x2b0   :  { %3562 = vmatpush1.bf16.msra.mxu0 %v9140_v21 }
 0x2b1   :  { %3563 = vmatprep.subr.bf16.mxu0 %v9145_v45 }
 0x2b3   :  { %3551 = vmatmul.mubr.bf16.gmra.mrb[28].mxu0 %v10005_v8 }
 0x2b4   :  { %3564 = vmatpush1.bf16.msra.mxu0 %v9143_v40  ;;  %3591 = vmatprep.mubr.bf16.mxu0 %v10007_v17 }
 0x2b5   :  { %3565 = vmatprep.subr.bf16.mxu0 %v9148_v14 }
 0x2b8   :  { %3566 = vmatpush1.bf16.msra.mxu0 %v9146_v24 }
 0x2b9   :  { %3567 = vmatprep.subr.bf16.mxu0 %v9151_v1 }
 0x2bc   :  { %3568 = vmatpush1.bf16.msra.mxu0 %v9149_v58 }
 0x2bd   :  { %v7880_v51 = vpop.f32.mrb[24].mxu1  ;;  %3569 = vmatprep.subr.bf16.mxu0 %v9154_v61 }
 0x2be   :  { %v7881_v46 = vpop.f32.mrb[25].mxu1 }
 0x2bf   :  { %v7882_v36 = vadd.f32 %v7881_v46, %v7880_v51  ;;  %v7883_v22 = vpop.f32.mrb[26].mxu1 }
 0x2c0   :  { %3570 = vmatpush1.bf16.msra.mxu0 %v9152_v29  ;;  %v7884_v8 = vpop.f32.mrb[27].mxu1 }
 0x2c1   :  { %v2766_v48 = vadd.f32 %v7882_v36, %v2104_v59  ;;  %v7885_v17 = vadd.f32 %v7884_v8, %v7883_v22  ;;  %3571 = vmatprep.subr.bf16.mxu0 %v9157_v47  ;;  %v9173_v59 = vld [vmem:[#allocation7 + $0x8a0] ss:$12 sps:$4 sm:$0xff]  }
 0x2c3   :  { %v2769_v18 = vadd.f32 %v7885_v17, %v2107_v49 }
 0x2c4   :  { %3572 = vmatpush1.bf16.msra.mxu0 %v9155_v30  ;;  %v2014_v15 = vpop.f32.mrb[16].mxu0 }
 0x2c5   :  { %v10065_v7 = vadd.f32 %v2014_v15, %v10056_v10  ;;  %v7886_v57 = vpop.f32.mrb[28].mxu1  ;;  %v2016_v16 = vpop.f32.mrb[17].mxu0  ;;  %3573 = vmatprep.subr.bf16.mxu0 %v9160_v32  ;;  %v9164_v10 = vld [vmem:[#allocation7 + $0x858] ss:$12 sps:$4 sm:$0xff]  }
 0x2c6   :  { %v10068_v9 = vadd.f32 %v2016_v16, %v10058_v60  ;;  %v7887_v55 = vpop.f32.mrb[29].mxu1  ;;  %v2018_v0 = vpop.f32.mrb[18].mxu0  ;;  %v9172_v60 = vld [vmem:[#allocation7 + $0x88c] ss:$12 sps:$4 sm:$0xff]   ;;  %v9185_v15 = vld [vmem:[#allocation10 + $0x100] sm:$0xff]  }
 0x2c7   :  { %v7888_v63 = vadd.f32 %v7887_v55, %v7886_v57  ;;  %v7889_v19 = vpop.f32.mrb[30].mxu1  ;;  %v2019_v20 = vpop.f32.mrb[19].mxu0  ;;  %v9187_v57 = vld [vmem:[#allocation10 + $0xc0] sm:$0xff]   ;;  %v9190_v55 = vld [vmem:[#allocation10 + $0x288] sm:$0xff]   ;;  %7976 = vmatprep.subr.bf16.mxu1 %v9185_v15  ;;  %v9193_v0 = vld [vmem:[#allocation10 + $0x110] sm:$0xff]  }
 0x2c8   :  { %3574 = vmatpush1.bf16.msra.mxu0 %v9158_v13  ;;  %v7890_v26 = vpop.f32.mrb[31].mxu1  ;;  %v9186_v13 = vld [vmem:[#allocation10 + $0x280] sm:$0xff]   ;;  %7977 = vmatpush3.bf16.msra.mxu1 %v9187_v57  ;;  %v9195_v19 = vld [vmem:[#allocation10 + $0xd0] sm:$0xff]  }
 0x2c9   :  { %v2774_v39 = vadd.f32 %v7888_v63, %v2112_v6  ;;  %3575 = vmatprep.subr.bf16.mxu0 %v9163_v2  ;;  %v9188_v16 = vld [vmem:[#allocation10 + $0x240] sm:$0xff]   ;;  %v9189_v2 = vld [vmem:[#allocation10 + $0x108] sm:$0xff]   ;;  %v9194_v63 = vld [vmem:[#allocation10 + $0x290] sm:$0xff]  }
 0x2ca   :  { %7978 = vmatprep.subr.bf16.mxu1 %v9189_v2  ;;  %v9196_v20 = vld [vmem:[#allocation10 + $0x250] sm:$0xff]   ;;  %v9197_v26 = vld [vmem:[#allocation10 + $0x118] sm:$0xff]   ;;  %v9217_v15 = vld [vmem:[#allocation10 + $0x340] sm:$0xff]  }
 0x2cc   :  { %3576 = vmatpush1.bf16.msra.mxu0 %v9161_v33  ;;  %v9198_v33 = vld [vmem:[#allocation10 + $0x298] sm:$0xff]  }
 0x2cd   :  { %3577 = vmatprep.subr.bf16.mxu0 %v9166_v43  ;;  %v9200_v43 = vld [vmem:[#allocation10 + $0x258] sm:$0xff]  }
 0x2d0   :  { %3578 = vmatpush1.bf16.msra.mxu0 %v9164_v10  ;;  %v9201_v10 = vld [vmem:[#allocation10 + $0x120] sm:$0xff]  }
 0x2d1   :  { %3579 = vmatprep.subr.bf16.mxu0 %v9169_v31  ;;  %v9202_v31 = vld [vmem:[#allocation10 + $0x2a0] sm:$0xff]  }
 0x2d4   :  { %3580 = vmatpush1.bf16.msra.mxu0 %v9167_v11  ;;  %v9203_v11 = vld [vmem:[#allocation10 + $0xe0] sm:$0xff]  }
 0x2d5   :  { %3581 = vmatprep.subr.bf16.mxu0 %v9172_v60  ;;  %v9204_v60 = vld [vmem:[#allocation10 + $0x260] sm:$0xff]  }
 0x2d8   :  { %3582 = vmatpush1.bf16.msra.mxu0 %v9170_v56  ;;  %v9205_v56 = vld [vmem:[#allocation10 + $0x128] sm:$0xff]  }
 0x2d9   :  { %3583 = vmatprep.subr.bf16.mxu0 %v9175_v27  ;;  %v9206_v27 = vld [vmem:[#allocation10 + $0x2a8] sm:$0xff]  }
 0x2dc   :  { %3584 = vmatpush1.bf16.msra.mxu0 %v9173_v59  ;;  %v9207_v59 = vld [vmem:[#allocation10 + $0xe8] sm:$0xff]  }
 0x2dd   :  { %3585 = vmatprep.subr.bf16.mxu0 %v9178_v23  ;;  %v9208_v23 = vld [vmem:[#allocation10 + $0x268] sm:$0xff]  }
 0x2de   :  { %v7908_v49 = vpop.f32.mrb[32].mxu1 }
 0x2df   :  { %v7909_v50 = vpop.f32.mrb[33].mxu1 }
 0x2e0   :  { %v7910_v25 = vadd.f32 %v7909_v50, %v7908_v49  ;;  %v7911_v3 = vpop.f32.mrb[34].mxu1  ;;  %3586 = vmatpush1.bf16.msra.mxu0 %v9176_v41 }
 0x2e1   :  { %v7912_v44 = vpop.f32.mrb[35].mxu1  ;;  %3587 = vmatprep.subr.bf16.mxu0 %v9181_v12 }
 0x2e2   :  { %v10070_v42 = vadd.f32 %v7910_v25, %v2766_v48  ;;  %v7913_v6 = vadd.f32 %v7912_v44, %v7911_v3  ;;  %v3715_v44 = vld [vmem:[#allocation8] sm:$0x7] }
 0x2e4   :  { %v10072_v34 = vadd.f32 %v7913_v6, %v2769_v18  ;;  %3588 = vmatpush1.bf16.msra.mxu0 %v9179_v5 }
 0x2e5   :  { %3589 = vmatprep.subr.bf16.mxu0 %v9184_v4 }
 0x2e6   :  { %v7914_v21 = vpop.f32.mrb[36].mxu1 }
 0x2e7   :  { %v7915_v45 = vpop.f32.mrb[37].mxu1 }
 0x2e8   :  { %v7916_v40 = vadd.f32 %v7915_v45, %v7914_v21  ;;  %v7917_v14 = vpop.f32.mrb[38].mxu1  ;;  %3590 = vmatpush1.bf16.msra.mxu0 %v9182_v38  ;;  %v10098_v38 = vrot.slane %v3715_v44, %v1060_v53  ;;  %v9210_v53 = vld [vmem:[#allocation10 + $0x2b0] sm:$0xff]  }
 0x2e9   :  { %v7918_v24 = vpop.f32.mrb[39].mxu1  ;;  %8069 = vmatprep.subr.bf16.mxu0 %v9186_v13  ;;  %v9627_v13 = vmov 0.0  }
 0x2ea   :  { %v10074_v1 = vadd.f32 %v7916_v40, %v2774_v39  ;;  %v9199_v39 = vld [vmem:[#allocation10 + $0xd8] sm:$0xff]  }
 0x2eb   :  { %3592 = vmatmul.mubr.bf16.vlgmr.msra.gmra.mrb[8].mxu0 %v9889_v35 }
 0x2ec   :  { %3601 = vmatprep.mubr.bf16.mxu0 %v10013_v62  ;;  %8070 = vmatpush3.bf16.msra.mxu0 %v9188_v16 }
 0x2ed   :  { %8071 = vmatprep.subr.bf16.mxu0 %v9190_v55  ;;  %v3724_v55 = vrot.slane %v3715_v44, %v1056_v54 }
 0x2f3   :  { %3602 = vmatmul.mubr.bf16.gmra.mrb[32].mxu0 %v10023_v37 }
 0x2fe   :  { %v7936_v58 = vpop.f32.mrb[40].mxu1 }
 0x2ff   :  { %v7937_v61 = vpop.f32.mrb[41].mxu1 }
 0x300   :  { %v10079_v29 = vadd.f32 %v7937_v61, %v7936_v58  ;;  %v7939_v51 = vpop.f32.mrb[42].mxu1 }
 0x301   :  { %v7940_v47 = vpop.f32.mrb[43].mxu1 }
 0x302   :  { %v10081_v46 = vadd.f32 %v7940_v47, %v7939_v51  ;;  %v9209_v47 = vld [vmem:[#allocation10 + $0x130] sm:$0xff]  }
 0x305   :  { %v2673_v36 = vpop.f32.mrb[20].mxu0 }
 0x306   :  { %v10084_v22 = vadd.f32 %v2673_v36, %v10065_v7  ;;  %v7942_v8 = vpop.f32.mrb[44].mxu1  ;;  %v2675_v30 = vpop.f32.mrb[21].mxu0  ;;  %v9191_v7 = vld [vmem:[#allocation10 + $0xc8] sm:$0xff]   ;;  %v9211_v36 = vld [vmem:[#allocation10 + $0xf0] sm:$0xff]  }
 0x307   :  { %v10087_v35 = vadd.f32 %v2675_v30, %v10068_v9  ;;  %v7943_v62 = vpop.f32.mrb[45].mxu1  ;;  %v2677_v48 = vpop.f32.mrb[22].mxu0  ;;  %v9192_v9 = vld [vmem:[#allocation10 + $0x248] sm:$0xff]   ;;  %7979 = vmatpush3.bf16.msra.mxu1 %v9191_v7 }
 0x308   :  { %v10089_v37 = vadd.f32 %v7943_v62, %v7942_v8  ;;  %v7945_v17 = vpop.f32.mrb[46].mxu1  ;;  %v2678_v32 = vpop.f32.mrb[23].mxu0  ;;  %8072 = vmatpush3.bf16.msra.mxu0 %v9192_v9  ;;  %7980 = vmatprep.subr.bf16.mxu1 %v9193_v0  ;;  %v9213_v8 = vld [vmem:[#allocation10 + $0x138] sm:$0xff]  }
 0x309   :  { %v7946_v18 = vpop.f32.mrb[47].mxu1  ;;  %8073 = vmatprep.subr.bf16.mxu0 %v9194_v63  ;;  %v9214_v48 = vld [vmem:[#allocation10 + $0x2b8] sm:$0xff]  }
 0x30a   :  { %v9216_v32 = vld [vmem:[#allocation10 + $0x278] sm:$0xff]  }
 0x30b   :  { %7981 = vmatpush3.bf16.msra.mxu1 %v9195_v19 }
 0x30c   :  { %8074 = vmatpush3.bf16.msra.mxu0 %v9196_v20  ;;  %7982 = vmatprep.subr.bf16.mxu1 %v9197_v26 }
 0x30d   :  { %8075 = vmatprep.subr.bf16.mxu0 %v9198_v33 }
 0x30f   :  { %7983 = vmatpush3.bf16.msra.mxu1 %v9199_v39 }
 0x310   :  { %8076 = vmatpush3.bf16.msra.mxu0 %v9200_v43  ;;  %7984 = vmatprep.subr.bf16.mxu1 %v9201_v10 }
 0x311   :  { %8077 = vmatprep.subr.bf16.mxu0 %v9202_v31 }
 0x313   :  { %7985 = vmatpush3.bf16.msra.mxu1 %v9203_v11  ;;  %v9218_v11 = vld [vmem:[#allocation10 + $0x140] sm:$0xff]  }
 0x314   :  { %8078 = vmatpush3.bf16.msra.mxu0 %v9204_v60  ;;  %7986 = vmatprep.subr.bf16.mxu1 %v9205_v56  ;;  %v9219_v60 = vld [vmem:[#allocation10 + $0x300] sm:$0xff]  }
 0x315   :  { %8079 = vmatprep.subr.bf16.mxu0 %v9206_v27 }
 0x317   :  { %7987 = vmatpush3.bf16.msra.mxu1 %v9207_v59 }
 0x318   :  { %8080 = vmatpush3.bf16.msra.mxu0 %v9208_v23  ;;  %7988 = vmatprep.subr.bf16.mxu1 %v9209_v47  ;;  %v9229_v47 = vld [vmem:[#allocation10 + $0x360] sm:$0xff]  }
 0x319   :  { %8081 = vmatprep.subr.bf16.mxu0 %v9210_v53  ;;  %v9230_v53 = vld [vmem:[#allocation10 + $0x160] sm:$0xff]  }
 0x31b   :  { %7989 = vmatpush3.bf16.msra.mxu1 %v9211_v36  ;;  %v9232_v36 = vld [vmem:[#allocation10 + $0x368] sm:$0xff]  }
 0x31c   :  { %7990 = vmatprep.subr.bf16.mxu1 %v9213_v8  ;;  %v9234_v8 = vld [vmem:[#allocation10 + $0x328] sm:$0xff]  }
 0x31f   :  { %v7964_v41 = vpop.f32.mrb[48].mxu1 }
 0x320   :  { %v7965_v12 = vpop.f32.mrb[49].mxu1 }
 0x321   :  { %v7966_v49 = vadd.f32 %v7965_v12, %v7964_v41  ;;  %v7967_v50 = vpop.f32.mrb[50].mxu1 }
 0x322   :  { %v7968_v25 = vpop.f32.mrb[51].mxu1 }
 0x323   :  { %v3693_v3 = vadd.f32 %v7966_v49, %v10079_v29  ;;  %v7969_v5 = vadd.f32 %v7968_v25, %v7967_v50  ;;  %v9220_v49 = vld [vmem:[#allocation10 + $0x348] sm:$0xff]  }
 0x325   :  { %v10093_v4 = vadd.f32 %v3693_v3, %v10070_v42  ;;  %v3696_v6 = vadd.f32 %v7969_v5, %v10081_v46 }
 0x327   :  { %v3711_v21 = vadd.f32 %v3696_v6, %v10072_v34  ;;  %v7970_v45 = vpop.f32.mrb[52].mxu1  ;;  %v9212_v34 = vld [vmem:[#allocation10 + $0x270] sm:$0xff]   ;;  %v9222_v6 = vld [vmem:[#allocation10 + $0x308] sm:$0xff]  }
 0x328   :  { %v7971_v40 = vpop.f32.mrb[53].mxu1  ;;  %8082 = vmatpush3.bf16.msra.mxu0 %v9212_v34  ;;  %v9233_v34 = vld [vmem:[#allocation10 + $0x168] sm:$0xff]  }
 0x329   :  { %v10102_v14 = vadd.f32 %v10098_v38, %v3711_v21  ;;  %v7972_v24 = vadd.f32 %v7971_v40, %v7970_v45  ;;  %v7973_v58 = vpop.f32.mrb[54].mxu1  ;;  %8083 = vmatprep.subr.bf16.mxu0 %v9214_v48  ;;  %v9223_v45 = vld [vmem:[#allocation10 + $0x350] sm:$0xff]  }
 0x32a   :  { %v7974_v61 = vpop.f32.mrb[55].mxu1  ;;  %v9225_v58 = vld [vmem:[#allocation10 + $0x310] sm:$0xff]  }
 0x32b   :  { %v3701_v29 = vadd.f32 %v7972_v24, %v10089_v37  ;;  %v9224_v24 = vld [vmem:[#allocation10 + $0x150] sm:$0xff]   ;;  %v9226_v61 = vld [vmem:[#allocation10 + $0x358] sm:$0xff]  }
 0x32c   :  { %8084 = vmatpush3.bf16.msra.mxu0 %v9216_v32  ;;  %v9236_v48 = vld [vmem:[#allocation10 + $0x170] sm:$0xff]   ;;  %v9238_v32 = vld [vmem:[#allocation10 + $0x378] sm:$0xff]  }
 0x32d   :  { %v3714_v42 = vadd.f32 %v3701_v29, %v10074_v1  ;;  %v9215_v1 = vld [vmem:[#allocation10 + $0xf8] sm:$0xff]   ;;  %8100 = vmatprep.subr.bf16.mxu0 %v9217_v15 }
 0x32e   :  { %7991 = vmatpush3.bf16.msra.mxu1 %v9215_v1  ;;  %v9227_v29 = vld [vmem:[#allocation10 + $0x158] sm:$0xff]  }
 0x32f   :  { %v10107_v51 = vadd.f32 %v10098_v38, %v3714_v42  ;;  %8348 = vmatprep.subr.bf16.mxu1 %v9627_v13  ;;  %v9228_v42 = vld [vmem:[#allocation10 + $0x318] sm:$0xff]  }
 0x346   :  { %v2724_v46 = vpop.f32.mrb[24].mxu0 }
 0x347   :  { %v2725_v30 = vadd.f32 %v2724_v46, %v10084_v22  ;;  %v2726_v62 = vpop.f32.mrb[25].mxu0  ;;  %v9231_v46 = vld [vmem:[#allocation10 + $0x320] sm:$0xff]  }
 0x348   :  { %v2727_v17 = vadd.f32 %v2726_v62, %v10087_v35  ;;  %v2728_v37 = vpop.f32.mrb[26].mxu0  ;;  %v10114_v35 = vrot.slane %v3715_v44, %v1052_v52  ;;  %v9221_v44 = vld [vmem:[#allocation10 + $0x148] sm:$0xff]   ;;  %v9235_v62 = vld [vmem:[#allocation10 + $0x370] sm:$0xff]  }
 0x349   :  { %v2729_v18 = vpop.f32.mrb[27].mxu0 }
 0x34a   :  { %v9239_v18 = vld [vmem:[#allocation10 + $0x178] sm:$0xff]  }
 0x386   :  { %v3552_v22 = vpop.f32.mrb[28].mxu0 }
 0x387   :  { %v3554_v57 = vpop.f32.mrb[29].mxu0 }
 0x388   :  { %v3556_v16 = vpop.f32.mrb[30].mxu0 }
 0x389   :  { %v3557_v2 = vpop.f32.mrb[31].mxu0  ;;  %v9243_v16 = vld [vmem:[#allocation10] sm:$0xff]  }
 0x3be   :  { %v3593_v7 = vpop.f32.mrb[8].mxu0 }
 0x3bf   :  { %v3732_v9 = vadd.f32 %v10114_v35, %v3593_v7  ;;  %v3595_v0 = vpop.f32.mrb[9].mxu0  ;;  %v9245_v7 = vld [vmem:[#allocation10 + $0x48] sm:$0xff]  }
 0x3c0   :  { %v3733_v63 = vadd.f32 %v3724_v55, %v3595_v0  ;;  %v10119_v19 = vpop.f32.mrb[10].mxu0 }
 0x3c1   :  { %v3741_v20 = vmax.f32 %v3732_v9, 0.0  ;;  %v3599_v26 = vpop.f32.mrb[11].mxu0  ;;  %v3735_v1 = vadd.f32 %v10114_v35, %v10119_v19  ;;  %v9246_v9 = vld [vmem:[#allocation10 + $0x408] sm:$0xff]  }
 0x3c2   :  { %v3742_v33 = vmax.f32 %v3733_v63, 0.0  ;;  %v3736_v39 = vadd.f32 %v3724_v55, %v3599_v26  ;;  %v9247_v63 = vld [vmem:[#allocation10 + $0x8] sm:$0xff]   ;;  %v9250_v26 = vld [vmem:[#allocation10 + $0x410] sm:$0xff]  }
 0x3c3   :  { %v10121_v43 = vpack.c.bf16 %v3741_v20, %v3741_v20  ;;  %v3744_v15 = vmax.f32 %v3735_v1, 0.0  ;;  %v9248_v19 = vld [vmem:[#allocation10 + $0x3c8] sm:$0xff]   ;;  %v9249_v20 = vld [vmem:[#allocation10 + $0x50] sm:$0xff]   ;;  %v9286_v1 = vld [vmem:[#allocation10 + $0xa0] sm:$0xff]  }
 0x3c4   :  { %v10123_v10 = vpack.c.bf16 %v3742_v33, %v3742_v33  ;;  %v3745_v52 = vmax.f32 %v3736_v39, 0.0  ;;  %v9251_v33 = vld [vmem:[#allocation10 + $0x10] sm:$0xff]  }
 0x3c5   :  { %v3853_v56 = vrot.slane %v10121_v43, 1  ;;  %v4636_v27 = vrot.slane %v10121_v43, 3  ;;  %v10152_v2 = vpack.c.bf16 %v3744_v15, %v3744_v15  ;;  %v9252_v39 = vld [vmem:[#allocation10 + $0x3d0] sm:$0xff]   ;;  %v9290_v15 = vld [vmem:[#allocation10 + $0x4a8] sm:$0xff]  }
 0x3c6   :  { %v3603_v31 = vpop.f32.mrb[32].mxu0  ;;  %v3854_v28 = vrot.slane %v10123_v10, 1  ;;  %v4637_v54 = vrot.slane %v10123_v10, 3  ;;  %v10129_v50 = vpack.c.bf16 %v3745_v52, %v3745_v52  ;;  %v9253_v52 = vld [vmem:[#allocation10 + $0x58] sm:$0xff]  }
 0x3c7   :  { %v3604_v59 = vadd.f32 %v3603_v31, %v3552_v22  ;;  %v3605_v23 = vpop.f32.mrb[33].mxu0  ;;  %v9241_v22 = vld [vmem:[#allocation10 + $0x40] sm:$0xff]   ;;  %v9254_v31 = vld [vmem:[#allocation10 + $0x418] sm:$0xff]  }
 0x3c8   :  { %v3606_v41 = vadd.f32 %v3605_v23, %v3554_v57  ;;  %v3607_v12 = vpop.f32.mrb[34].mxu0  ;;  %4035 = vmatprep.mubr.bf16.mxu1 %v3854_v28  ;;  %4818 = vmatprep.mubr.bf16.mxu0 %v4637_v54  ;;  %v9242_v57 = vld [vmem:[#allocation10 + $0x400] sm:$0xff]   ;;  %v5197_v0 = vrot.slane %v10129_v50, 1  ;;  %v9255_v28 = vld [vmem:[#allocation10 + $0x18] sm:$0xff]   ;;  %v9262_v23 = vld [vmem:[#allocation10 + $0x428] sm:$0xff]  }
 0x3c9   :  { %v3712_v25 = vadd.f32 %v3604_v59, %v2725_v30  ;;  %v3608_v3 = vpop.f32.mrb[35].mxu0  ;;  %4036 = vmatmul.mubr.bf16.vlgmr.msra.gmra.mrb[56].mxu1 %v3853_v56  ;;  %4819 = vmatmul.mubr.bf16.vlgmr.msra.gmra.mrb[36].mxu0 %v4636_v27  ;;  %v3734_v30 = vadd.f32 %v10098_v38, %v10093_v4  ;;  %v9240_v4 = vld [vmem:[#allocation10 + $0x338] sm:$0xff]   ;;  %v9259_v56 = vld [vmem:[#allocation10 + $0x20] sm:$0xff]   ;;  %v9261_v59 = vld [vmem:[#allocation10 + $0x68] sm:$0xff]  }
 0x3ca   :  { %v3713_v5 = vadd.f32 %v3606_v41, %v2727_v17  ;;  %8349 = vmatpush3.bf16.msra.mxu1 %v9218_v11  ;;  %8101 = vmatpush3.bf16.msra.mxu0 %v9219_v60  ;;  %v9237_v17 = vld [vmem:[#allocation10 + $0x330] sm:$0xff]   ;;  %v9256_v54 = vld [vmem:[#allocation10 + $0x3d8] sm:$0xff]   ;;  %v9257_v11 = vld [vmem:[#allocation10 + $0x60] sm:$0xff]  }
 0x3cb   :  { %v10132_v21 = vadd.f32 %v10114_v35, %v3712_v25  ;;  %5095 = vmatprep.mubr.bf16.mxu0 %v10129_v50  ;;  %8350 = vmatprep.subr.bf16.mxu1 %v9627_v13  ;;  %v3743_v37 = vmax.f32 %v3734_v30, 0.0  ;;  %v9258_v60 = vld [vmem:[#allocation10 + $0x420] sm:$0xff]   ;;  %v9263_v41 = vld [vmem:[#allocation10 + $0x28] sm:$0xff]   ;;  %v9266_v25 = vld [vmem:[#allocation10 + $0x430] sm:$0xff]  }
 0x3cc   :  { %v10136_v40 = vadd.f32 %v3724_v55, %v3713_v5  ;;  %8102 = vmatprep.subr.bf16.mxu0 %v9220_v49  ;;  %8364 = vmatprep.mubr.msk.bf16.mxu1 %vm9628_vm2, %v9627_v13  ;;  %v9244_v55 = vld [vmem:[#allocation10 + $0x3c0] sm:$0xff]   ;;  %v9264_v12 = vld [vmem:[#allocation10 + $0x3e8] sm:$0xff]   ;;  %v9265_v49 = vld [vmem:[#allocation10 + $0x70] sm:$0xff]  }
 0x3cd   :  { %v10149_v38 = vpack.c.bf16 %v3743_v37, %v3743_v37  ;;  %v9260_v27 = vld [vmem:[#allocation10 + $0x3e0] sm:$0xff]   ;;  %v9267_v3 = vld [vmem:[#allocation10 + $0x30] sm:$0xff]  }
 0x3ce   :  { %8351 = vmatpush3.bf16.msra.mxu1 %v9221_v44  ;;  %8103 = vmatpush3.bf16.msra.mxu0 %v9222_v6  ;;  %v9268_v5 = vld [vmem:[#allocation10 + $0x3f0] sm:$0xff]   ;;  %v9269_v44 = vld [vmem:[#allocation10 + $0x78] sm:$0xff]   ;;  %v9285_v37 = vld [vmem:[#allocation10 + $0x4e0] sm:$0xff]  }
 0x3cf   :  { %8352 = vmatprep.subr.bf16.mxu1 %v9627_v13  ;;  %8104 = vmatprep.subr.bf16.mxu0 %v9223_v45  ;;  %v3855_v35 = vrot.slane %v10149_v38, 1  ;;  %v9270_v6 = vld [vmem:[#allocation10 + $0x438] sm:$0xff]   ;;  %v9281_v30 = vld [vmem:[#allocation10 + $0x490] sm:$0xff]  }
 0x3d0   :  { %v9271_v45 = vld [vmem:[#allocation10 + $0x38] sm:$0xff]  }
 0x3d2   :  { %8353 = vmatpush3.bf16.msra.mxu1 %v9224_v24  ;;  %8105 = vmatpush3.bf16.msra.mxu0 %v9225_v58  ;;  %v9272_v24 = vld [vmem:[#allocation10 + $0x3f8] sm:$0xff]   ;;  %v9273_v58 = vld [vmem:[#allocation10 + $0x4c0] sm:$0xff]  }
 0x3d3   :  { %8354 = vmatprep.subr.bf16.mxu1 %v9627_v13  ;;  %8106 = vmatprep.subr.bf16.mxu0 %v9226_v61  ;;  %v9274_v61 = vld [vmem:[#allocation10 + $0x80] sm:$0xff]  }
 0x3d6   :  { %8355 = vmatpush3.bf16.msra.mxu1 %v9227_v29  ;;  %8107 = vmatpush3.bf16.msra.mxu0 %v9228_v42  ;;  %v9275_v29 = vld [vmem:[#allocation10 + $0x480] sm:$0xff]   ;;  %v5196_v42 = vrot.slane %v10152_v2, 1 }
 0x3d7   :  { %8356 = vmatprep.subr.bf16.mxu1 %v9627_v13  ;;  %8108 = vmatprep.subr.bf16.mxu0 %v9229_v47  ;;  %v9276_v47 = vld [vmem:[#allocation10 + $0x4c8] sm:$0xff]  }
 0x3da   :  { %8357 = vmatpush3.bf16.msra.mxu1 %v9230_v53  ;;  %8109 = vmatpush3.bf16.msra.mxu0 %v9231_v46  ;;  %v5477_v53 = vrot.slane %v10129_v50, 2  ;;  %v9277_v46 = vld [vmem:[#allocation10 + $0x88] sm:$0xff]  }
 0x3db   :  { %8358 = vmatprep.subr.bf16.mxu1 %v9627_v13  ;;  %8110 = vmatprep.subr.bf16.mxu0 %v9232_v36  ;;  %v9278_v36 = vld [vmem:[#allocation10 + $0x488] sm:$0xff]  }
 0x3de   :  { %8359 = vmatpush3.bf16.msra.mxu1 %v9233_v34  ;;  %8111 = vmatpush3.bf16.msra.mxu0 %v9234_v8  ;;  %v9279_v34 = vld [vmem:[#allocation10 + $0x4d0] sm:$0xff]  }
 0x3df   :  { %8360 = vmatprep.subr.bf16.mxu1 %v9627_v13  ;;  %8112 = vmatprep.subr.bf16.mxu0 %v9235_v62  ;;  %v9280_v8 = vld [vmem:[#allocation10 + $0x90] sm:$0xff]   ;;  %v9282_v62 = vld [vmem:[#allocation10 + $0x4d8] sm:$0xff]  }
 0x3e2   :  { %8361 = vmatpush3.bf16.msra.mxu1 %v9236_v48  ;;  %8113 = vmatpush3.bf16.msra.mxu0 %v9237_v17  ;;  %v9283_v48 = vld [vmem:[#allocation10 + $0x98] sm:$0xff]  }
 0x3e3   :  { %8362 = vmatprep.subr.bf16.mxu1 %v9627_v13  ;;  %8114 = vmatprep.subr.bf16.mxu0 %v9238_v32  ;;  %v9284_v17 = vld [vmem:[#allocation10 + $0x498] sm:$0xff]   ;;  %v9287_v32 = vld [vmem:[#allocation10 + $0x4a0] sm:$0xff]  }
 0x3e6   :  { %8363 = vmatpush3.bf16.msra.mxu1 %v9239_v18  ;;  %8115 = vmatpush3.bf16.msra.mxu0 %v9240_v4  ;;  %v9288_v18 = vld [vmem:[#allocation10 + $0x4e8] sm:$0xff]  }
 0x3e7   :  { %8007 = vmatprep.subr.bf16.mxu1 %v9241_v22  ;;  %8131 = vmatprep.subr.bf16.mxu0 %v9242_v57  ;;  %v9289_v4 = vld [vmem:[#allocation10 + $0xa8] sm:$0xff]   ;;  %v9291_v22 = vld [vmem:[#allocation10 + $0x4f0] sm:$0xff]  }
 0x3e8   :  { %v9292_v57 = vld [vmem:[#allocation10 + $0xb0] sm:$0xff]  }
 0x3e9   :  { %8365 = vmatmul.mubr.bf16.vlgmr.msra.gmra.mrb[60].mxu1 %v3855_v35  ;;  %5096 = vmatmul.mubr.bf16.vlgmr.msra.gmra.mrb[40].mxu0 %v10152_v2  ;;  %v9294_v35 = vld [vmem:[#allocation10 + $0x4f8] sm:$0xff]  }
 0x3ea   :  { %8008 = vmatpush3.bf16.msra.mxu1 %v9243_v16  ;;  %4259 = vmatprep.mubr.bf16.mxu1 %v10123_v10  ;;  %v9293_v16 = vld [vmem:[#allocation10 + $0x4b0] sm:$0xff]  }
 0x3eb   :  { %8132 = vmatpush3.bf16.msra.mxu0 %v9244_v55  ;;  %5378 = vmatprep.mubr.bf16.mxu0 %v5197_v0  ;;  %v9295_v55 = vld [vmem:[#allocation10 + $0xb8] sm:$0xff]   ;;  %v9298_v0 = vld [vmem:[#allocation10 + $0x580] sm:$0xff]  }
 0x3ec   :  { %8009 = vmatprep.subr.bf16.mxu1 %v9245_v7  ;;  %8133 = vmatprep.subr.bf16.mxu0 %v9246_v9  ;;  %v9296_v7 = vld [vmem:[#allocation10 + $0x4b8] sm:$0xff]   ;;  %v9297_v9 = vld [vmem:[#allocation10 + $0x1c0] sm:$0xff]  }
 0x3ee   :  { %8010 = vmatpush3.bf16.msra.mxu1 %v9247_v63  ;;  %v9299_v63 = vld [vmem:[#allocation10 + $0x180] sm:$0xff]  }
 0x3ef   :  { %8134 = vmatpush3.bf16.msra.mxu0 %v9248_v19  ;;  %8011 = vmatprep.subr.bf16.mxu1 %v9249_v20  ;;  %v9300_v19 = vld [vmem:[#allocation10 + $0x540] sm:$0xff]   ;;  %v5476_v20 = vrot.slane %v10152_v2, 2 }
 0x3f0   :  { %8135 = vmatprep.subr.bf16.mxu0 %v9250_v26  ;;  %v9301_v26 = vld [vmem:[#allocation10 + $0x1c8] sm:$0xff]  }
 0x3f2   :  { %8012 = vmatpush3.bf16.msra.mxu1 %v9251_v33  ;;  %v4357_v33 = vrot.slane %v10123_v10, 2  ;;  %v9309_v10 = vld [vmem:[#allocation10 + $0x1d8] sm:$0xff]  }
 0x3f3   :  { %8136 = vmatpush3.bf16.msra.mxu0 %v9252_v39  ;;  %8013 = vmatprep.subr.bf16.mxu1 %v9253_v52  ;;  %v9302_v39 = vld [vmem:[#allocation10 + $0x588] sm:$0xff]   ;;  %v5757_v52 = vrot.slane %v10129_v50, 3  ;;  %v9312_v50 = vld [vmem:[#allocation10 + $0x558] sm:$0xff]  }
 0x3f4   :  { %8137 = vmatprep.subr.bf16.mxu0 %v9254_v31  ;;  %v9303_v31 = vld [vmem:[#allocation10 + $0x188] sm:$0xff]  }
 0x3f6   :  { %8014 = vmatpush3.bf16.msra.mxu1 %v9255_v28  ;;  %v9304_v28 = vld [vmem:[#allocation10 + $0x548] sm:$0xff]  }
 0x3f7   :  { %8138 = vmatpush3.bf16.msra.mxu0 %v9256_v54  ;;  %8015 = vmatprep.subr.bf16.mxu1 %v9257_v11  ;;  %v9305_v54 = vld [vmem:[#allocation10 + $0x1d0] sm:$0xff]  }
 0x3f8   :  { %8139 = vmatprep.subr.bf16.mxu0 %v9258_v60  ;;  %v9306_v11 = vld [vmem:[#allocation10 + $0x590] sm:$0xff]  }
 0x3f9   :  { %v9307_v60 = vld [vmem:[#allocation10 + $0x190] sm:$0xff]  }
 0x3fa   :  { %8016 = vmatpush3.bf16.msra.mxu1 %v9259_v56  ;;  %v9308_v56 = vld [vmem:[#allocation10 + $0x550] sm:$0xff]  }
 0x3fb   :  { %8140 = vmatpush3.bf16.msra.mxu0 %v9260_v27  ;;  %8017 = vmatprep.subr.bf16.mxu1 %v9261_v59  ;;  %v9310_v27 = vld [vmem:[#allocation10 + $0x598] sm:$0xff]  }
 0x3fc   :  { %8141 = vmatprep.subr.bf16.mxu0 %v9262_v23  ;;  %v9311_v59 = vld [vmem:[#allocation10 + $0x198] sm:$0xff]   ;;  %v9313_v23 = vld [vmem:[#allocation10 + $0x1e0] sm:$0xff]  }
 0x3fe   :  { %8018 = vmatpush3.bf16.msra.mxu1 %v9263_v41  ;;  %v9314_v41 = vld [vmem:[#allocation10 + $0x5a0] sm:$0xff]  }
 0x3ff   :  { %8142 = vmatpush3.bf16.msra.mxu0 %v9264_v12  ;;  %8019 = vmatprep.subr.bf16.mxu1 %v9265_v49  ;;  %v9315_v12 = vld [vmem:[#allocation10 + $0x1a0] sm:$0xff]  }
 0x400   :  { %8143 = vmatprep.subr.bf16.mxu0 %v9266_v25  ;;  %v9316_v49 = vld [vmem:[#allocation10 + $0x560] sm:$0xff]   ;;  %v9317_v25 = vld [vmem:[#allocation10 + $0x1e8] sm:$0xff]  }
 0x402   :  { %8020 = vmatpush3.bf16.msra.mxu1 %v9267_v3  ;;  %v9318_v3 = vld [vmem:[#allocation10 + $0x5a8] sm:$0xff]  }
 0x403   :  { %8144 = vmatpush3.bf16.msra.mxu0 %v9268_v5  ;;  %8021 = vmatprep.subr.bf16.mxu1 %v9269_v44  ;;  %v9319_v5 = vld [vmem:[#allocation10 + $0x1a8] sm:$0xff]  }
 0x404   :  { %8145 = vmatprep.subr.bf16.mxu0 %v9270_v6  ;;  %v9320_v44 = vld [vmem:[#allocation10 + $0x568] sm:$0xff]   ;;  %v9321_v6 = vld [vmem:[#allocation10 + $0x1f0] sm:$0xff]  }
 0x406   :  { %8022 = vmatpush3.bf16.msra.mxu1 %v9271_v45  ;;  %v9322_v45 = vld [vmem:[#allocation10 + $0x5b0] sm:$0xff]  }
 0x407   :  { %8146 = vmatpush3.bf16.msra.mxu0 %v9272_v24  ;;  %8368 = vmatprep.subr.bf16.mxu1 %v9627_v13  ;;  %v9323_v24 = vld [vmem:[#allocation10 + $0x1b0] sm:$0xff]  }
 0x408   :  { %8162 = vmatprep.subr.bf16.mxu0 %v9273_v58  ;;  %v9324_v58 = vld [vmem:[#allocation10 + $0x570] sm:$0xff]  }
 0x409   :  { %4260 = vmatmul.mubr.bf16.vlgmr.msra.gmra.mrb[64].mxu1 %v10121_v43 }
 0x40a   :  { %5379 = vmatmul.mubr.bf16.vlgmr.msra.gmra.mrb[44].mxu0 %v5196_v42  ;;  %8369 = vmatpush3.bf16.msra.mxu1 %v9274_v61  ;;  %v9325_v61 = vld [vmem:[#allocation10 + $0x1f8] sm:$0xff]  }
 0x40b   :  { %8163 = vmatpush3.bf16.msra.mxu0 %v9275_v29  ;;  %5658 = vmatprep.mubr.bf16.mxu0 %v5477_v53  ;;  %v9326_v29 = vld [vmem:[#allocation10 + $0x5b8] sm:$0xff]   ;;  %v9329_v53 = vld [vmem:[#allocation10 + $0x640] sm:$0xff]  }
 0x40c   :  { %8370 = vmatprep.subr.bf16.mxu1 %v9627_v13  ;;  %8164 = vmatprep.subr.bf16.mxu0 %v9276_v47  ;;  %v9327_v42 = vld [vmem:[#allocation10 + $0x1b8] sm:$0xff]  }
 0x40d   :  { %8384 = vmatprep.mubr.msk.bf16.mxu1 %vm9628_vm2, %v9627_v13  ;;  %v9328_v47 = vld [vmem:[#allocation10 + $0x578] sm:$0xff]  }
 0x40e   :  { %8371 = vmatpush3.bf16.msra.mxu1 %v9277_v46  ;;  %v3748_v46 = vmax.f32 %v10136_v40, 0.0  ;;  %v9334_v40 = vld [vmem:[#allocation10 + $0x608] sm:$0xff]  }
 0x40f   :  { %8165 = vmatpush3.bf16.msra.mxu0 %v9278_v36  ;;  %8372 = vmatprep.subr.bf16.mxu1 %v9627_v13  ;;  %v9330_v36 = vld [vmem:[#allocation10 + $0x200] sm:$0xff]  }
 0x410   :  { %8166 = vmatprep.subr.bf16.mxu0 %v9279_v34  ;;  %v4356_v34 = vrot.slane %v10121_v43, 2  ;;  %v9335_v43 = vld [vmem:[#allocation10 + $0x650] sm:$0xff]  }
 0x412   :  { %8373 = vmatpush3.bf16.msra.mxu1 %v9280_v8  ;;  %v9331_v8 = vld [vmem:[#allocation10 + $0x600] sm:$0xff]  }
 0x413   :  { %8167 = vmatpush3.bf16.msra.mxu0 %v9281_v30  ;;  %8374 = vmatprep.subr.bf16.mxu1 %v9627_v13  ;;  %v5756_v30 = vrot.slane %v10152_v2, 3  ;;  %v9336_v2 = vld [vmem:[#allocation10 + $0x210] sm:$0xff]  }
 0x414   :  { %8168 = vmatprep.subr.bf16.mxu0 %v9282_v62  ;;  %v9332_v62 = vld [vmem:[#allocation10 + $0x648] sm:$0xff]  }
 0x416   :  { %8375 = vmatpush3.bf16.msra.mxu1 %v9283_v48  ;;  %v10179_v48 = vpack.c.bf16 %v3748_v46, %v3748_v46  ;;  %v9380_v46 = vld [vmem:[#allocation10 + $0x7c8] sm:$0xff]  }
 0x417   :  { %8169 = vmatpush3.bf16.msra.mxu0 %v9284_v17  ;;  %8376 = vmatprep.subr.bf16.mxu1 %v9627_v13  ;;  %v9333_v17 = vld [vmem:[#allocation10 + $0x208] sm:$0xff]  }
 0x418   :  { %8170 = vmatprep.subr.bf16.mxu0 %v9285_v37  ;;  %v9337_v37 = vld [vmem:[#allocation10 + $0x610] sm:$0xff]  }
 0x41a   :  { %8377 = vmatpush3.bf16.msra.mxu1 %v9286_v1  ;;  %v9338_v1 = vld [vmem:[#allocation10 + $0x658] sm:$0xff]  }
 0x41b   :  { %8171 = vmatpush3.bf16.msra.mxu0 %v9287_v32  ;;  %8378 = vmatprep.subr.bf16.mxu1 %v9627_v13  ;;  %v9339_v32 = vld [vmem:[#allocation10 + $0x218] sm:$0xff]  }
 0x41c   :  { %8172 = vmatprep.subr.bf16.mxu0 %v9288_v18  ;;  %v9340_v18 = vld [vmem:[#allocation10 + $0x618] sm:$0xff]  }
 0x41e   :  { %8379 = vmatpush3.bf16.msra.mxu1 %v9289_v4  ;;  %v9341_v4 = vld [vmem:[#allocation10 + $0x660] sm:$0xff]  }
 0x41f   :  { %8173 = vmatpush3.bf16.msra.mxu0 %v9290_v15  ;;  %8380 = vmatprep.subr.bf16.mxu1 %v9627_v13  ;;  %v9342_v15 = vld [vmem:[#allocation10 + $0x220] sm:$0xff]  }
 0x420   :  { %8174 = vmatprep.subr.bf16.mxu0 %v9291_v22  ;;  %v9343_v22 = vld [vmem:[#allocation10 + $0x620] sm:$0xff]  }
 0x422   :  { %8381 = vmatpush3.bf16.msra.mxu1 %v9292_v57  ;;  %v9344_v57 = vld [vmem:[#allocation10 + $0x668] sm:$0xff]  }
 0x423   :  { %8175 = vmatpush3.bf16.msra.mxu0 %v9293_v16  ;;  %8382 = vmatprep.subr.bf16.mxu1 %v9627_v13  ;;  %v9345_v16 = vld [vmem:[#allocation10 + $0x228] sm:$0xff]  }
 0x424   :  { %8176 = vmatprep.subr.bf16.mxu0 %v9294_v35  ;;  %v9346_v35 = vld [vmem:[#allocation10 + $0x628] sm:$0xff]  }
 0x426   :  { %8383 = vmatpush3.bf16.msra.mxu1 %v9295_v55  ;;  %v9347_v55 = vld [vmem:[#allocation10 + $0x670] sm:$0xff]  }
 0x427   :  { %8177 = vmatpush3.bf16.msra.mxu0 %v9296_v7  ;;  %8038 = vmatprep.subr.bf16.mxu1 %v9297_v9  ;;  %v9348_v7 = vld [vmem:[#allocation10 + $0x230] sm:$0xff]  }
 0x428   :  { %8193 = vmatprep.subr.bf16.mxu0 %v9298_v0  ;;  %v9349_v9 = vld [vmem:[#allocation10 + $0x630] sm:$0xff]   ;;  %v9350_v0 = vld [vmem:[#allocation10 + $0x678] sm:$0xff]  }
 0x429   :  { %8385 = vmatmul.mubr.bf16.vlgmr.msra.gmra.mrb[68].mxu1 %v10149_v38 }
 0x42a   :  { %5659 = vmatmul.mubr.bf16.vlgmr.msra.gmra.mrb[48].mxu0 %v5476_v20  ;;  %8039 = vmatpush3.bf16.msra.mxu1 %v9299_v63  ;;  %v9351_v63 = vld [vmem:[#allocation10 + $0x238] sm:$0xff]   ;;  %v3747_v20 = vmax.f32 %v10132_v21, 0.0  ;;  %v9357_v21 = vld [vmem:[#allocation10 + $0x2c8] sm:$0xff]  }
 0x42b   :  { %4538 = vmatprep.mubr.bf16.mxu1 %v4357_v33  ;;  %8194 = vmatpush3.bf16.msra.mxu0 %v9300_v19  ;;  %v9352_v19 = vld [vmem:[#allocation10 + $0x638] sm:$0xff]   ;;  %v9354_v33 = vld [vmem:[#allocation10 + $0x2c0] sm:$0xff]  }
 0x42c   :  { %5938 = vmatprep.mubr.bf16.mxu0 %v5757_v52  ;;  %8040 = vmatprep.subr.bf16.mxu1 %v9301_v26  ;;  %v9353_v26 = vld [vmem:[#allocation10 + $0x700] sm:$0xff]  }
 0x42d   :  { %8195 = vmatprep.subr.bf16.mxu0 %v9302_v39  ;;  %v4358_v39 = vrot.slane %v10149_v38, 2  ;;  %v9355_v52 = vld [vmem:[#allocation10 + $0x6c0] sm:$0xff]  }
 0x42e   :  { %8041 = vmatpush3.bf16.msra.mxu1 %v9303_v31  ;;  %v10194_v31 = vpack.c.bf16 %v3747_v20, %v3747_v20 }
 0x42f   :  { %8196 = vmatpush3.bf16.msra.mxu0 %v9304_v28  ;;  %8042 = vmatprep.subr.bf16.mxu1 %v9305_v54  ;;  %v9356_v28 = vld [vmem:[#allocation10 + $0x708] sm:$0xff]   ;;  %v6317_v54 = vrot.slane %v10179_v48, 1 }
 0x430   :  { %8197 = vmatprep.subr.bf16.mxu0 %v9306_v11  ;;  %v9358_v11 = vld [vmem:[#allocation10 + $0x6c8] sm:$0xff]  }
 0x432   :  { %8043 = vmatpush3.bf16.msra.mxu1 %v9307_v60  ;;  %v9359_v60 = vld [vmem:[#allocation10 + $0x710] sm:$0xff]  }
 0x433   :  { %8198 = vmatpush3.bf16.msra.mxu0 %v9308_v56  ;;  %8044 = vmatprep.subr.bf16.mxu1 %v9309_v10  ;;  %v9360_v56 = vld [vmem:[#allocation10 + $0x2d0] sm:$0xff]  }
 0x434   :  { %8199 = vmatprep.subr.bf16.mxu0 %v9310_v27  ;;  %v9361_v10 = vld [vmem:[#allocation10 + $0x6d0] sm:$0xff]   ;;  %v9362_v27 = vld [vmem:[#allocation10 + $0x718] sm:$0xff]  }
 0x436   :  { %8045 = vmatpush3.bf16.msra.mxu1 %v9311_v59  ;;  %v9363_v59 = vld [vmem:[#allocation10 + $0x2d8] sm:$0xff]  }
 0x437   :  { %8200 = vmatpush3.bf16.msra.mxu0 %v9312_v50  ;;  %8046 = vmatprep.subr.bf16.mxu1 %v9313_v23  ;;  %v9364_v50 = vld [vmem:[#allocation10 + $0x6d8] sm:$0xff]   ;;  %v9365_v23 = vld [vmem:[#allocation10 + $0x720] sm:$0xff]  }
 0x438   :  { %8201 = vmatprep.subr.bf16.mxu0 %v9314_v41  ;;  %v9366_v41 = vld [vmem:[#allocation10 + $0x2e0] sm:$0xff]  }
 0x43a   :  { %8047 = vmatpush3.bf16.msra.mxu1 %v9315_v12  ;;  %v9367_v12 = vld [vmem:[#allocation10 + $0x6e0] sm:$0xff]  }
 0x43b   :  { %8202 = vmatpush3.bf16.msra.mxu0 %v9316_v49  ;;  %8048 = vmatprep.subr.bf16.mxu1 %v9317_v25  ;;  %v9368_v49 = vld [vmem:[#allocation10 + $0x728] sm:$0xff]  }
 0x43c   :  { %8203 = vmatprep.subr.bf16.mxu0 %v9318_v3  ;;  %v9369_v25 = vld [vmem:[#allocation10 + $0x2e8] sm:$0xff]  }
 0x43d   :  { %v9370_v3 = vld [vmem:[#allocation10 + $0x6e8] sm:$0xff]  }
 0x43e   :  { %8049 = vmatpush3.bf16.msra.mxu1 %v9319_v5  ;;  %v9371_v5 = vld [vmem:[#allocation10 + $0x730] sm:$0xff]  }
 0x43f   :  { %8204 = vmatpush3.bf16.msra.mxu0 %v9320_v44  ;;  %8050 = vmatprep.subr.bf16.mxu1 %v9321_v6  ;;  %v9372_v44 = vld [vmem:[#allocation10 + $0x2f0] sm:$0xff]  }
 0x440   :  { %8205 = vmatprep.subr.bf16.mxu0 %v9322_v45  ;;  %v9373_v6 = vld [vmem:[#allocation10 + $0x6f0] sm:$0xff]   ;;  %v9374_v45 = vld [vmem:[#allocation10 + $0x738] sm:$0xff]  }
 0x442   :  { %8051 = vmatpush3.bf16.msra.mxu1 %v9323_v24  ;;  %v9375_v24 = vld [vmem:[#allocation10 + $0x2f8] sm:$0xff]  }
 0x443   :  { %8206 = vmatpush3.bf16.msra.mxu0 %v9324_v58  ;;  %8052 = vmatprep.subr.bf16.mxu1 %v9325_v61  ;;  %v9376_v58 = vld [vmem:[#allocation10 + $0x6f8] sm:$0xff]   ;;  %v9377_v61 = vld [vmem:[#allocation10 + $0x7c0] sm:$0xff]  }
 0x444   :  { %8207 = vmatprep.subr.bf16.mxu0 %v9326_v29  ;;  %v9378_v29 = vld [vmem:[#allocation10 + $0x380] sm:$0xff]  }
 0x446   :  { %8053 = vmatpush3.bf16.msra.mxu1 %v9327_v42  ;;  %v4638_v42 = vrot.slane %v10149_v38, 3  ;;  %v9383_v38 = vld [vmem:[#allocation10 + $0x7d0] sm:$0xff]  }
 0x447   :  { %8208 = vmatpush3.bf16.msra.mxu0 %v9328_v47  ;;  %8388 = vmatprep.subr.bf16.mxu1 %v9627_v13  ;;  %v9379_v47 = vld [vmem:[#allocation10 + $0x780] sm:$0xff]  }
 0x448   :  { %8224 = vmatprep.subr.bf16.mxu0 %v9329_v53  ;;  %v6316_v53 = vrot.slane %v10194_v31, 1 }
 0x449   :  { %4539 = vmatmul.mubr.bf16.vlgmr.msra.gmra.mrb[72].mxu1 %v4356_v34  ;;  %v9381_v34 = vld [vmem:[#allocation10 + $0x388] sm:$0xff]  }
 0x44a   :  { %5939 = vmatmul.mubr.bf16.vlgmr.msra.gmra.mrb[52].mxu0 %v5756_v30  ;;  %8389 = vmatpush3.bf16.msra.mxu1 %v9330_v36  ;;  %v6597_v36 = vrot.slane %v10179_v48, 2  ;;  %v9384_v30 = vld [vmem:[#allocation10 + $0x390] sm:$0xff]  }
 0x44b   :  { %8225 = vmatpush3.bf16.msra.mxu0 %v9331_v8  ;;  %6215 = vmatprep.mubr.bf16.mxu0 %v10179_v48  ;;  %v9382_v8 = vld [vmem:[#allocation10 + $0x788] sm:$0xff]  }
 0x44c   :  { %8390 = vmatprep.subr.bf16.mxu1 %v9627_v13  ;;  %8226 = vmatprep.subr.bf16.mxu0 %v9332_v62  ;;  %v9385_v62 = vld [vmem:[#allocation10 + $0x790] sm:$0xff]  }
 0x44d   :  { %8404 = vmatprep.mubr.msk.bf16.mxu1 %vm9628_vm2, %v9627_v13 }
 0x44e   :  { %8391 = vmatpush3.bf16.msra.mxu1 %v9333_v17  ;;  %v9386_v17 = vld [vmem:[#allocation10 + $0x7d8] sm:$0xff]  }
 0x44f   :  { %8227 = vmatpush3.bf16.msra.mxu0 %v9334_v40  ;;  %8392 = vmatprep.subr.bf16.mxu1 %v9627_v13  ;;  %v9387_v40 = vld [vmem:[#allocation10 + $0x398] sm:$0xff]  }
 0x450   :  { %8228 = vmatprep.subr.bf16.mxu0 %v9335_v43  ;;  %v9388_v43 = vld [vmem:[#allocation10 + $0x798] sm:$0xff]  }
 0x452   :  { %8393 = vmatpush3.bf16.msra.mxu1 %v9336_v2  ;;  %v9389_v2 = vld [vmem:[#allocation10 + $0x7e0] sm:$0xff]  }
 0x453   :  { %8229 = vmatpush3.bf16.msra.mxu0 %v9337_v37  ;;  %8394 = vmatprep.subr.bf16.mxu1 %v9627_v13  ;;  %v9390_v37 = vld [vmem:[#allocation10 + $0x3a0] sm:$0xff]  }
 0x454   :  { %8230 = vmatprep.subr.bf16.mxu0 %v9338_v1  ;;  %v9391_v1 = vld [vmem:[#allocation10 + $0x7a0] sm:$0xff]  }
 0x456   :  { %8395 = vmatpush3.bf16.msra.mxu1 %v9339_v32  ;;  %v9392_v32 = vld [vmem:[#allocation10 + $0x7e8] sm:$0xff]  }
 0x457   :  { %8231 = vmatpush3.bf16.msra.mxu0 %v9340_v18  ;;  %8396 = vmatprep.subr.bf16.mxu1 %v9627_v13  ;;  %v9393_v18 = vld [vmem:[#allocation10 + $0x3a8] sm:$0xff]  }
 0x458   :  { %8232 = vmatprep.subr.bf16.mxu0 %v9341_v4  ;;  %v9394_v4 = vld [vmem:[#allocation10 + $0x7a8] sm:$0xff]  }
 0x45a   :  { %8397 = vmatpush3.bf16.msra.mxu1 %v9342_v15 }
 0x45b   :  { %8233 = vmatpush3.bf16.msra.mxu0 %v9343_v22  ;;  %8398 = vmatprep.subr.bf16.mxu1 %v9627_v13 }
 0x45c   :  { %8234 = vmatprep.subr.bf16.mxu0 %v9344_v57  ;;  %v9395_v57 = vld [vmem:[#allocation10 + $0x7f0] sm:$0xff]  }
 0x45e   :  { %8399 = vmatpush3.bf16.msra.mxu1 %v9345_v16 }
 0x45f   :  { %8235 = vmatpush3.bf16.msra.mxu0 %v9346_v35  ;;  %8400 = vmatprep.subr.bf16.mxu1 %v9627_v13 }
 0x460   :  { %8236 = vmatprep.subr.bf16.mxu0 %v9347_v55 }
 0x462   :  { %8401 = vmatpush3.bf16.msra.mxu1 %v9348_v7 }
 0x463   :  { %8237 = vmatpush3.bf16.msra.mxu0 %v9349_v9  ;;  %8402 = vmatprep.subr.bf16.mxu1 %v9627_v13 }
 0x464   :  { %8238 = vmatprep.subr.bf16.mxu0 %v9350_v0 }
 0x466   :  { %8403 = vmatpush3.bf16.msra.mxu1 %v9351_v63  ;;  %v9396_v63 = vld [vmem:[#allocation10 + $0x3b0] sm:$0xff]  }
 0x467   :  { %8239 = vmatpush3.bf16.msra.mxu0 %v9352_v19  ;;  %8408 = vmatprep.subr.bf16.mxu1 %v9627_v13 }
 0x468   :  { %8255 = vmatprep.subr.bf16.mxu0 %v9353_v26  ;;  %v9397_v26 = vld [vmem:[#allocation10 + $0x7b0] sm:$0xff]  }
 0x469   :  { %8405 = vmatmul.mubr.bf16.vlgmr.msra.gmra.mrb[76].mxu1 %v4358_v39  ;;  %v9399_v39 = vld [vmem:[#allocation10 + $0x3b8] sm:$0xff]  }
 0x46a   :  { %6216 = vmatmul.mubr.bf16.vlgmr.msra.gmra.mrb[56].mxu0 %v10194_v31  ;;  %8409 = vmatpush3.bf16.msra.mxu1 %v9354_v33  ;;  %v9398_v33 = vld [vmem:[#allocation10 + $0x7f8] sm:$0xff]  }
 0x46b   :  { %8256 = vmatpush3.bf16.msra.mxu0 %v9355_v52  ;;  %6498 = vmatprep.mubr.bf16.mxu0 %v6317_v54  ;;  %v3746_v52 = vmax.f32 %v10102_v14, 0.0  ;;  %v9401_v54 = vld [vmem:[#allocation10 + $0x880] sm:$0xff]   ;;  %v6877_v14 = vrot.slane %v10179_v48, 3  ;;  %v9410_v48 = vld [vmem:[#allocation10 + $0x898] sm:$0xff]  }
 0x46c   :  { %8410 = vmatprep.subr.bf16.mxu1 %v9627_v13  ;;  %8257 = vmatprep.subr.bf16.mxu0 %v9356_v28  ;;  %v9400_v28 = vld [vmem:[#allocation10 + $0x7b8] sm:$0xff]  }
 0x46d   :  { %8424 = vmatprep.mubr.msk.bf16.mxu1 %vm9628_vm2, %v9627_v13 }
 0x46e   :  { %8411 = vmatpush3.bf16.msra.mxu1 %v9357_v21  ;;  %v9402_v21 = vld [vmem:[#allocation10 + $0x440] sm:$0xff]  }
 0x46f   :  { %8258 = vmatpush3.bf16.msra.mxu0 %v9358_v11  ;;  %8412 = vmatprep.subr.bf16.mxu1 %v9627_v13  ;;  %v10225_v11 = vpack.c.bf16 %v3746_v52, %v3746_v52 }
 0x470   :  { %8259 = vmatprep.subr.bf16.mxu0 %v9359_v60  ;;  %v9403_v60 = vld [vmem:[#allocation10 + $0x840] sm:$0xff]  }
 0x471   :  { %v5478_v52 = vrot.slane %v10225_v11, 2 }
 0x472   :  { %8413 = vmatpush3.bf16.msra.mxu1 %v9360_v56  ;;  %v6596_v56 = vrot.slane %v10194_v31, 2 }
 0x473   :  { %8260 = vmatpush3.bf16.msra.mxu0 %v9361_v10  ;;  %8414 = vmatprep.subr.bf16.mxu1 %v9627_v13  ;;  %v9404_v10 = vld [vmem:[#allocation10 + $0x888] sm:$0xff]  }
 0x474   :  { %8261 = vmatprep.subr.bf16.mxu0 %v9362_v27  ;;  %v9405_v27 = vld [vmem:[#allocation10 + $0x448] sm:$0xff]  }
 0x476   :  { %8415 = vmatpush3.bf16.msra.mxu1 %v9363_v59  ;;  %v9406_v59 = vld [vmem:[#allocation10 + $0x848] sm:$0xff]  }
 0x477   :  { %8262 = vmatpush3.bf16.msra.mxu0 %v9364_v50  ;;  %8416 = vmatprep.subr.bf16.mxu1 %v9627_v13  ;;  %v9407_v50 = vld [vmem:[#allocation10 + $0x890] sm:$0xff]  }
 0x478   :  { %8263 = vmatprep.subr.bf16.mxu0 %v9365_v23  ;;  %v9408_v23 = vld [vmem:[#allocation10 + $0x450] sm:$0xff]  }
 0x47a   :  { %8417 = vmatpush3.bf16.msra.mxu1 %v9366_v41  ;;  %v9409_v41 = vld [vmem:[#allocation10 + $0x850] sm:$0xff]  }
 0x47b   :  { %8264 = vmatpush3.bf16.msra.mxu0 %v9367_v12  ;;  %8418 = vmatprep.subr.bf16.mxu1 %v9627_v13  ;;  %v9411_v12 = vld [vmem:[#allocation10 + $0x458] sm:$0xff]  }
 0x47c   :  { %8265 = vmatprep.subr.bf16.mxu0 %v9368_v49  ;;  %v9412_v49 = vld [vmem:[#allocation10 + $0x858] sm:$0xff]  }
 0x47e   :  { %8419 = vmatpush3.bf16.msra.mxu1 %v9369_v25  ;;  %v9413_v25 = vld [vmem:[#allocation10 + $0x8a0] sm:$0xff]  }
 0x47f   :  { %8266 = vmatpush3.bf16.msra.mxu0 %v9370_v3  ;;  %8420 = vmatprep.subr.bf16.mxu1 %v9627_v13  ;;  %v9414_v3 = vld [vmem:[#allocation10 + $0x460] sm:$0xff]  }
 0x480   :  { %8267 = vmatprep.subr.bf16.mxu0 %v9371_v5  ;;  %v9415_v5 = vld [vmem:[#allocation10 + $0x860] sm:$0xff]  }
 0x482   :  { %8421 = vmatpush3.bf16.msra.mxu1 %v9372_v44  ;;  %v9416_v44 = vld [vmem:[#allocation10 + $0x8a8] sm:$0xff]  }
 0x483   :  { %8268 = vmatpush3.bf16.msra.mxu0 %v9373_v6  ;;  %8422 = vmatprep.subr.bf16.mxu1 %v9627_v13  ;;  %v9417_v6 = vld [vmem:[#allocation10 + $0x468] sm:$0xff]  }
 0x484   :  { %8269 = vmatprep.subr.bf16.mxu0 %v9374_v45  ;;  %v9418_v45 = vld [vmem:[#allocation10 + $0x868] sm:$0xff]  }
 0x486   :  { %8423 = vmatpush3.bf16.msra.mxu1 %v9375_v24 }
 0x487   :  { %8270 = vmatpush3.bf16.msra.mxu0 %v9376_v58  ;;  %8428 = vmatprep.subr.bf16.mxu1 %v9627_v13 }
 0x488   :  { %8286 = vmatprep.subr.bf16.mxu0 %v9377_v61  ;;  %v9419_v61 = vld [vmem:[#allocation10 + $0x8b0] sm:$0xff]  }
 0x489   :  { %8425 = vmatmul.mubr.bf16.vlgmr.msra.gmra.mrb[80].mxu1 %v4638_v42 }
 0x48a   :  { %6499 = vmatmul.mubr.bf16.vlgmr.msra.gmra.mrb[60].mxu0 %v6316_v53  ;;  %8429 = vmatpush3.bf16.msra.mxu1 %v9378_v29 }
 0x48b   :  { %8287 = vmatpush3.bf16.msra.mxu0 %v9379_v47  ;;  %6778 = vmatprep.mubr.bf16.mxu0 %v6597_v36 }
 0x48c   :  { %8430 = vmatprep.subr.bf16.mxu1 %v9627_v13  ;;  %8288 = vmatprep.subr.bf16.mxu0 %v9380_v46 }
 0x48d   :  { %8444 = vmatprep.mubr.msk.bf16.mxu1 %vm9628_vm2, %v9627_v13 }
 0x48e   :  { %8431 = vmatpush3.bf16.msra.mxu1 %v9381_v34  ;;  %v9420_v34 = vld [vmem:[#allocation10 + $0x470] sm:$0xff]  }
 0x48f   :  { %8289 = vmatpush3.bf16.msra.mxu0 %v9382_v8  ;;  %8432 = vmatprep.subr.bf16.mxu1 %v9627_v13 }
 0x490   :  { %8290 = vmatprep.subr.bf16.mxu0 %v9383_v38 }
 0x492   :  { %8433 = vmatpush3.bf16.msra.mxu1 %v9384_v30  ;;  %v9421_v30 = vld [vmem:[#allocation10 + $0x870] sm:$0xff]  }
 0x493   :  { %8291 = vmatpush3.bf16.msra.mxu0 %v9385_v62  ;;  %8434 = vmatprep.subr.bf16.mxu1 %v9627_v13  ;;  %v9422_v62 = vld [vmem:[#allocation10 + $0x8b8] sm:$0xff]  }
 0x494   :  { %8292 = vmatprep.subr.bf16.mxu0 %v9386_v17  ;;  %v9423_v17 = vld [vmem:[#allocation10 + $0x478] sm:$0xff]  }
 0x496   :  { %8435 = vmatpush3.bf16.msra.mxu1 %v9387_v40  ;;  %v9424_v40 = vld [vmem:[#allocation10 + $0x878] sm:$0xff]  }
 0x497   :  { %8293 = vmatpush3.bf16.msra.mxu0 %v9388_v43  ;;  %8436 = vmatprep.subr.bf16.mxu1 %v9627_v13  ;;  %v9425_v43 = vld [vmem:[#allocation10 + $0x500] sm:$0xff]  }
 0x498   :  { %8294 = vmatprep.subr.bf16.mxu0 %v9389_v2  ;;  %v5198_v2 = vrot.slane %v10225_v11, 1 }
 0x49a   :  { %8437 = vmatpush3.bf16.msra.mxu1 %v9390_v37  ;;  %v6876_v37 = vrot.slane %v10194_v31, 3  ;;  %v9430_v31 = vld [vmem:[#allocation10 + $0x528] sm:$0xff]  }
 0x49b   :  { %8295 = vmatpush3.bf16.msra.mxu0 %v9391_v1  ;;  %8438 = vmatprep.subr.bf16.mxu1 %v9627_v13  ;;  %v9426_v1 = vld [vmem:[#allocation10 + $0x508] sm:$0xff]  }
 0x49c   :  { %v7992_v15 = vpop.f32.mrb[56].mxu1  ;;  %v8085_v22 = vpop.f32.mrb[36].mxu0  ;;  %8296 = vmatprep.subr.bf16.mxu0 %v9392_v32  ;;  %v9427_v32 = vld [vmem:[#allocation10 + $0x510] sm:$0xff]  }
 0x49d   :  { %v7993_v16 = vpop.f32.mrb[57].mxu1  ;;  %v8086_v35 = vpop.f32.mrb[37].mxu0 }
 0x49e   :  { %v10218_v55 = vadd.f32 %v7993_v16, %v7992_v15  ;;  %v10220_v7 = vadd.f32 %v8086_v35, %v8085_v22  ;;  %8439 = vmatpush3.bf16.msra.mxu1 %v9393_v18  ;;  %v7995_v9 = vpop.f32.mrb[58].mxu1  ;;  %v8088_v0 = vpop.f32.mrb[38].mxu0  ;;  %v9428_v18 = vld [vmem:[#allocation10 + $0x518] sm:$0xff]  }
 0x49f   :  { %8297 = vmatpush3.bf16.msra.mxu0 %v9394_v4  ;;  %v7996_v19 = vpop.f32.mrb[59].mxu1  ;;  %v8089_v20 = vpop.f32.mrb[39].mxu0  ;;  %8440 = vmatprep.subr.bf16.mxu1 %v9627_v13  ;;  %v9429_v4 = vld [vmem:[#allocation10 + $0x520] sm:$0xff]   ;;  %v9431_v9 = vld [vmem:[#allocation10 + $0x530] sm:$0xff]  }
 0x4a0   :  { %8298 = vmatprep.subr.bf16.mxu0 %v9395_v57 }
 0x4a2   :  { %8441 = vmatpush3.bf16.msra.mxu1 %v9396_v63 }
 0x4a3   :  { %8299 = vmatpush3.bf16.msra.mxu0 %v9397_v26  ;;  %8442 = vmatprep.subr.bf16.mxu1 %v9627_v13 }
 0x4a4   :  { %8300 = vmatprep.subr.bf16.mxu0 %v9398_v33  ;;  %v9432_v33 = vld [vmem:[#allocation10 + $0x538] sm:$0xff]  }
 0x4a6   :  { %8443 = vmatpush3.bf16.msra.mxu1 %v9399_v39  ;;  %v9433_v39 = vld [vmem:[#allocation10 + $0x5c0] sm:$0xff]  }
 0x4a7   :  { %8301 = vmatpush3.bf16.msra.mxu0 %v9400_v28  ;;  %8448 = vmatprep.subr.bf16.mxu1 %v9627_v13  ;;  %v9434_v28 = vld [vmem:[#allocation10 + $0x5c8] sm:$0xff]  }
 0x4a8   :  { %8317 = vmatprep.subr.bf16.mxu0 %v9401_v54  ;;  %v9435_v54 = vld [vmem:[#allocation10 + $0x5d0] sm:$0xff]  }
 0x4a9   :  { %8445 = vmatmul.mubr.bf16.vlgmr.msra.gmra.mrb[84].mxu1 %v10225_v11 }
 0x4aa   :  { %6779 = vmatmul.mubr.bf16.vlgmr.msra.gmra.mrb[64].mxu0 %v6596_v56  ;;  %8449 = vmatpush3.bf16.msra.mxu1 %v9402_v21  ;;  %v9436_v21 = vld [vmem:[#allocation10 + $0x5d8] sm:$0xff]   ;;  %v9438_v56 = vld [vmem:[#allocation10 + $0x5e8] sm:$0xff]  }
 0x4ab   :  { %8318 = vmatpush3.bf16.msra.mxu0 %v9403_v60  ;;  %7058 = vmatprep.mubr.bf16.mxu0 %v6877_v14  ;;  %v9437_v60 = vld [vmem:[#allocation10 + $0x5e0] sm:$0xff]  }
 0x4ac   :  { %8450 = vmatprep.subr.bf16.mxu1 %v9627_v13  ;;  %8319 = vmatprep.subr.bf16.mxu0 %v9404_v10 }
 0x4ad   :  { %8464 = vmatprep.mubr.msk.bf16.mxu1 %vm9628_vm2, %v9627_v13 }
 0x4ae   :  { %8451 = vmatpush3.bf16.msra.mxu1 %v9405_v27 }
 0x4af   :  { %8320 = vmatpush3.bf16.msra.mxu0 %v9406_v59  ;;  %8452 = vmatprep.subr.bf16.mxu1 %v9627_v13 }
 0x4b0   :  { %8321 = vmatprep.subr.bf16.mxu0 %v9407_v50 }
 0x4b2   :  { %8453 = vmatpush3.bf16.msra.mxu1 %v9408_v23 }
 0x4b3   :  { %8322 = vmatpush3.bf16.msra.mxu0 %v9409_v41  ;;  %8454 = vmatprep.subr.bf16.mxu1 %v9627_v13  ;;  %v9439_v41 = vld [vmem:[#allocation10 + $0x5f0] sm:$0xff]  }
 0x4b4   :  { %8323 = vmatprep.subr.bf16.mxu0 %v9410_v48 }
 0x4b6   :  { %8455 = vmatpush3.bf16.msra.mxu1 %v9411_v12 }
 0x4b7   :  { %8324 = vmatpush3.bf16.msra.mxu0 %v9412_v49  ;;  %8456 = vmatprep.subr.bf16.mxu1 %v9627_v13 }
 0x4b8   :  { %8325 = vmatprep.subr.bf16.mxu0 %v9413_v25 }
 0x4ba   :  { %8457 = vmatpush3.bf16.msra.mxu1 %v9414_v3  ;;  %v9440_v3 = vld [vmem:[#allocation10 + $0x5f8] sm:$0xff]  }
 0x4bb   :  { %8326 = vmatpush3.bf16.msra.mxu0 %v9415_v5  ;;  %8458 = vmatprep.subr.bf16.mxu1 %v9627_v13  ;;  %v9441_v5 = vld [vmem:[#allocation10 + $0x680] sm:$0xff]  }
 0x4bc   :  { %v4077_v24 = vpop.f32.mrb[60].mxu1  ;;  %v8116_v58 = vpop.f32.mrb[40].mxu0  ;;  %8327 = vmatprep.subr.bf16.mxu0 %v9416_v44  ;;  %v5758_v44 = vrot.slane %v10225_v11, 3  ;;  %v9445_v11 = vld [vmem:[#allocation10 + $0x6a0] sm:$0xff]  }
 0x4bd   :  { %v4078_v29 = vadd.f32 %v10218_v55, %v4077_v24  ;;  %v8366_v42 = vpop.f32.mrb[61].mxu1  ;;  %v8117_v47 = vpop.f32.mrb[41].mxu0  ;;  %v9444_v24 = vld [vmem:[#allocation10 + $0x698] sm:$0xff]  }
 0x4be   :  { %v10239_v53 = vadd.f32 %v8117_v47, %v8116_v58  ;;  %v4080_v46 = vpop.f32.mrb[62].mxu1  ;;  %v8119_v36 = vpop.f32.mrb[42].mxu0  ;;  %8459 = vmatpush3.bf16.msra.mxu1 %v9417_v6  ;;  %v9442_v6 = vld [vmem:[#allocation10 + $0x688] sm:$0xff]  }
 0x4bf   :  { %8328 = vmatpush3.bf16.msra.mxu0 %v9418_v45  ;;  %v8367_v8 = vpop.f32.mrb[63].mxu1  ;;  %v8120_v38 = vpop.f32.mrb[43].mxu0  ;;  %8460 = vmatprep.subr.bf16.mxu1 %v9627_v13  ;;  %v9443_v45 = vld [vmem:[#allocation10 + $0x690] sm:$0xff]   ;;  %v9446_v58 = vld [vmem:[#allocation10 + $0x6a8] sm:$0xff]  }
 0x4c0   :  { %8329 = vmatprep.subr.bf16.mxu0 %v9419_v61 }
 0x4c2   :  { %8461 = vmatpush3.bf16.msra.mxu1 %v9420_v34  ;;  %v9447_v34 = vld [vmem:[#allocation10 + $0x6b0] sm:$0xff]  }
 0x4c3   :  { %8330 = vmatpush3.bf16.msra.mxu0 %v9421_v30  ;;  %8462 = vmatprep.subr.bf16.mxu1 %v9627_v13 }
 0x4c4   :  { %8331 = vmatprep.subr.bf16.mxu0 %v9422_v62 }
 0x4c6   :  { %8463 = vmatpush3.bf16.msra.mxu1 %v9423_v17  ;;  %v9448_v17 = vld [vmem:[#allocation10 + $0x6b8] sm:$0xff]  }
 0x4c7   :  { %8332 = vmatpush3.bf16.msra.mxu0 %v9424_v40  ;;  %8468 = vmatprep.subr.bf16.mxu1 %v9627_v13  ;;  %v3749_v40 = vmax.f32 %v10107_v51, 0.0  ;;  %v9452_v51 = vld [vmem:[#allocation10 + $0x758] sm:$0xff]  }
 0x4c9   :  { %8465 = vmatmul.mubr.bf16.vlgmr.msra.gmra.mrb[88].mxu1 %v5198_v2  ;;  %v10286_v2 = vpack.c.bf16 %v3749_v40, %v3749_v40 }
 0x4ca   :  { %7059 = vmatmul.mubr.bf16.vlgmr.msra.gmra.mrb[68].mxu0 %v6876_v37  ;;  %8469 = vmatpush3.bf16.msra.mxu1 %v9425_v43  ;;  %v9449_v43 = vld [vmem:[#allocation10 + $0x740] sm:$0xff]   ;;  %v9450_v37 = vld [vmem:[#allocation10 + $0x748] sm:$0xff]  }
 0x4cb   :  { %8470 = vmatprep.subr.bf16.mxu1 %v9627_v13  ;;  %8484 = vmatprep.mubr.msk.bf16.mxu1 %vm9628_vm2, %v9627_v13 }
 0x4ce   :  { %8471 = vmatpush3.bf16.msra.mxu1 %v9426_v1  ;;  %v9451_v1 = vld [vmem:[#allocation10 + $0x750] sm:$0xff]  }
 0x4cf   :  { %8472 = vmatprep.subr.bf16.mxu1 %v9627_v13 }
 0x4d2   :  { %8473 = vmatpush3.bf16.msra.mxu1 %v9427_v32  ;;  %v9453_v32 = vld [vmem:[#allocation10 + $0x760] sm:$0xff]  }
 0x4d3   :  { %8474 = vmatprep.subr.bf16.mxu1 %v9627_v13 }
 0x4d6   :  { %8475 = vmatpush3.bf16.msra.mxu1 %v9428_v18  ;;  %v9454_v18 = vld [vmem:[#allocation10 + $0x768] sm:$0xff]  }
 0x4d7   :  { %8476 = vmatprep.subr.bf16.mxu1 %v9627_v13 }
 0x4da   :  { %8477 = vmatpush3.bf16.msra.mxu1 %v9429_v4 }
 0x4db   :  { %8478 = vmatprep.subr.bf16.mxu1 %v9627_v13 }
 0x4dc   :  { %v8023_v15 = vpop.f32.mrb[64].mxu1 }
 0x4dd   :  { %v8147_v22 = vpop.f32.mrb[44].mxu0  ;;  %v8024_v57 = vpop.f32.mrb[65].mxu1 }
 0x4de   :  { %v8025_v16 = vadd.f32 %v8024_v57, %v8023_v15  ;;  %v8148_v35 = vpop.f32.mrb[45].mxu0  ;;  %v8026_v55 = vpop.f32.mrb[66].mxu1  ;;  %8479 = vmatpush3.bf16.msra.mxu1 %v9430_v31 }
 0x4df   :  { %v10253_v0 = vadd.f32 %v8148_v35, %v8147_v22  ;;  %v8150_v63 = vpop.f32.mrb[46].mxu0  ;;  %v8027_v19 = vpop.f32.mrb[67].mxu1  ;;  %8480 = vmatprep.subr.bf16.mxu1 %v9627_v13  ;;  %v9455_v35 = vld [vmem:[#allocation10 + $0x770] sm:$0xff]  }
 0x4e0   :  { %v8151_v20 = vpop.f32.mrb[47].mxu0  ;;  %v4262_v26 = vadd.f32 %v8025_v16, %v4078_v29 }
 0x4e2   :  { %8481 = vmatpush3.bf16.msra.mxu1 %v9431_v9 }
 0x4e3   :  { %8482 = vmatprep.subr.bf16.mxu1 %v9627_v13 }
 0x4e6   :  { %8483 = vmatpush3.bf16.msra.mxu1 %v9432_v33  ;;  %v9457_v33 = vld [vmem:[#allocation10 + $0x800] sm:$0xff]  }
 0x4e7   :  { %8488 = vmatprep.subr.bf16.mxu1 %v9627_v13 }
 0x4e9   :  { %8485 = vmatmul.mubr.bf16.vlgmr.msra.gmra.mrb[92].mxu1 %v5478_v52  ;;  %v9458_v52 = vld [vmem:[#allocation10 + $0x808] sm:$0xff]  }
 0x4ea   :  { %8489 = vmatpush3.bf16.msra.mxu1 %v9433_v39  ;;  %8504 = vmatprep.mubr.msk.bf16.mxu1 %vm9628_vm2, %v9627_v13  ;;  %v6318_v39 = vrot.slane %v10286_v2, 1 }
 0x4eb   :  { %8490 = vmatprep.subr.bf16.mxu1 %v9627_v13 }
 0x4ee   :  { %8491 = vmatpush3.bf16.msra.mxu1 %v9434_v28  ;;  %v9459_v28 = vld [vmem:[#allocation10 + $0x810] sm:$0xff]  }
 0x4ef   :  { %8492 = vmatprep.subr.bf16.mxu1 %v9627_v13 }
 0x4f2   :  { %8493 = vmatpush3.bf16.msra.mxu1 %v9435_v54  ;;  %v9460_v54 = vld [vmem:[#allocation10 + $0x818] sm:$0xff]  }
 0x4f3   :  { %8494 = vmatprep.subr.bf16.mxu1 %v9627_v13 }
 0x4f6   :  { %8495 = vmatpush3.bf16.msra.mxu1 %v9436_v21  ;;  %v9461_v21 = vld [vmem:[#allocation10 + $0x820] sm:$0xff]  }
 0x4f7   :  { %8496 = vmatprep.subr.bf16.mxu1 %v9627_v13 }
 0x4fa   :  { %8497 = vmatpush3.bf16.msra.mxu1 %v9437_v60  ;;  %v9462_v60 = vld [vmem:[#allocation10 + $0x828] sm:$0xff]  }
 0x4fb   :  { %8498 = vmatprep.subr.bf16.mxu1 %v9627_v13 }
 0x4fc   :  { %v4301_v10 = vpop.f32.mrb[68].mxu1 }
 0x4fd   :  { %v10266_v14 = vadd.f32 %v4301_v10, %v4262_v26  ;;  %v8178_v27 = vpop.f32.mrb[48].mxu0  ;;  %v8386_v59 = vpop.f32.mrb[69].mxu1  ;;  %v9456_v26 = vld [vmem:[#allocation10 + $0x778] sm:$0xff]  }
 0x4fe   :  { %v8179_v50 = vpop.f32.mrb[49].mxu0  ;;  %v4304_v23 = vpop.f32.mrb[70].mxu1  ;;  %8499 = vmatpush3.bf16.msra.mxu1 %v9438_v56 }
 0x4ff   :  { %v10268_v48 = vadd.f32 %v8179_v50, %v8178_v27  ;;  %v8181_v12 = vpop.f32.mrb[50].mxu0  ;;  %v8387_v49 = vpop.f32.mrb[71].mxu1  ;;  %8500 = vmatprep.subr.bf16.mxu1 %v9627_v13  ;;  %v9463_v23 = vld [vmem:[#allocation10 + $0x830] sm:$0xff]  }
 0x500   :  { %v8182_v25 = vpop.f32.mrb[51].mxu0 }
 0x502   :  { %8501 = vmatpush3.bf16.msra.mxu1 %v9439_v41 }
 0x503   :  { %8502 = vmatprep.subr.bf16.mxu1 %v9627_v13 }
 0x506   :  { %8503 = vmatpush3.bf16.msra.mxu1 %v9440_v3 }
 0x507   :  { %8508 = vmatprep.subr.bf16.mxu1 %v9627_v13 }
 0x509   :  { %8505 = vmatmul.mubr.bf16.vlgmr.msra.gmra.mrb[96].mxu1 %v5758_v44  ;;  %v6598_v44 = vrot.slane %v10286_v2, 2 }
 0x50a   :  { %8509 = vmatpush3.bf16.msra.mxu1 %v9441_v5  ;;  %8524 = vmatprep.mubr.msk.bf16.mxu1 %vm9628_vm2, %v9627_v13  ;;  %v9464_v5 = vld [vmem:[#allocation10 + $0x838] sm:$0xff]  }
 0x50b   :  { %8510 = vmatprep.subr.bf16.mxu1 %v9627_v13 }
 0x50e   :  { %8511 = vmatpush3.bf16.msra.mxu1 %v9442_v6  ;;  %v9466_v6 = vld [vmem:[#allocation10 + $0x8c8] sm:$0xff]  }
 0x50f   :  { %8512 = vmatprep.subr.bf16.mxu1 %v9627_v13 }
 0x512   :  { %8513 = vmatpush3.bf16.msra.mxu1 %v9443_v45  ;;  %v9467_v45 = vld [vmem:[#allocation10 + $0x8d0] sm:$0xff]  }
 0x513   :  { %8514 = vmatprep.subr.bf16.mxu1 %v9627_v13 }
 0x516   :  { %8515 = vmatpush3.bf16.msra.mxu1 %v9444_v24  ;;  %v9468_v24 = vld [vmem:[#allocation10 + $0x8d8] sm:$0xff]  }
 0x517   :  { %8516 = vmatprep.subr.bf16.mxu1 %v9627_v13 }
 0x51a   :  { %8517 = vmatpush3.bf16.msra.mxu1 %v9445_v11  ;;  %v9469_v11 = vld [vmem:[#allocation10 + $0x8e0] sm:$0xff]  }
 0x51b   :  { %8518 = vmatprep.subr.bf16.mxu1 %v9627_v13 }
 0x51c   :  { %v8054_v61 = vpop.f32.mrb[72].mxu1 }
 0x51d   :  { %v8209_v29 = vpop.f32.mrb[52].mxu0  ;;  %v8055_v42 = vpop.f32.mrb[73].mxu1 }
 0x51e   :  { %v8056_v47 = vadd.f32 %v8055_v42, %v8054_v61  ;;  %v8210_v46 = vpop.f32.mrb[53].mxu0  ;;  %v8057_v36 = vpop.f32.mrb[74].mxu1  ;;  %8519 = vmatpush3.bf16.msra.mxu1 %v9446_v58  ;;  %v9470_v58 = vld [vmem:[#allocation10 + $0x8e8] sm:$0xff]  }
 0x51f   :  { %v10281_v8 = vadd.f32 %v8210_v46, %v8209_v29  ;;  %v8212_v38 = vpop.f32.mrb[54].mxu0  ;;  %v8058_v30 = vpop.f32.mrb[75].mxu1  ;;  %8520 = vmatprep.subr.bf16.mxu1 %v9627_v13 }
 0x520   :  { %v8213_v62 = vpop.f32.mrb[55].mxu0 }
 0x522   :  { %8521 = vmatpush3.bf16.msra.mxu1 %v9447_v34  ;;  %v9471_v34 = vld [vmem:[#allocation10 + $0x8f0] sm:$0xff]  }
 0x523   :  { %8522 = vmatprep.subr.bf16.mxu1 %v9627_v13 }
 0x526   :  { %8523 = vmatpush3.bf16.msra.mxu1 %v9448_v17 }
 0x527   :  { %8528 = vmatprep.subr.bf16.mxu1 %v9627_v13 }
 0x529   :  { %8525 = vmatmul.mubr.bf16.vlgmr.msra.gmra.mrb[100].mxu1 %v10286_v2 }
 0x52a   :  { %8529 = vmatpush3.bf16.msra.mxu1 %v9449_v43  ;;  %8544 = vmatprep.mubr.msk.bf16.mxu1 %vm9628_vm2, %v9627_v13  ;;  %v9472_v43 = vld [vmem:[#allocation10 + $0x8f8] sm:$0xff]  }
 0x52b   :  { %8530 = vmatprep.subr.bf16.mxu1 %v9627_v13 }
 0x52e   :  { %8531 = vmatpush3.bf16.msra.mxu1 %v9450_v37 }
 0x52f   :  { %8532 = vmatprep.subr.bf16.mxu1 %v9627_v13 }
 0x532   :  { %8533 = vmatpush3.bf16.msra.mxu1 %v9451_v1 }
 0x533   :  { %8534 = vmatprep.subr.bf16.mxu1 %v9627_v13 }
 0x536   :  { %8535 = vmatpush3.bf16.msra.mxu1 %v9452_v51 }
 0x537   :  { %8536 = vmatprep.subr.bf16.mxu1 %v9627_v13 }
 0x53a   :  { %8537 = vmatpush3.bf16.msra.mxu1 %v9453_v32 }
 0x53b   :  { %8538 = vmatprep.subr.bf16.mxu1 %v9627_v13 }
 0x53c   :  { %v4580_v4 = vpop.f32.mrb[76].mxu1 }
 0x53d   :  { %v4581_v31 = vadd.f32 %v8056_v47, %v4580_v4  ;;  %v8240_v15 = vpop.f32.mrb[56].mxu0  ;;  %v8406_v22 = vpop.f32.mrb[77].mxu1 }
 0x53e   :  { %v8241_v57 = vpop.f32.mrb[57].mxu0  ;;  %v4583_v16 = vpop.f32.mrb[78].mxu1  ;;  %8539 = vmatpush3.bf16.msra.mxu1 %v9454_v18 }
 0x53f   :  { %v4586_v55 = vadd.f32 %v4581_v31, %v10266_v14  ;;  %v10298_v9 = vadd.f32 %v8241_v57, %v8240_v15  ;;  %v8243_v63 = vpop.f32.mrb[58].mxu0  ;;  %v8407_v19 = vpop.f32.mrb[79].mxu1  ;;  %8540 = vmatprep.subr.bf16.mxu1 %v9627_v13 }
 0x540   :  { %v8244_v20 = vpop.f32.mrb[59].mxu0 }
 0x542   :  { %8541 = vmatpush3.bf16.msra.mxu1 %v9455_v35 }
 0x543   :  { %8542 = vmatprep.subr.bf16.mxu1 %v9627_v13 }
 0x546   :  { %8543 = vmatpush3.bf16.msra.mxu1 %v9456_v26 }
 0x547   :  { %8548 = vmatprep.subr.bf16.mxu1 %v9627_v13 }
 0x549   :  { %8545 = vmatmul.mubr.bf16.vlgmr.msra.gmra.mrb[104].mxu1 %v6318_v39 }
 0x54a   :  { %8549 = vmatpush3.bf16.msra.mxu1 %v9457_v33  ;;  %8564 = vmatprep.mubr.msk.bf16.mxu1 %vm9628_vm2, %v9627_v13 }
 0x54b   :  { %8550 = vmatprep.subr.bf16.mxu1 %v9627_v13 }
 0x54e   :  { %8551 = vmatpush3.bf16.msra.mxu1 %v9458_v52 }
 0x54f   :  { %8552 = vmatprep.subr.bf16.mxu1 %v9627_v13 }
 0x552   :  { %8553 = vmatpush3.bf16.msra.mxu1 %v9459_v28 }
 0x553   :  { %8554 = vmatprep.subr.bf16.mxu1 %v9627_v13 }
 0x556   :  { %8555 = vmatpush3.bf16.msra.mxu1 %v9460_v54 }
 0x557   :  { %8556 = vmatprep.subr.bf16.mxu1 %v9627_v13 }
 0x55a   :  { %8557 = vmatpush3.bf16.msra.mxu1 %v9461_v21 }
 0x55b   :  { %8558 = vmatprep.subr.bf16.mxu1 %v9627_v13 }
 0x55c   :  { %v4860_v56 = vpop.f32.mrb[80].mxu1 }
 0x55d   :  { %v4861_v10 = vadd.f32 %v10220_v7, %v4860_v56  ;;  %v8271_v14 = vpop.f32.mrb[60].mxu0  ;;  %v8426_v27 = vpop.f32.mrb[81].mxu1  ;;  %v9465_v7 = vld [vmem:[#allocation10 + $0x8c0] sm:$0xff]  }
 0x55e   :  { %v8272_v59 = vpop.f32.mrb[61].mxu0  ;;  %v4863_v50 = vpop.f32.mrb[82].mxu1  ;;  %8559 = vmatpush3.bf16.msra.mxu1 %v9462_v60 }
 0x55f   :  { %v4866_v41 = vadd.f32 %v4861_v10, %v4586_v55  ;;  %v10312_v12 = vadd.f32 %v8272_v59, %v8271_v14  ;;  %v8274_v49 = vpop.f32.mrb[62].mxu0  ;;  %v8427_v25 = vpop.f32.mrb[83].mxu1  ;;  %8560 = vmatprep.subr.bf16.mxu1 %v9627_v13 }
 0x560   :  { %v8275_v3 = vpop.f32.mrb[63].mxu0 }
 0x562   :  { %8561 = vmatpush3.bf16.msra.mxu1 %v9463_v23 }
 0x563   :  { %8562 = vmatprep.subr.bf16.mxu1 %v9627_v13 }
 0x566   :  { %8563 = vmatpush3.bf16.msra.mxu1 %v9464_v5 }
 0x567   :  { %8568 = vmatprep.subr.bf16.mxu1 %v9627_v13 }
 0x569   :  { %8565 = vmatmul.mubr.bf16.vlgmr.msra.gmra.mrb[108].mxu1 %v6598_v44 }
 0x56a   :  { %8569 = vmatpush3.bf16.msra.mxu1 %v9465_v7  ;;  %8584 = vmatprep.mubr.msk.bf16.mxu1 %vm9628_vm2, %v9627_v13 }
 0x56b   :  { %8570 = vmatprep.subr.bf16.mxu1 %v9627_v13 }
 0x56e   :  { %8571 = vmatpush3.bf16.msra.mxu1 %v9466_v6 }
 0x56f   :  { %8572 = vmatprep.subr.bf16.mxu1 %v9627_v13 }
 0x572   :  { %8573 = vmatpush3.bf16.msra.mxu1 %v9467_v45  ;;  %v7807_v45 = vld [vmem:[%s10355_s6] ss:$0 sm:$0xff] }
 0x573   :  { %8574 = vmatprep.subr.bf16.mxu1 %v9627_v13 }
 0x576   :  { %8575 = vmatpush3.bf16.msra.mxu1 %v9468_v24 }
 0x577   :  { %8576 = vmatprep.subr.bf16.mxu1 %v9627_v13 }
 0x57a   :  { %8577 = vmatpush3.bf16.msra.mxu1 %v9469_v11 }
 0x57b   :  { %8578 = vmatprep.subr.bf16.mxu1 %v9627_v13 }
 0x57c   :  { %v5137_v61 = vpop.f32.mrb[84].mxu1 }
 0x57d   :  { %v5138_v29 = vadd.f32 %v10239_v53, %v5137_v61  ;;  %v8302_v42 = vpop.f32.mrb[64].mxu0  ;;  %v8446_v47 = vpop.f32.mrb[85].mxu1  ;;  %v6878_v53 = vrot.slane %v10286_v2, 3 }
 0x57e   :  { %v8303_v46 = vpop.f32.mrb[65].mxu0  ;;  %v5140_v36 = vpop.f32.mrb[86].mxu1  ;;  %8579 = vmatpush3.bf16.msra.mxu1 %v9470_v58 }
 0x57f   :  { %v5143_v38 = vadd.f32 %v5138_v29, %v4866_v41  ;;  %v8304_v30 = vadd.f32 %v8303_v46, %v8302_v42  ;;  %v8305_v62 = vpop.f32.mrb[66].mxu0  ;;  %v8447_v17 = vpop.f32.mrb[87].mxu1  ;;  %8580 = vmatprep.subr.bf16.mxu1 %v9627_v13 }
 0x580   :  { %v8306_v40 = vpop.f32.mrb[67].mxu0 }
 0x582   :  { %8581 = vmatpush3.bf16.msra.mxu1 %v9471_v34 }
 0x583   :  { %8582 = vmatprep.subr.bf16.mxu1 %v9627_v13 }
 0x586   :  { %8583 = vmatpush3.bf16.msra.mxu1 %v9472_v43 }
 0x589   :  { %8585 = vmatmul.mubr.bf16.vlgmr.msra.gmra.mrb[112].mxu1 %v6878_v53 }
 0x59c   :  { %v5420_v37 = vpop.f32.mrb[88].mxu1 }
 0x59d   :  { %v5421_v1 = vadd.f32 %v10253_v0, %v5420_v37  ;;  %v8333_v51 = vpop.f32.mrb[68].mxu0  ;;  %v8466_v32 = vpop.f32.mrb[89].mxu1 }
 0x59e   :  { %v8334_v18 = vpop.f32.mrb[69].mxu0  ;;  %v5423_v4 = vpop.f32.mrb[90].mxu1 }
 0x59f   :  { %v5426_v31 = vadd.f32 %v5421_v1, %v5143_v38  ;;  %v8335_v15 = vadd.f32 %v8334_v18, %v8333_v51  ;;  %v8336_v22 = vpop.f32.mrb[70].mxu0  ;;  %v8467_v57 = vpop.f32.mrb[91].mxu1 }
 0x5a0   :  { %v8337_v16 = vpop.f32.mrb[71].mxu0 }
 0x5bc   :  { %v5700_v35 = vpop.f32.mrb[92].mxu1 }
 0x5bd   :  { %v5701_v55 = vadd.f32 %v10268_v48, %v5700_v35  ;;  %v8486_v13 = vpop.f32.mrb[93].mxu1 }
 0x5be   :  { %v5703_v63 = vpop.f32.mrb[94].mxu1 }
 0x5bf   :  { %v5706_v19 = vadd.f32 %v5701_v55, %v5426_v31  ;;  %v8487_v2 = vpop.f32.mrb[95].mxu1 }
 0x5dc   :  { %v5980_v20 = vpop.f32.mrb[96].mxu1 }
 0x5dd   :  { %v5981_v26 = vadd.f32 %v10281_v8, %v5980_v20  ;;  %v8506_v0 = vpop.f32.mrb[97].mxu1 }
 0x5de   :  { %v5983_v33 = vpop.f32.mrb[98].mxu1 }
 0x5df   :  { %v5986_v39 = vadd.f32 %v5981_v26, %v5706_v19  ;;  %v8507_v52 = vpop.f32.mrb[99].mxu1 }
 0x5fc   :  { %v6257_v28 = vpop.f32.mrb[100].mxu1 }
 0x5fd   :  { %v6258_v54 = vadd.f32 %v10298_v9, %v6257_v28  ;;  %v8526_v21 = vpop.f32.mrb[101].mxu1 }
 0x5fe   :  { %v6260_v60 = vpop.f32.mrb[102].mxu1 }
 0x5ff   :  { %v6263_v56 = vadd.f32 %v6258_v54, %v5986_v39  ;;  %v8527_v10 = vpop.f32.mrb[103].mxu1 }
 0x61c   :  { %v6540_v14 = vpop.f32.mrb[104].mxu1 }
 0x61d   :  { %v6541_v48 = vadd.f32 %v10312_v12, %v6540_v14  ;;  %v8546_v27 = vpop.f32.mrb[105].mxu1 }
 0x61e   :  { %v6543_v59 = vpop.f32.mrb[106].mxu1 }
 0x61f   :  { %v6546_v50 = vadd.f32 %v6541_v48, %v6263_v56  ;;  %v8547_v23 = vpop.f32.mrb[107].mxu1 }
 0x63c   :  { %v6820_v41 = vpop.f32.mrb[108].mxu1 }
 0x63d   :  { %v6821_v8 = vadd.f32 %v8304_v30, %v6820_v41  ;;  %v8566_v49 = vpop.f32.mrb[109].mxu1 }
 0x63e   :  { %v6823_v25 = vpop.f32.mrb[110].mxu1 }
 0x63f   :  { %v6826_v3 = vadd.f32 %v6821_v8, %v6546_v50  ;;  %v8567_v5 = vpop.f32.mrb[111].mxu1 }
 0x65c   :  { %v7100_v7 = vpop.f32.mrb[112].mxu1 }
 0x65d   :  { %v7101_v44 = vadd.f32 %v8335_v15, %v7100_v7  ;;  %v8586_v9 = vpop.f32.mrb[113].mxu1 }
 0x65e   :  { %v7103_v6 = vpop.f32.mrb[114].mxu1 }
 0x65f   :  { %v7106_v12 = vadd.f32 %v7101_v44, %v6826_v3  ;;  %v8587_v24 = vpop.f32.mrb[115].mxu1 }
 0x661   :  { %v7114_v11 = vadd.f32 %v7807_v45, %v7106_v12 }
 0x663   :  { %7115 = vst [vmem:[#allocation11] sm:$0x3] %v7114_v11 }
 0x664   :  { %9596 = shalt.err (!%p9593_p2)
}
 0x665   :  { %s9597_s1 = scalar_lea.hbm %s10356_s7, 32 }
 0x666   :  { %p9598_p3 = scmp.ne.s32.totalorder %s10356_s7, %s9597_s1  ;;  %p9601_p4 = scmp.lt.u32.totalorder %s9597_s1, %s10356_s7 }
 0x668   :  { %p9603_p5 = pnand %p9601_p4, %p9598_p3 }
 0x66a   :  { %9606 = shalt.err (!%p9603_p5)
}
 0x66b   :  { %7125 = dma.vmem_to_hbm [thread:$0]  %s7123_s21, 32, %s10356_s7, [#allocation4]  }
 0x66c   :  { %9613 = dma.done.wait [#allocation4], 32  }
 0x66d   :  { %9614 = vsyncadd [#allocation4], 4294967264 }
 0x66e   :  { %7129 = vsyncpa [#allocation3], 1 }
 0x66f   :  { %7130 = vsyncpa [#allocation6], 1 }
 0x670   :  { %7131 = vsyncpa [#allocation9], 1 }
 0x671   :  { %7132 = vsyncpa [#allocation4], 1 }

</bundles_post_ra>
